<compile_context>
chip_gen: v5e
topology: v5e:2x2
jax: 0.10.0
libtpu: 0.0.40
codegen_flags: <defaults>
</compile_context>

<pallas_src>
import jax
import jax.numpy as jnp
from jax.experimental import pallas as pl
from jax.experimental.pallas import tpu as pltpu

NEG_SLOPE = 0.01   # nn.LeakyReLU default negative slope
INV_ALPHA = 0.9    # InvLeakyRelu alpha


def _pad_to(n, m):
    return ((n + m - 1) // m) * m


def _cdiv(a, b):
    return -(-a // b)


def _device_kind():
    try:
        return jax.devices()[0].device_kind.lower()
    except Exception:
        return ""


def _mxu_is_256():
    # v6e / v7x have a 256x256 MXU; v2-v5 are 128-wide.
    k = _device_kind()
    return ("v6" in k) or ("v7" in k) or ("tpu7" in k)


def _vmem_capacity_bytes():
    try:
        return int(pltpu.get_tpu_info().vmem_capacity_bytes)
    except Exception:
        return 64 << 20   # conservative default (v7x per-TC VMEM)


# ----------------------------------------------------------------------------
# Kernel (factory: static config baked in via closure)
# ----------------------------------------------------------------------------
def make_kernel(depth, HP, HD, fuse_st, stash_lane):
    def kernel(x_ref, xc_ref, loc_ref, scale_ref,
               w1x_ref, w1c_ref, b1_ref,
               wh_ref, bh_ref, wo_ref, bo_ref,
               *out_refs):
        h_ref = out_refs[0]

        def leaky(y):
            return jnp.where(y >= 0, y, NEG_SLOPE * y)

        def mm(a_f32, w_bf16):
            # bf16 operands on the MXU, f32 accumulation.
            return jnp.dot(a_f32.astype(jnp.bfloat16), w_bf16,
                           preferred_element_type=jnp.float32)

        x = x_ref[...]                        # (TB, 2*HP) f32, halves pre-split
        xc = xc_ref[...]                      # (TB, CP)   f32

        # ------------- ActNorm (elementwise; logdet hoisted to wrapper) ------
        h = scale_ref[...] * (x + loc_ref[...])
        # ------------- InvLeakyRelu forward -----------------------------------
        h = h * jnp.where(h >= 0, jnp.float32(1.0), jnp.float32(INV_ALPHA))

        x0 = h[:, :HP]                        # lane-aligned slices (HP % 128 == 0)
        x1 = h[:, HP:]

        xc_b16 = xc.astype(jnp.bfloat16)

        def coupled_nets(i, x_apply):
            # Fused (s | t) first layer.  The cond part is computed lazily
            # per pass so only one (TB, 2*HD) cond activation is live.
            xc_part = jnp.dot(xc_b16, w1c_ref[i], preferred_element_type=jnp.float32)
            y = leaky(mm(x_apply, w1x_ref[i]) + xc_part + b1_ref[i])
            if fuse_st:
                # s/t hidden + output layers fused via block-diagonal weights:
                # one 2*HD-wide matmul per layer (full 256-wide MXU fill).
                for d in range(depth):
                    fi = i * depth + d
                    y = leaky(mm(y, wh_ref[fi]) + bh_ref[fi])
                yo = mm(y, wo_ref[i]) + bo_ref[i]
                s = jnp.tanh(yo[:, :HP])
                t = yo[:, HP:]
            else:
                ys = y[:, :HD]                # s-net hidden (aligned slice)
                yt = y[:, HD:]                # t-net hidden (aligned slice)
                for d in range(depth):
                    si = (2 * i + 0) * depth + d
                    ti = (2 * i + 1) * depth + d
                    ys = leaky(mm(ys, wh_ref[si]) + bh_ref[si])
                    yt = leaky(mm(yt, wh_ref[ti]) + bh_ref[ti])
                s = jnp.tanh(mm(ys, wo_ref[2 * i + 0]) + bo_ref[2 * i + 0])
                t = mm(yt, wo_ref[2 * i + 1]) + bo_ref[2 * i + 1]
            return s, t

        # ---------------- Coupling pass 0 ------------------------------------
        # NOTE (invariant): logdet sums s over all HP lanes.  This is correct
        # only because the wo/bo padding columns are exactly zero, so padded
        # s lanes are tanh(0) == 0.  pack_params() guarantees this.
        s0, t0 = coupled_nets(0, x0)
        x1 = x1 * jnp.exp(s0) + t0
        ld = jnp.sum(s0, axis=1, keepdims=True)

        # ---------------- Coupling pass 1 (halves swapped) --------------------
        s1, t1 = coupled_nets(1, x1)
        x0 = x0 * jnp.exp(s1) + t1
        ld = ld + jnp.sum(s1, axis=1, keepdims=True)

        # Output ordering of the coupling module is [x1', x0'].  Channel
        # shuffle and un-padding are a single gather in the wrapper.
        if stash_lane is None:
            h_ref[:, :HP] = x1
            h_ref[:, HP:] = x0
            out_refs[1][...] = jnp.broadcast_to(ld, out_refs[1].shape)
        else:
            # Stash the per-row logdet in an unused padding lane of the x1
            # block: no extra output stream / HBM writeback, store stays dense.
            lane = jax.lax.broadcasted_iota(jnp.int32, x1.shape, 1)
            h_ref[:, :HP] = jnp.where(lane == stash_lane, ld, x1)
            h_ref[:, HP:] = x0

    return kernel


# ----------------------------------------------------------------------------
# Parameters
# ----------------------------------------------------------------------------
def pack_params(p, fuse_st):
    """Build padded, fused, bf16 kernel weights from the f32 master params."""
    C = p["in_channels"]
    half = C // 2
    cond = p["cond_channels"]
    hidden = p["hidden_dim"]
    depth = p["depth"]

    HP = _pad_to(half, 128)
    CP = _pad_to(cond, 128)
    HD = _pad_to(hidden, 128)

    w1x = jnp.zeros((2, HP, 2 * HD), jnp.float32)
    w1c = jnp.zeros((2, CP, 2 * HD), jnp.float32)
    b1 = jnp.zeros((2, 1, 2 * HD), jnp.float32)
    if fuse_st:
        wh = jnp.zeros((2 * depth, 2 * HD, 2 * HD), jnp.float32)
        bh = jnp.zeros((2 * depth, 1, 2 * HD), jnp.float32)
        wo = jnp.zeros((2, 2 * HD, 2 * HP), jnp.float32)
        bo = jnp.zeros((2, 1, 2 * HP), jnp.float32)
    else:
        wh = jnp.zeros((4 * depth, HD, HD), jnp.float32)
        bh = jnp.zeros((4 * depth, 1, HD), jnp.float32)
        wo = jnp.zeros((4, HD, HP), jnp.float32)
        bo = jnp.zeros((4, 1, HP), jnp.float32)

    for i in range(2):                    # coupling pass
        for j in range(2):                # 0: s-net, 1: t-net
            n = 2 * i + j                 # master index in [s0, t0, s1, t1]
            c0 = j * HD
            W0 = p["w0"][n]               # (half + cond, hidden)
            w1x = w1x.at[i, :half, c0:c0 + hidden].set(W0[:half])
            w1c = w1c.at[i, :cond, c0:c0 + hidden].set(W0[half:])
            b1 = b1.at[i, 0, c0:c0 + hidden].set(p["b0"][n])
            if fuse_st:
                for d in range(depth):
                    fi = i * depth + d
                    wh = wh.at[fi, c0:c0 + hidden, c0:c0 + hidden].set(p["wh"][n][d])
                    bh = bh.at[fi, 0, c0:c0 + hidden].set(p["bh"][n][d])
                wo = wo.at[i, c0:c0 + hidden, j * HP:j * HP + half].set(p["wo"][n])
                bo = bo.at[i, 0, j * HP:j * HP + half].set(p["bo"][n])
            else:
                for d in range(depth):
                    fi = n * depth + d
                    wh = wh.at[fi, :hidden, :hidden].set(p["wh"][n][d])
                    bh = bh.at[fi, 0, :hidden].set(p["bh"][n][d])
                wo = wo.at[n, :hidden, :half].set(p["wo"][n])
                bo = bo.at[n, 0, :half].set(p["bo"][n])

    # ActNorm params in the split/padded channel layout (padding: scale=1, loc=0).
    loc = jnp.zeros((1, 2 * HP), jnp.float32)
    loc = loc.at[0, :half].set(p["loc"][0, :half])
    loc = loc.at[0, HP:HP + half].set(p["loc"][0, half:])
    scale = jnp.ones((1, 2 * HP), jnp.float32)
    scale = scale.at[0, :half].set(p["scale"][0, :half])
    scale = scale.at[0, HP:HP + half].set(p["scale"][0, half:])

    # Gather that combines un-padding of the kernel output with the Shuffle.
    perm = p["perm_idx"]
    gather_idx = jnp.where(perm < half, perm, perm - half + HP)

    # ActNorm logdet is data-independent: compute once, add in the wrapper.
    actnorm_logdet = jnp.sum(jnp.log(jnp.abs(p["scale"])))

    # Padding lane used to stash the per-row coupling logdet (in the x1 block).
    stash_lane = half if (half % 128) != 0 else None

    return dict(HP=HP, CP=CP, HD=HD, fuse_st=fuse_st, stash_lane=stash_lane,
                w1x=w1x.astype(jnp.bfloat16), w1c=w1c.astype(jnp.bfloat16),
                b1=b1,
                wh=wh.astype(jnp.bfloat16), bh=bh,
                wo=wo.astype(jnp.bfloat16), bo=bo,
                loc=loc, scale=scale,
                gather_idx=gather_idx, actnorm_logdet=actnorm_logdet)


def make_params(key, in_channels, cond_channels, hidden_dim, hidden_depth):
    half = in_channels // 2
    din = half + cond_channels
    keys = iter(jax.random.split(key, 128))

    def lin(fan_in, shape):
        # PyTorch nn.Linear default init: U(-1/sqrt(fan_in), 1/sqrt(fan_in))
        bound = 1.0 / float(fan_in) ** 0.5
        return jax.random.uniform(next(keys), shape, jnp.float32, -bound, bound)

    # 4 master nets in order [s0, t0, s1, t1]
    w0, b0, wh, bh, wo, bo = [], [], [], [], [], []
    for _ in range(4):
        w0.append(lin(din, (din, hidden_dim)))
        b0.append(lin(din, (hidden_dim,)))
        wh.append([lin(hidden_dim, (hidden_dim, hidden_dim)) for _ in range(hidden_depth)])
        bh.append([lin(hidden_dim, (hidden_dim,)) for _ in range(hidden_depth)])
        wo.append(lin(hidden_dim, (hidden_dim, half)))
        bo.append(lin(hidden_dim, (half,)))

    loc = 0.1 * jax.random.normal(next(keys), (1, in_channels), jnp.float32)
    scale = jax.random.uniform(next(keys), (1, in_channels), jnp.float32, 0.5, 1.5)
    perm_idx = jax.random.permutation(next(keys), in_channels)

    params = dict(depth=hidden_depth, in_channels=in_channels,
                  cond_channels=cond_channels, hidden_dim=hidden_dim,
                  w0=w0, b0=b0, wh=wh, bh=bh, wo=wo, bo=bo,
                  loc=loc, scale=scale, perm_idx=perm_idx)

    # Block-diagonal s/t fusion only pays on 256-wide-MXU chips with HD == 128;
    # on v5e (128-wide MXU) it would double real MXU work.
    fuse_st = (_pad_to(hidden_dim, 128) == 128) and _mxu_is_256()
    params["packed"] = pack_params(params, fuse_st)
    return params


# ----------------------------------------------------------------------------
# Wrapper
# ----------------------------------------------------------------------------
def flow_block_forward(x, xcond, params):
    """x: (B, C, 1, 1), xcond: (B, Ccond, 1, 1) -> (h (B, C, 1, 1), logdet (B,))"""
    pk = params["packed"]
    B, C, H, W = x.shape
    assert H == 1 and W == 1, "coupling block requires 1x1 spatial dims"
    assert xcond.shape[2] == 1 and xcond.shape[3] == 1
    half = C // 2
    HP, CP, HD = pk["HP"], pk["CP"], pk["HD"]
    fuse_st, stash_lane = pk["fuse_st"], pk["stash_lane"]
    depth = params["depth"]

    x2 = x.reshape(B, C).astype(jnp.float32)
    xc2 = xcond.reshape(xcond.shape[0], -1).astype(jnp.float32)
    cond = xc2.shape[1]

    weight_args = (pk["loc"], pk["scale"], pk["w1x"], pk["w1c"], pk["b1"],
                   pk["wh"], pk["bh"], pk["wo"], pk["bo"])
    weight_bytes = sum(int(a.size) * a.dtype.itemsize for a in weight_args)

    # VMEM budget / cap per chip generation (~48 MiB on v7x, ~96 MiB on v5e/v6e).
    vmem_cap = _vmem_capacity_bytes()
    cap = (vmem_cap * 3) // 4

    # Batch tiling: as large as the VMEM budget allows (amortizes per-grid-step
    # overhead), balanced tiles to minimize tail padding, and >= 2 tiles when
    # B >= 16 so dimension_semantics=("parallel",) shards across both TCs (v7x).
    row_bytes = 2 * 4 * (2 * HP + CP + 2 * HP)     # double-buffered I/O tiles
    row_bytes += 4 * (2 * HD) * 8                  # in-kernel activation temps (est.)
    avail = max(cap - weight_bytes - (4 << 20), 8 << 20)
    TB_max = max(64, min(1024, (int(avail // max(row_bytes, 1)) // 8) * 8))

    nb = max(1, _cdiv(B, TB_max))
    if B >= 16:
        nb = max(nb, 2)
    TB = _pad_to(_cdiv(B, nb), 8)
    B_pad = nb * TB

    # Split + lane-pad x into (x0 | x1) layout; zero-pad cond channels.
    xp = jnp.zeros((B_pad, 2 * HP), jnp.float32)
    xp = xp.at[:B, :half].set(x2[:, :half])
    xp = xp.at[:B, HP:HP + half].set(x2[:, half:])
    xcp = jnp.zeros((B_pad, CP), jnp.float32).at[:B, :cond].set(xc2)

    kernel = make_kernel(depth, HP, HD, fuse_st, stash_lane)

    if stash_lane is None:
        out_shape = (jax.ShapeDtypeStruct((B_pad, 2 * HP), jnp.float32),
                     jax.ShapeDtypeStruct((B_pad, 128), jnp.float32))
        out_specs = (pl.BlockSpec((TB, 2 * HP), lambda i: (i, 0)),
                     pl.BlockSpec((TB, 128), lambda i: (i, 0)))
        out_lanes = 2 * HP + 128
    else:
        out_shape = jax.ShapeDtypeStruct((B_pad, 2 * HP), jnp.float32)
        out_specs = pl.BlockSpec((TB, 2 * HP), lambda i: (i, 0))
        out_lanes = 2 * HP

    def run(single_buffer_weights):
        def const_spec(a):
            nd = a.ndim
            # Constant block index -> stays VMEM-resident across grid iterations.
            if single_buffer_weights:
                return pl.BlockSpec(a.shape, lambda i: (0,) * nd,
                                    pipeline_mode=pl.Buffered(1))
            return pl.BlockSpec(a.shape, lambda i: (0,) * nd)

        in_specs = ([pl.BlockSpec((TB, 2 * HP), lambda i: (i, 0)),
                     pl.BlockSpec((TB, CP), lambda i: (i, 0))]
                    + [const_spec(a) for a in weight_args])

        wmul = 1 if single_buffer_weights else 2
        io_bytes = 2 * 4 * TB * (2 * HP + CP + out_lanes)
        act_bytes = 4 * TB * (2 * HD) * 10
        need = wmul * weight_bytes + io_bytes + act_bytes + (2 << 20)
        vmem_limit = int(min(max(need, 16 << 20), cap))

        return pl.pallas_call(
            kernel,
            out_shape=out_shape,
            grid=(nb,),
            in_specs=in_specs,
            out_specs=out_specs,
            compiler_params=pltpu.CompilerParams(
                dimension_semantics=("parallel",),
                vmem_limit_bytes=vmem_limit),
        )(xp, xcp, *weight_args)

    try:
        outs = run(True)        # single-buffered resident weights
    except Exception:
        outs = run(False)       # fallback: default double buffering

    if stash_lane is None:
        h_pad, ld_pad = outs
        ld = ld_pad[:B, 0]
    else:
        h_pad = outs
        ld = h_pad[:B, stash_lane]

    # Shuffle + un-pad as one gather (pure data movement, kept out of the kernel).
    h = h_pad[:B, pk["gather_idx"]]
    logdet = ld + pk["actnorm_logdet"]
    return h[:, :, None, None], logdet


# ----------------------------------------------------------------------------
# Pure-JAX reference mirroring the PyTorch forward (same bf16 matmul precision
# as the kernel: bf16 operands, f32 accumulation; elementwise math in f32).
# ----------------------------------------------------------------------------
def flow_block_reference(x, xcond, params):
    B, C = x.shape[0], x.shape[1]
    half = C // 2
    depth = params["depth"]
    h = x.reshape(B, C).astype(jnp.float32)
    xc = xcond.reshape(xcond.shape[0], -1).astype(jnp.float32)

    # ActNorm
    h = params["scale"] * (h + params["loc"])
    logdet = jnp.broadcast_to(jnp.sum(jnp.log(jnp.abs(params["scale"]))), (B,))
    # InvLeakyRelu
    h = h * jnp.where(h >= 0, 1.0, INV_ALPHA)

    def mm(a, w):
        return jnp.dot(a.astype(jnp.bfloat16), w.astype(jnp.bfloat16),
                       preferred_element_type=jnp.float32)

    def net(idx, inp, use_tanh):
        y = mm(inp, params["w0"][idx]) + params["b0"][idx]
        y = jnp.where(y >= 0, y, NEG_SLOPE * y)
        for d in range(depth):
            y = mm(y, params["wh"][idx][d]) + params["bh"][idx][d]
            y = jnp.where(y >= 0, y, NEG_SLOPE * y)
        y = mm(y, params["wo"][idx]) + params["bo"][idx]
        return jnp.tanh(y) if use_tanh else y

    x0, x1 = h[:, :half], h[:, half:]
    c0 = jnp.concatenate([x0, xc], axis=1)
    s0, t0 = net(0, c0, True), net(1, c0, False)
    x1 = x1 * jnp.exp(s0) + t0
    logdet = logdet + jnp.sum(s0, axis=1)

    c1 = jnp.concatenate([x1, xc], axis=1)
    s1, t1 = net(2, c1, True), net(3, c1, False)
    x0 = x0 * jnp.exp(s1) + t1
    logdet = logdet + jnp.sum(s1, axis=1)

    h = jnp.concatenate([x1, x0], axis=1)
    h = h[:, params["perm_idx"]]
    return h[:, :, None, None], logdet


if __name__ == "__main__":
    B = 8
    in_channels = 8        # must be even
    cond_channels = 8
    hidden_dim = 32
    hidden_depth = 2

    root = jax.random.PRNGKey(0)
    kx, kc, kp = jax.random.split(root, 3)

    x = jax.random.normal(kx, (B, in_channels, 1, 1), jnp.float32)
    xcond = jax.random.normal(kc, (B, cond_channels, 1, 1), jnp.float32)
    params = make_params(kp, in_channels, cond_channels, hidden_dim, hidden_depth)

    h, logdet = flow_block_forward(x, xcond, params)
    jax.block_until_ready((h, logdet))

    h_ref, ld_ref = flow_block_reference(x, xcond, params)
    assert h.shape == (B, in_channels, 1, 1) and logdet.shape == (B,)
    assert jnp.allclose(h, h_ref, atol=2e-3, rtol=2e-3)
    assert jnp.allclose(logdet, ld_ref, atol=2e-3, rtol=2e-3)

    print("KERNEL_OK")
</pallas_src>

<mosaic_0001>
module attributes {stable_mosaic.version = 11 : i64} {
  func.func @kernel(%arg0: i32, %arg1: memref<8x256xf32, #tpu.memory_space<vmem>>, %arg2: memref<8x128xf32, #tpu.memory_space<vmem>>, %arg3: memref<1x256xf32, #tpu.memory_space<vmem>>, %arg4: memref<1x256xf32, #tpu.memory_space<vmem>>, %arg5: memref<2x128x256xbf16, #tpu.memory_space<vmem>>, %arg6: memref<2x128x256xbf16, #tpu.memory_space<vmem>>, %arg7: memref<2x1x256xf32, #tpu.memory_space<vmem>>, %arg8: memref<8x128x128xbf16, #tpu.memory_space<vmem>>, %arg9: memref<8x1x128xf32, #tpu.memory_space<vmem>>, %arg10: memref<4x128x128xbf16, #tpu.memory_space<vmem>>, %arg11: memref<4x1x128xf32, #tpu.memory_space<vmem>>, %arg12: memref<8x256xf32, #tpu.memory_space<vmem>>) attributes {dimension_semantics = [#tpu.dimension_semantics<parallel>], iteration_bounds = array<i64: 1>, scalar_prefetch = 0 : i64, scratch_operands = 0 : i64, tpu.core_type = #tpu.core_type<tc>, window_params = [{transform_indices = @transform_0, window_bounds = array<i64: 8, 256>}, {transform_indices = @transform_1, window_bounds = array<i64: 8, 128>}, {pipeline_mode = #tpu.pipeline_mode<synchronous>, transform_indices = @transform_2, window_bounds = array<i64: 1, 256>}, {pipeline_mode = #tpu.pipeline_mode<synchronous>, transform_indices = @transform_3, window_bounds = array<i64: 1, 256>}, {pipeline_mode = #tpu.pipeline_mode<synchronous>, transform_indices = @transform_4, window_bounds = array<i64: 2, 128, 256>}, {pipeline_mode = #tpu.pipeline_mode<synchronous>, transform_indices = @transform_5, window_bounds = array<i64: 2, 128, 256>}, {pipeline_mode = #tpu.pipeline_mode<synchronous>, transform_indices = @transform_6, window_bounds = array<i64: 2, 1, 256>}, {pipeline_mode = #tpu.pipeline_mode<synchronous>, transform_indices = @transform_7, window_bounds = array<i64: 8, 128, 128>}, {pipeline_mode = #tpu.pipeline_mode<synchronous>, transform_indices = @transform_8, window_bounds = array<i64: 8, 1, 128>}, {pipeline_mode = #tpu.pipeline_mode<synchronous>, transform_indices = @transform_9, window_bounds = array<i64: 4, 128, 128>}, {pipeline_mode = #tpu.pipeline_mode<synchronous>, transform_indices = @transform_10, window_bounds = array<i64: 4, 1, 128>}, {transform_indices = @transform_11, window_bounds = array<i64: 8, 256>}]} {
    %c0 = arith.constant 0 : index
    %c0_0 = arith.constant 0 : index
    %0 = vector.load %arg1[%c0, %c0_0] : memref<8x256xf32, #tpu.memory_space<vmem>>, vector<8x256xf32>
    %c0_1 = arith.constant 0 : index
    %c0_2 = arith.constant 0 : index
    %1 = vector.load %arg2[%c0_1, %c0_2] : memref<8x128xf32, #tpu.memory_space<vmem>>, vector<8x128xf32>
    %c0_3 = arith.constant 0 : index
    %c0_4 = arith.constant 0 : index
    %2 = vector.load %arg4[%c0_3, %c0_4] : memref<1x256xf32, #tpu.memory_space<vmem>>, vector<1x256xf32>
    %c0_5 = arith.constant 0 : index
    %c0_6 = arith.constant 0 : index
    %3 = vector.load %arg3[%c0_5, %c0_6] : memref<1x256xf32, #tpu.memory_space<vmem>>, vector<1x256xf32>
    %4 = vector.broadcast %3 : vector<1x256xf32> to vector<8x256xf32>
    %5 = arith.addf %0, %4 : vector<8x256xf32>
    %6 = vector.broadcast %2 : vector<1x256xf32> to vector<8x256xf32>
    %7 = arith.mulf %6, %5 : vector<8x256xf32>
    %cst = arith.constant 0.000000e+00 : f32
    %8 = vector.broadcast %cst : f32 to vector<8x256xf32>
    %9 = arith.cmpf oge, %7, %8 : vector<8x256xf32>
    %cst_7 = arith.constant 1.000000e+00 : f32
    %cst_8 = arith.constant 0.899999976 : f32
    %10 = vector.broadcast %cst_7 : f32 to vector<8x256xf32>
    %11 = vector.broadcast %cst_8 : f32 to vector<8x256xf32>
    %12 = arith.select %9, %10, %11 : vector<8x256xi1>, vector<8x256xf32>
    %13 = arith.mulf %7, %12 : vector<8x256xf32>
    %14 = vector.extract_strided_slice %13 {offsets = [0, 0], sizes = [8, 128], strides = [1, 1]} : vector<8x256xf32> to vector<8x128xf32>
    %15 = vector.extract_strided_slice %13 {offsets = [0, 128], sizes = [8, 128], strides = [1, 1]} : vector<8x256xf32> to vector<8x128xf32>
    %16 = arith.truncf %1 : vector<8x128xf32> to vector<8x128xbf16>
    %c0_9 = arith.constant 0 : index
    %c0_10 = arith.constant 0 : index
    %c0_11 = arith.constant 0 : index
    %17 = vector.load %arg6[%c0_9, %c0_10, %c0_11] : memref<2x128x256xbf16, #tpu.memory_space<vmem>>, vector<1x128x256xbf16>
    %18 = vector.shape_cast %17 : vector<1x128x256xbf16> to vector<128x256xbf16>
    %cst_12 = arith.constant dense<0.000000e+00> : vector<8x256xf32>
    %19 = tpu.matmul %16, %18, %cst_12 {dimension_numbers = #tpu.dot_dimension_numbers<[1], [0], [0], [1], [0, 0, 1, 1], [], []>} : vector<8x128xbf16>, vector<128x256xbf16>, vector<8x256xf32> -> vector<8x256xf32>
    %c0_13 = arith.constant 0 : index
    %c0_14 = arith.constant 0 : index
    %c0_15 = arith.constant 0 : index
    %20 = vector.load %arg5[%c0_13, %c0_14, %c0_15] : memref<2x128x256xbf16, #tpu.memory_space<vmem>>, vector<1x128x256xbf16>
    %21 = vector.shape_cast %20 : vector<1x128x256xbf16> to vector<128x256xbf16>
    %22 = arith.truncf %14 : vector<8x128xf32> to vector<8x128xbf16>
    %cst_16 = arith.constant dense<0.000000e+00> : vector<8x256xf32>
    %23 = tpu.matmul %22, %21, %cst_16 {dimension_numbers = #tpu.dot_dimension_numbers<[1], [0], [0], [1], [0, 0, 1, 1], [], []>} : vector<8x128xbf16>, vector<128x256xbf16>, vector<8x256xf32> -> vector<8x256xf32>
    %24 = arith.addf %23, %19 : vector<8x256xf32>
    %c0_17 = arith.constant 0 : index
    %c0_18 = arith.constant 0 : index
    %c0_19 = arith.constant 0 : index
    %25 = vector.load %arg7[%c0_17, %c0_18, %c0_19] : memref<2x1x256xf32, #tpu.memory_space<vmem>>, vector<1x1x256xf32>
    %26 = vector.shape_cast %25 : vector<1x1x256xf32> to vector<1x256xf32>
    %27 = vector.broadcast %26 : vector<1x256xf32> to vector<8x256xf32>
    %28 = arith.addf %24, %27 : vector<8x256xf32>
    %cst_20 = arith.constant 0.000000e+00 : f32
    %29 = vector.broadcast %cst_20 : f32 to vector<8x256xf32>
    %30 = arith.cmpf oge, %28, %29 : vector<8x256xf32>
    %cst_21 = arith.constant 0.00999999977 : f32
    %31 = vector.broadcast %cst_21 : f32 to vector<8x256xf32>
    %32 = arith.mulf %31, %28 : vector<8x256xf32>
    %33 = arith.select %30, %28, %32 : vector<8x256xi1>, vector<8x256xf32>
    %34 = vector.extract_strided_slice %33 {offsets = [0, 0], sizes = [8, 128], strides = [1, 1]} : vector<8x256xf32> to vector<8x128xf32>
    %35 = vector.extract_strided_slice %33 {offsets = [0, 128], sizes = [8, 128], strides = [1, 1]} : vector<8x256xf32> to vector<8x128xf32>
    %c0_22 = arith.constant 0 : index
    %c0_23 = arith.constant 0 : index
    %c0_24 = arith.constant 0 : index
    %36 = vector.load %arg8[%c0_22, %c0_23, %c0_24] : memref<8x128x128xbf16, #tpu.memory_space<vmem>>, vector<1x128x128xbf16>
    %37 = vector.shape_cast %36 : vector<1x128x128xbf16> to vector<128x128xbf16>
    %38 = arith.truncf %34 : vector<8x128xf32> to vector<8x128xbf16>
    %cst_25 = arith.constant dense<0.000000e+00> : vector<8x128xf32>
    %39 = tpu.matmul %38, %37, %cst_25 {dimension_numbers = #tpu.dot_dimension_numbers<[1], [0], [0], [1], [0, 0, 1, 1], [], []>} : vector<8x128xbf16>, vector<128x128xbf16>, vector<8x128xf32> -> vector<8x128xf32>
    %c0_26 = arith.constant 0 : index
    %c0_27 = arith.constant 0 : index
    %c0_28 = arith.constant 0 : index
    %40 = vector.load %arg9[%c0_26, %c0_27, %c0_28] : memref<8x1x128xf32, #tpu.memory_space<vmem>>, vector<1x1x128xf32>
    %41 = vector.shape_cast %40 : vector<1x1x128xf32> to vector<1x128xf32>
    %42 = vector.broadcast %41 : vector<1x128xf32> to vector<8x128xf32>
    %43 = arith.addf %39, %42 : vector<8x128xf32>
    %cst_29 = arith.constant 0.000000e+00 : f32
    %44 = vector.broadcast %cst_29 : f32 to vector<8x128xf32>
    %45 = arith.cmpf oge, %43, %44 : vector<8x128xf32>
    %cst_30 = arith.constant 0.00999999977 : f32
    %46 = vector.broadcast %cst_30 : f32 to vector<8x128xf32>
    %47 = arith.mulf %46, %43 : vector<8x128xf32>
    %48 = arith.select %45, %43, %47 : vector<8x128xi1>, vector<8x128xf32>
    %c2 = arith.constant 2 : index
    %c0_31 = arith.constant 0 : index
    %c0_32 = arith.constant 0 : index
    %49 = vector.load %arg8[%c2, %c0_31, %c0_32] : memref<8x128x128xbf16, #tpu.memory_space<vmem>>, vector<1x128x128xbf16>
    %50 = vector.shape_cast %49 : vector<1x128x128xbf16> to vector<128x128xbf16>
    %51 = arith.truncf %35 : vector<8x128xf32> to vector<8x128xbf16>
    %cst_33 = arith.constant dense<0.000000e+00> : vector<8x128xf32>
    %52 = tpu.matmul %51, %50, %cst_33 {dimension_numbers = #tpu.dot_dimension_numbers<[1], [0], [0], [1], [0, 0, 1, 1], [], []>} : vector<8x128xbf16>, vector<128x128xbf16>, vector<8x128xf32> -> vector<8x128xf32>
    %c2_34 = arith.constant 2 : index
    %c0_35 = arith.constant 0 : index
    %c0_36 = arith.constant 0 : index
    %53 = vector.load %arg9[%c2_34, %c0_35, %c0_36] : memref<8x1x128xf32, #tpu.memory_space<vmem>>, vector<1x1x128xf32>
    %54 = vector.shape_cast %53 : vector<1x1x128xf32> to vector<1x128xf32>
    %55 = vector.broadcast %54 : vector<1x128xf32> to vector<8x128xf32>
    %56 = arith.addf %52, %55 : vector<8x128xf32>
    %cst_37 = arith.constant 0.000000e+00 : f32
    %57 = vector.broadcast %cst_37 : f32 to vector<8x128xf32>
    %58 = arith.cmpf oge, %56, %57 : vector<8x128xf32>
    %cst_38 = arith.constant 0.00999999977 : f32
    %59 = vector.broadcast %cst_38 : f32 to vector<8x128xf32>
    %60 = arith.mulf %59, %56 : vector<8x128xf32>
    %61 = arith.select %58, %56, %60 : vector<8x128xi1>, vector<8x128xf32>
    %c1 = arith.constant 1 : index
    %c0_39 = arith.constant 0 : index
    %c0_40 = arith.constant 0 : index
    %62 = vector.load %arg8[%c1, %c0_39, %c0_40] : memref<8x128x128xbf16, #tpu.memory_space<vmem>>, vector<1x128x128xbf16>
    %63 = vector.shape_cast %62 : vector<1x128x128xbf16> to vector<128x128xbf16>
    %64 = arith.truncf %48 : vector<8x128xf32> to vector<8x128xbf16>
    %cst_41 = arith.constant dense<0.000000e+00> : vector<8x128xf32>
    %65 = tpu.matmul %64, %63, %cst_41 {dimension_numbers = #tpu.dot_dimension_numbers<[1], [0], [0], [1], [0, 0, 1, 1], [], []>} : vector<8x128xbf16>, vector<128x128xbf16>, vector<8x128xf32> -> vector<8x128xf32>
    %c1_42 = arith.constant 1 : index
    %c0_43 = arith.constant 0 : index
    %c0_44 = arith.constant 0 : index
    %66 = vector.load %arg9[%c1_42, %c0_43, %c0_44] : memref<8x1x128xf32, #tpu.memory_space<vmem>>, vector<1x1x128xf32>
    %67 = vector.shape_cast %66 : vector<1x1x128xf32> to vector<1x128xf32>
    %68 = vector.broadcast %67 : vector<1x128xf32> to vector<8x128xf32>
    %69 = arith.addf %65, %68 : vector<8x128xf32>
    %cst_45 = arith.constant 0.000000e+00 : f32
    %70 = vector.broadcast %cst_45 : f32 to vector<8x128xf32>
    %71 = arith.cmpf oge, %69, %70 : vector<8x128xf32>
    %cst_46 = arith.constant 0.00999999977 : f32
    %72 = vector.broadcast %cst_46 : f32 to vector<8x128xf32>
    %73 = arith.mulf %72, %69 : vector<8x128xf32>
    %74 = arith.select %71, %69, %73 : vector<8x128xi1>, vector<8x128xf32>
    %c3 = arith.constant 3 : index
    %c0_47 = arith.constant 0 : index
    %c0_48 = arith.constant 0 : index
    %75 = vector.load %arg8[%c3, %c0_47, %c0_48] : memref<8x128x128xbf16, #tpu.memory_space<vmem>>, vector<1x128x128xbf16>
    %76 = vector.shape_cast %75 : vector<1x128x128xbf16> to vector<128x128xbf16>
    %77 = arith.truncf %61 : vector<8x128xf32> to vector<8x128xbf16>
    %cst_49 = arith.constant dense<0.000000e+00> : vector<8x128xf32>
    %78 = tpu.matmul %77, %76, %cst_49 {dimension_numbers = #tpu.dot_dimension_numbers<[1], [0], [0], [1], [0, 0, 1, 1], [], []>} : vector<8x128xbf16>, vector<128x128xbf16>, vector<8x128xf32> -> vector<8x128xf32>
    %c3_50 = arith.constant 3 : index
    %c0_51 = arith.constant 0 : index
    %c0_52 = arith.constant 0 : index
    %79 = vector.load %arg9[%c3_50, %c0_51, %c0_52] : memref<8x1x128xf32, #tpu.memory_space<vmem>>, vector<1x1x128xf32>
    %80 = vector.shape_cast %79 : vector<1x1x128xf32> to vector<1x128xf32>
    %81 = vector.broadcast %80 : vector<1x128xf32> to vector<8x128xf32>
    %82 = arith.addf %78, %81 : vector<8x128xf32>
    %cst_53 = arith.constant 0.000000e+00 : f32
    %83 = vector.broadcast %cst_53 : f32 to vector<8x128xf32>
    %84 = arith.cmpf oge, %82, %83 : vector<8x128xf32>
    %cst_54 = arith.constant 0.00999999977 : f32
    %85 = vector.broadcast %cst_54 : f32 to vector<8x128xf32>
    %86 = arith.mulf %85, %82 : vector<8x128xf32>
    %87 = arith.select %84, %82, %86 : vector<8x128xi1>, vector<8x128xf32>
    %c0_55 = arith.constant 0 : index
    %c0_56 = arith.constant 0 : index
    %c0_57 = arith.constant 0 : index
    %88 = vector.load %arg10[%c0_55, %c0_56, %c0_57] : memref<4x128x128xbf16, #tpu.memory_space<vmem>>, vector<1x128x128xbf16>
    %89 = vector.shape_cast %88 : vector<1x128x128xbf16> to vector<128x128xbf16>
    %90 = arith.truncf %74 : vector<8x128xf32> to vector<8x128xbf16>
    %cst_58 = arith.constant dense<0.000000e+00> : vector<8x128xf32>
    %91 = tpu.matmul %90, %89, %cst_58 {dimension_numbers = #tpu.dot_dimension_numbers<[1], [0], [0], [1], [0, 0, 1, 1], [], []>} : vector<8x128xbf16>, vector<128x128xbf16>, vector<8x128xf32> -> vector<8x128xf32>
    %c0_59 = arith.constant 0 : index
    %c0_60 = arith.constant 0 : index
    %c0_61 = arith.constant 0 : index
    %92 = vector.load %arg11[%c0_59, %c0_60, %c0_61] : memref<4x1x128xf32, #tpu.memory_space<vmem>>, vector<1x1x128xf32>
    %93 = vector.shape_cast %92 : vector<1x1x128xf32> to vector<1x128xf32>
    %94 = vector.broadcast %93 : vector<1x128xf32> to vector<8x128xf32>
    %95 = arith.addf %91, %94 : vector<8x128xf32>
    %96 = math.tanh %95 : vector<8x128xf32>
    %c1_62 = arith.constant 1 : index
    %c0_63 = arith.constant 0 : index
    %c0_64 = arith.constant 0 : index
    %97 = vector.load %arg10[%c1_62, %c0_63, %c0_64] : memref<4x128x128xbf16, #tpu.memory_space<vmem>>, vector<1x128x128xbf16>
    %98 = vector.shape_cast %97 : vector<1x128x128xbf16> to vector<128x128xbf16>
    %99 = arith.truncf %87 : vector<8x128xf32> to vector<8x128xbf16>
    %cst_65 = arith.constant dense<0.000000e+00> : vector<8x128xf32>
    %100 = tpu.matmul %99, %98, %cst_65 {dimension_numbers = #tpu.dot_dimension_numbers<[1], [0], [0], [1], [0, 0, 1, 1], [], []>} : vector<8x128xbf16>, vector<128x128xbf16>, vector<8x128xf32> -> vector<8x128xf32>
    %c1_66 = arith.constant 1 : index
    %c0_67 = arith.constant 0 : index
    %c0_68 = arith.constant 0 : index
    %101 = vector.load %arg11[%c1_66, %c0_67, %c0_68] : memref<4x1x128xf32, #tpu.memory_space<vmem>>, vector<1x1x128xf32>
    %102 = vector.shape_cast %101 : vector<1x1x128xf32> to vector<1x128xf32>
    %103 = vector.broadcast %102 : vector<1x128xf32> to vector<8x128xf32>
    %104 = arith.addf %100, %103 : vector<8x128xf32>
    %105 = math.exp %96 : vector<8x128xf32>
    %106 = arith.mulf %15, %105 : vector<8x128xf32>
    %107 = arith.addf %106, %104 : vector<8x128xf32>
    %cst_69 = arith.constant dense<0.000000e+00> : vector<8xf32>
    %108 = vector.multi_reduction <add>, %96, %cst_69 [1] : vector<8x128xf32> to vector<8xf32>
    %109 = vector.shape_cast %108 : vector<8xf32> to vector<8x1xf32>
    %c1_70 = arith.constant 1 : index
    %c0_71 = arith.constant 0 : index
    %c0_72 = arith.constant 0 : index
    %110 = vector.load %arg6[%c1_70, %c0_71, %c0_72] : memref<2x128x256xbf16, #tpu.memory_space<vmem>>, vector<1x128x256xbf16>
    %111 = vector.shape_cast %110 : vector<1x128x256xbf16> to vector<128x256xbf16>
    %cst_73 = arith.constant dense<0.000000e+00> : vector<8x256xf32>
    %112 = tpu.matmul %16, %111, %cst_73 {dimension_numbers = #tpu.dot_dimension_numbers<[1], [0], [0], [1], [0, 0, 1, 1], [], []>} : vector<8x128xbf16>, vector<128x256xbf16>, vector<8x256xf32> -> vector<8x256xf32>
    %c1_74 = arith.constant 1 : index
    %c0_75 = arith.constant 0 : index
    %c0_76 = arith.constant 0 : index
    %113 = vector.load %arg5[%c1_74, %c0_75, %c0_76] : memref<2x128x256xbf16, #tpu.memory_space<vmem>>, vector<1x128x256xbf16>
    %114 = vector.shape_cast %113 : vector<1x128x256xbf16> to vector<128x256xbf16>
    %115 = arith.truncf %107 : vector<8x128xf32> to vector<8x128xbf16>
    %cst_77 = arith.constant dense<0.000000e+00> : vector<8x256xf32>
    %116 = tpu.matmul %115, %114, %cst_77 {dimension_numbers = #tpu.dot_dimension_numbers<[1], [0], [0], [1], [0, 0, 1, 1], [], []>} : vector<8x128xbf16>, vector<128x256xbf16>, vector<8x256xf32> -> vector<8x256xf32>
    %117 = arith.addf %116, %112 : vector<8x256xf32>
    %c1_78 = arith.constant 1 : index
    %c0_79 = arith.constant 0 : index
    %c0_80 = arith.constant 0 : index
    %118 = vector.load %arg7[%c1_78, %c0_79, %c0_80] : memref<2x1x256xf32, #tpu.memory_space<vmem>>, vector<1x1x256xf32>
    %119 = vector.shape_cast %118 : vector<1x1x256xf32> to vector<1x256xf32>
    %120 = vector.broadcast %119 : vector<1x256xf32> to vector<8x256xf32>
    %121 = arith.addf %117, %120 : vector<8x256xf32>
    %cst_81 = arith.constant 0.000000e+00 : f32
    %122 = vector.broadcast %cst_81 : f32 to vector<8x256xf32>
    %123 = arith.cmpf oge, %121, %122 : vector<8x256xf32>
    %cst_82 = arith.constant 0.00999999977 : f32
    %124 = vector.broadcast %cst_82 : f32 to vector<8x256xf32>
    %125 = arith.mulf %124, %121 : vector<8x256xf32>
    %126 = arith.select %123, %121, %125 : vector<8x256xi1>, vector<8x256xf32>
    %127 = vector.extract_strided_slice %126 {offsets = [0, 0], sizes = [8, 128], strides = [1, 1]} : vector<8x256xf32> to vector<8x128xf32>
    %128 = vector.extract_strided_slice %126 {offsets = [0, 128], sizes = [8, 128], strides = [1, 1]} : vector<8x256xf32> to vector<8x128xf32>
    %c4 = arith.constant 4 : index
    %c0_83 = arith.constant 0 : index
    %c0_84 = arith.constant 0 : index
    %129 = vector.load %arg8[%c4, %c0_83, %c0_84] : memref<8x128x128xbf16, #tpu.memory_space<vmem>>, vector<1x128x128xbf16>
    %130 = vector.shape_cast %129 : vector<1x128x128xbf16> to vector<128x128xbf16>
    %131 = arith.truncf %127 : vector<8x128xf32> to vector<8x128xbf16>
    %cst_85 = arith.constant dense<0.000000e+00> : vector<8x128xf32>
    %132 = tpu.matmul %131, %130, %cst_85 {dimension_numbers = #tpu.dot_dimension_numbers<[1], [0], [0], [1], [0, 0, 1, 1], [], []>} : vector<8x128xbf16>, vector<128x128xbf16>, vector<8x128xf32> -> vector<8x128xf32>
    %c4_86 = arith.constant 4 : index
    %c0_87 = arith.constant 0 : index
    %c0_88 = arith.constant 0 : index
    %133 = vector.load %arg9[%c4_86, %c0_87, %c0_88] : memref<8x1x128xf32, #tpu.memory_space<vmem>>, vector<1x1x128xf32>
    %134 = vector.shape_cast %133 : vector<1x1x128xf32> to vector<1x128xf32>
    %135 = vector.broadcast %134 : vector<1x128xf32> to vector<8x128xf32>
    %136 = arith.addf %132, %135 : vector<8x128xf32>
    %cst_89 = arith.constant 0.000000e+00 : f32
    %137 = vector.broadcast %cst_89 : f32 to vector<8x128xf32>
    %138 = arith.cmpf oge, %136, %137 : vector<8x128xf32>
    %cst_90 = arith.constant 0.00999999977 : f32
    %139 = vector.broadcast %cst_90 : f32 to vector<8x128xf32>
    %140 = arith.mulf %139, %136 : vector<8x128xf32>
    %141 = arith.select %138, %136, %140 : vector<8x128xi1>, vector<8x128xf32>
    %c6 = arith.constant 6 : index
    %c0_91 = arith.constant 0 : index
    %c0_92 = arith.constant 0 : index
    %142 = vector.load %arg8[%c6, %c0_91, %c0_92] : memref<8x128x128xbf16, #tpu.memory_space<vmem>>, vector<1x128x128xbf16>
    %143 = vector.shape_cast %142 : vector<1x128x128xbf16> to vector<128x128xbf16>
    %144 = arith.truncf %128 : vector<8x128xf32> to vector<8x128xbf16>
    %cst_93 = arith.constant dense<0.000000e+00> : vector<8x128xf32>
    %145 = tpu.matmul %144, %143, %cst_93 {dimension_numbers = #tpu.dot_dimension_numbers<[1], [0], [0], [1], [0, 0, 1, 1], [], []>} : vector<8x128xbf16>, vector<128x128xbf16>, vector<8x128xf32> -> vector<8x128xf32>
    %c6_94 = arith.constant 6 : index
    %c0_95 = arith.constant 0 : index
    %c0_96 = arith.constant 0 : index
    %146 = vector.load %arg9[%c6_94, %c0_95, %c0_96] : memref<8x1x128xf32, #tpu.memory_space<vmem>>, vector<1x1x128xf32>
    %147 = vector.shape_cast %146 : vector<1x1x128xf32> to vector<1x128xf32>
    %148 = vector.broadcast %147 : vector<1x128xf32> to vector<8x128xf32>
    %149 = arith.addf %145, %148 : vector<8x128xf32>
    %cst_97 = arith.constant 0.000000e+00 : f32
    %150 = vector.broadcast %cst_97 : f32 to vector<8x128xf32>
    %151 = arith.cmpf oge, %149, %150 : vector<8x128xf32>
    %cst_98 = arith.constant 0.00999999977 : f32
    %152 = vector.broadcast %cst_98 : f32 to vector<8x128xf32>
    %153 = arith.mulf %152, %149 : vector<8x128xf32>
    %154 = arith.select %151, %149, %153 : vector<8x128xi1>, vector<8x128xf32>
    %c5 = arith.constant 5 : index
    %c0_99 = arith.constant 0 : index
    %c0_100 = arith.constant 0 : index
    %155 = vector.load %arg8[%c5, %c0_99, %c0_100] : memref<8x128x128xbf16, #tpu.memory_space<vmem>>, vector<1x128x128xbf16>
    %156 = vector.shape_cast %155 : vector<1x128x128xbf16> to vector<128x128xbf16>
    %157 = arith.truncf %141 : vector<8x128xf32> to vector<8x128xbf16>
    %cst_101 = arith.constant dense<0.000000e+00> : vector<8x128xf32>
    %158 = tpu.matmul %157, %156, %cst_101 {dimension_numbers = #tpu.dot_dimension_numbers<[1], [0], [0], [1], [0, 0, 1, 1], [], []>} : vector<8x128xbf16>, vector<128x128xbf16>, vector<8x128xf32> -> vector<8x128xf32>
    %c5_102 = arith.constant 5 : index
    %c0_103 = arith.constant 0 : index
    %c0_104 = arith.constant 0 : index
    %159 = vector.load %arg9[%c5_102, %c0_103, %c0_104] : memref<8x1x128xf32, #tpu.memory_space<vmem>>, vector<1x1x128xf32>
    %160 = vector.shape_cast %159 : vector<1x1x128xf32> to vector<1x128xf32>
    %161 = vector.broadcast %160 : vector<1x128xf32> to vector<8x128xf32>
    %162 = arith.addf %158, %161 : vector<8x128xf32>
    %cst_105 = arith.constant 0.000000e+00 : f32
    %163 = vector.broadcast %cst_105 : f32 to vector<8x128xf32>
    %164 = arith.cmpf oge, %162, %163 : vector<8x128xf32>
    %cst_106 = arith.constant 0.00999999977 : f32
    %165 = vector.broadcast %cst_106 : f32 to vector<8x128xf32>
    %166 = arith.mulf %165, %162 : vector<8x128xf32>
    %167 = arith.select %164, %162, %166 : vector<8x128xi1>, vector<8x128xf32>
    %c7 = arith.constant 7 : index
    %c0_107 = arith.constant 0 : index
    %c0_108 = arith.constant 0 : index
    %168 = vector.load %arg8[%c7, %c0_107, %c0_108] : memref<8x128x128xbf16, #tpu.memory_space<vmem>>, vector<1x128x128xbf16>
    %169 = vector.shape_cast %168 : vector<1x128x128xbf16> to vector<128x128xbf16>
    %170 = arith.truncf %154 : vector<8x128xf32> to vector<8x128xbf16>
    %cst_109 = arith.constant dense<0.000000e+00> : vector<8x128xf32>
    %171 = tpu.matmul %170, %169, %cst_109 {dimension_numbers = #tpu.dot_dimension_numbers<[1], [0], [0], [1], [0, 0, 1, 1], [], []>} : vector<8x128xbf16>, vector<128x128xbf16>, vector<8x128xf32> -> vector<8x128xf32>
    %c7_110 = arith.constant 7 : index
    %c0_111 = arith.constant 0 : index
    %c0_112 = arith.constant 0 : index
    %172 = vector.load %arg9[%c7_110, %c0_111, %c0_112] : memref<8x1x128xf32, #tpu.memory_space<vmem>>, vector<1x1x128xf32>
    %173 = vector.shape_cast %172 : vector<1x1x128xf32> to vector<1x128xf32>
    %174 = vector.broadcast %173 : vector<1x128xf32> to vector<8x128xf32>
    %175 = arith.addf %171, %174 : vector<8x128xf32>
    %cst_113 = arith.constant 0.000000e+00 : f32
    %176 = vector.broadcast %cst_113 : f32 to vector<8x128xf32>
    %177 = arith.cmpf oge, %175, %176 : vector<8x128xf32>
    %cst_114 = arith.constant 0.00999999977 : f32
    %178 = vector.broadcast %cst_114 : f32 to vector<8x128xf32>
    %179 = arith.mulf %178, %175 : vector<8x128xf32>
    %180 = arith.select %177, %175, %179 : vector<8x128xi1>, vector<8x128xf32>
    %c2_115 = arith.constant 2 : index
    %c0_116 = arith.constant 0 : index
    %c0_117 = arith.constant 0 : index
    %181 = vector.load %arg10[%c2_115, %c0_116, %c0_117] : memref<4x128x128xbf16, #tpu.memory_space<vmem>>, vector<1x128x128xbf16>
    %182 = vector.shape_cast %181 : vector<1x128x128xbf16> to vector<128x128xbf16>
    %183 = arith.truncf %167 : vector<8x128xf32> to vector<8x128xbf16>
    %cst_118 = arith.constant dense<0.000000e+00> : vector<8x128xf32>
    %184 = tpu.matmul %183, %182, %cst_118 {dimension_numbers = #tpu.dot_dimension_numbers<[1], [0], [0], [1], [0, 0, 1, 1], [], []>} : vector<8x128xbf16>, vector<128x128xbf16>, vector<8x128xf32> -> vector<8x128xf32>
    %c2_119 = arith.constant 2 : index
    %c0_120 = arith.constant 0 : index
    %c0_121 = arith.constant 0 : index
    %185 = vector.load %arg11[%c2_119, %c0_120, %c0_121] : memref<4x1x128xf32, #tpu.memory_space<vmem>>, vector<1x1x128xf32>
    %186 = vector.shape_cast %185 : vector<1x1x128xf32> to vector<1x128xf32>
    %187 = vector.broadcast %186 : vector<1x128xf32> to vector<8x128xf32>
    %188 = arith.addf %184, %187 : vector<8x128xf32>
    %189 = math.tanh %188 : vector<8x128xf32>
    %c3_122 = arith.constant 3 : index
    %c0_123 = arith.constant 0 : index
    %c0_124 = arith.constant 0 : index
    %190 = vector.load %arg10[%c3_122, %c0_123, %c0_124] : memref<4x128x128xbf16, #tpu.memory_space<vmem>>, vector<1x128x128xbf16>
    %191 = vector.shape_cast %190 : vector<1x128x128xbf16> to vector<128x128xbf16>
    %192 = arith.truncf %180 : vector<8x128xf32> to vector<8x128xbf16>
    %cst_125 = arith.constant dense<0.000000e+00> : vector<8x128xf32>
    %193 = tpu.matmul %192, %191, %cst_125 {dimension_numbers = #tpu.dot_dimension_numbers<[1], [0], [0], [1], [0, 0, 1, 1], [], []>} : vector<8x128xbf16>, vector<128x128xbf16>, vector<8x128xf32> -> vector<8x128xf32>
    %c3_126 = arith.constant 3 : index
    %c0_127 = arith.constant 0 : index
    %c0_128 = arith.constant 0 : index
    %194 = vector.load %arg11[%c3_126, %c0_127, %c0_128] : memref<4x1x128xf32, #tpu.memory_space<vmem>>, vector<1x1x128xf32>
    %195 = vector.shape_cast %194 : vector<1x1x128xf32> to vector<1x128xf32>
    %196 = vector.broadcast %195 : vector<1x128xf32> to vector<8x128xf32>
    %197 = arith.addf %193, %196 : vector<8x128xf32>
    %198 = math.exp %189 : vector<8x128xf32>
    %199 = arith.mulf %14, %198 : vector<8x128xf32>
    %200 = arith.addf %199, %197 : vector<8x128xf32>
    %cst_129 = arith.constant dense<0.000000e+00> : vector<8xf32>
    %201 = vector.multi_reduction <add>, %189, %cst_129 [1] : vector<8x128xf32> to vector<8xf32>
    %202 = vector.shape_cast %201 : vector<8xf32> to vector<8x1xf32>
    %203 = arith.addf %109, %202 : vector<8x1xf32>
    %204 = tpu.iota {dimensions = array<i32: 1>} : vector<8x128xi32>
    %c4_i32 = arith.constant 4 : i32
    %205 = vector.broadcast %c4_i32 : i32 to vector<8x128xi32>
    %206 = arith.cmpi eq, %204, %205 : vector<8x128xi32>
    %207 = vector.shape_cast %203 : vector<8x1xf32> to vector<8x1xf32>
    %208 = vector.broadcast %207 : vector<8x1xf32> to vector<8x128xf32>
    %209 = arith.select %206, %208, %107 : vector<8x128xi1>, vector<8x128xf32>
    %c0_130 = arith.constant 0 : index
    %c0_131 = arith.constant 0 : index
    %210 = vector.load %arg12[%c0_130, %c0_131] : memref<8x256xf32, #tpu.memory_space<vmem>>, vector<8x128xf32>
    tpu.vector_store %arg12[%c0_130, %c0_131], %209 {strides = array<i32>} : memref<8x256xf32, #tpu.memory_space<vmem>>, vector<8x128xf32>,
    %c0_132 = arith.constant 0 : index
    %c128 = arith.constant 128 : index
    %211 = vector.load %arg12[%c0_132, %c128] : memref<8x256xf32, #tpu.memory_space<vmem>>, vector<8x128xf32>
    tpu.vector_store %arg12[%c0_132, %c128], %200 {strides = array<i32>} : memref<8x256xf32, #tpu.memory_space<vmem>>, vector<8x128xf32>,
    return
  }
  func.func @transform_0(%arg0: i32) -> (i32, i32) {
    %c0_i32 = arith.constant 0 : i32
    %c0_i32_0 = arith.constant 0 : i32
    return %arg0, %c0_i32 : i32, i32
  }
  func.func @transform_1(%arg0: i32) -> (i32, i32) {
    %c0_i32 = arith.constant 0 : i32
    %c0_i32_0 = arith.constant 0 : i32
    return %arg0, %c0_i32 : i32, i32
  }
  func.func @transform_2(%arg0: i32) -> (i32, i32) {
    %c0_i32 = arith.constant 0 : i32
    %c0_i32_0 = arith.constant 0 : i32
    %c0_i32_1 = arith.constant 0 : i32
    return %c0_i32, %c0_i32_0 : i32, i32
  }
  func.func @transform_3(%arg0: i32) -> (i32, i32) {
    %c0_i32 = arith.constant 0 : i32
    %c0_i32_0 = arith.constant 0 : i32
    %c0_i32_1 = arith.constant 0 : i32
    return %c0_i32, %c0_i32_0 : i32, i32
  }
  func.func @transform_4(%arg0: i32) -> (i32, i32, i32) {
    %c0_i32 = arith.constant 0 : i32
    %c0_i32_0 = arith.constant 0 : i32
    %c0_i32_1 = arith.constant 0 : i32
    %c0_i32_2 = arith.constant 0 : i32
    return %c0_i32, %c0_i32_0, %c0_i32_1 : i32, i32, i32
  }
  func.func @transform_5(%arg0: i32) -> (i32, i32, i32) {
    %c0_i32 = arith.constant 0 : i32
    %c0_i32_0 = arith.constant 0 : i32
    %c0_i32_1 = arith.constant 0 : i32
    %c0_i32_2 = arith.constant 0 : i32
    return %c0_i32, %c0_i32_0, %c0_i32_1 : i32, i32, i32
  }
  func.func @transform_6(%arg0: i32) -> (i32, i32, i32) {
    %c0_i32 = arith.constant 0 : i32
    %c0_i32_0 = arith.constant 0 : i32
    %c0_i32_1 = arith.constant 0 : i32
    %c0_i32_2 = arith.constant 0 : i32
    return %c0_i32, %c0_i32_0, %c0_i32_1 : i32, i32, i32
  }
  func.func @transform_7(%arg0: i32) -> (i32, i32, i32) {
    %c0_i32 = arith.constant 0 : i32
    %c0_i32_0 = arith.constant 0 : i32
    %c0_i32_1 = arith.constant 0 : i32
    %c0_i32_2 = arith.constant 0 : i32
    return %c0_i32, %c0_i32_0, %c0_i32_1 : i32, i32, i32
  }
  func.func @transform_8(%arg0: i32) -> (i32, i32, i32) {
    %c0_i32 = arith.constant 0 : i32
    %c0_i32_0 = arith.constant 0 : i32
    %c0_i32_1 = arith.constant 0 : i32
    %c0_i32_2 = arith.constant 0 : i32
    return %c0_i32, %c0_i32_0, %c0_i32_1 : i32, i32, i32
  }
  func.func @transform_9(%arg0: i32) -> (i32, i32, i32) {
    %c0_i32 = arith.constant 0 : i32
    %c0_i32_0 = arith.constant 0 : i32
    %c0_i32_1 = arith.constant 0 : i32
    %c0_i32_2 = arith.constant 0 : i32
    return %c0_i32, %c0_i32_0, %c0_i32_1 : i32, i32, i32
  }
  func.func @transform_10(%arg0: i32) -> (i32, i32, i32) {
    %c0_i32 = arith.constant 0 : i32
    %c0_i32_0 = arith.constant 0 : i32
    %c0_i32_1 = arith.constant 0 : i32
    %c0_i32_2 = arith.constant 0 : i32
    return %c0_i32, %c0_i32_0, %c0_i32_1 : i32, i32, i32
  }
  func.func @transform_11(%arg0: i32) -> (i32, i32) {
    %c0_i32 = arith.constant 0 : i32
    %c0_i32_0 = arith.constant 0 : i32
    return %arg0, %c0_i32 : i32, i32
  }
}

module attributes {stable_mosaic.version = 11 : i64} {
  func.func @kernel(%arg0: i32, %arg1: memref<8x256xf32, #tpu.memory_space<vmem>>, %arg2: memref<8x128xf32, #tpu.memory_space<vmem>>, %arg3: memref<1x256xf32, #tpu.memory_space<vmem>>, %arg4: memref<1x256xf32, #tpu.memory_space<vmem>>, %arg5: memref<2x128x256xbf16, #tpu.memory_space<vmem>>, %arg6: memref<2x128x256xbf16, #tpu.memory_space<vmem>>, %arg7: memref<2x1x256xf32, #tpu.memory_space<vmem>>, %arg8: memref<8x128x128xbf16, #tpu.memory_space<vmem>>, %arg9: memref<8x1x128xf32, #tpu.memory_space<vmem>>, %arg10: memref<4x128x128xbf16, #tpu.memory_space<vmem>>, %arg11: memref<4x1x128xf32, #tpu.memory_space<vmem>>, %arg12: memref<8x256xf32, #tpu.memory_space<vmem>>) attributes {dimension_semantics = [#tpu.dimension_semantics<parallel>], iteration_bounds = array<i64: 1>, scalar_prefetch = 0 : i64, scratch_operands = 0 : i64, tpu.core_type = #tpu.core_type<tc>, window_params = [{transform_indices = @transform_0, window_bounds = array<i64: 8, 256>}, {transform_indices = @transform_1, window_bounds = array<i64: 8, 128>}, {pipeline_mode = #tpu.pipeline_mode<synchronous>, transform_indices = @transform_2, window_bounds = array<i64: 1, 256>}, {pipeline_mode = #tpu.pipeline_mode<synchronous>, transform_indices = @transform_3, window_bounds = array<i64: 1, 256>}, {pipeline_mode = #tpu.pipeline_mode<synchronous>, transform_indices = @transform_4, window_bounds = array<i64: 2, 128, 256>}, {pipeline_mode = #tpu.pipeline_mode<synchronous>, transform_indices = @transform_5, window_bounds = array<i64: 2, 128, 256>}, {pipeline_mode = #tpu.pipeline_mode<synchronous>, transform_indices = @transform_6, window_bounds = array<i64: 2, 1, 256>}, {pipeline_mode = #tpu.pipeline_mode<synchronous>, transform_indices = @transform_7, window_bounds = array<i64: 8, 128, 128>}, {pipeline_mode = #tpu.pipeline_mode<synchronous>, transform_indices = @transform_8, window_bounds = array<i64: 8, 1, 128>}, {pipeline_mode = #tpu.pipeline_mode<synchronous>, transform_indices = @transform_9, window_bounds = array<i64: 4, 128, 128>}, {pipeline_mode = #tpu.pipeline_mode<synchronous>, transform_indices = @transform_10, window_bounds = array<i64: 4, 1, 128>}, {transform_indices = @transform_11, window_bounds = array<i64: 8, 256>}]} {
    %c0 = arith.constant 0 : index
    %c0_0 = arith.constant 0 : index
    %0 = vector.load %arg1[%c0, %c0_0] : memref<8x256xf32, #tpu.memory_space<vmem>>, vector<8x256xf32>
    %c0_1 = arith.constant 0 : index
    %c0_2 = arith.constant 0 : index
    %1 = vector.load %arg2[%c0_1, %c0_2] : memref<8x128xf32, #tpu.memory_space<vmem>>, vector<8x128xf32>
    %c0_3 = arith.constant 0 : index
    %c0_4 = arith.constant 0 : index
    %2 = vector.load %arg4[%c0_3, %c0_4] : memref<1x256xf32, #tpu.memory_space<vmem>>, vector<1x256xf32>
    %c0_5 = arith.constant 0 : index
    %c0_6 = arith.constant 0 : index
    %3 = vector.load %arg3[%c0_5, %c0_6] : memref<1x256xf32, #tpu.memory_space<vmem>>, vector<1x256xf32>
    %4 = vector.broadcast %3 : vector<1x256xf32> to vector<8x256xf32>
    %5 = arith.addf %0, %4 : vector<8x256xf32>
    %6 = vector.broadcast %2 : vector<1x256xf32> to vector<8x256xf32>
    %7 = arith.mulf %6, %5 : vector<8x256xf32>
    %cst = arith.constant 0.000000e+00 : f32
    %8 = vector.broadcast %cst : f32 to vector<8x256xf32>
    %9 = arith.cmpf oge, %7, %8 : vector<8x256xf32>
    %cst_7 = arith.constant 1.000000e+00 : f32
    %cst_8 = arith.constant 0.899999976 : f32
    %10 = vector.broadcast %cst_7 : f32 to vector<8x256xf32>
    %11 = vector.broadcast %cst_8 : f32 to vector<8x256xf32>
    %12 = arith.select %9, %10, %11 : vector<8x256xi1>, vector<8x256xf32>
    %13 = arith.mulf %7, %12 : vector<8x256xf32>
    %14 = vector.extract_strided_slice %13 {offsets = [0, 0], sizes = [8, 128], strides = [1, 1]} : vector<8x256xf32> to vector<8x128xf32>
    %15 = vector.extract_strided_slice %13 {offsets = [0, 128], sizes = [8, 128], strides = [1, 1]} : vector<8x256xf32> to vector<8x128xf32>
    %16 = arith.truncf %1 : vector<8x128xf32> to vector<8x128xbf16>
    %c0_9 = arith.constant 0 : index
    %c0_10 = arith.constant 0 : index
    %c0_11 = arith.constant 0 : index
    %17 = vector.load %arg6[%c0_9, %c0_10, %c0_11] : memref<2x128x256xbf16, #tpu.memory_space<vmem>>, vector<1x128x256xbf16>
    %18 = vector.shape_cast %17 : vector<1x128x256xbf16> to vector<128x256xbf16>
    %cst_12 = arith.constant dense<0.000000e+00> : vector<8x256xf32>
    %19 = tpu.matmul %16, %18, %cst_12 {dimension_numbers = #tpu.dot_dimension_numbers<[1], [0], [0], [1], [0, 0, 1, 1], [], []>} : vector<8x128xbf16>, vector<128x256xbf16>, vector<8x256xf32> -> vector<8x256xf32>
    %c0_13 = arith.constant 0 : index
    %c0_14 = arith.constant 0 : index
    %c0_15 = arith.constant 0 : index
    %20 = vector.load %arg5[%c0_13, %c0_14, %c0_15] : memref<2x128x256xbf16, #tpu.memory_space<vmem>>, vector<1x128x256xbf16>
    %21 = vector.shape_cast %20 : vector<1x128x256xbf16> to vector<128x256xbf16>
    %22 = arith.truncf %14 : vector<8x128xf32> to vector<8x128xbf16>
    %cst_16 = arith.constant dense<0.000000e+00> : vector<8x256xf32>
    %23 = tpu.matmul %22, %21, %cst_16 {dimension_numbers = #tpu.dot_dimension_numbers<[1], [0], [0], [1], [0, 0, 1, 1], [], []>} : vector<8x128xbf16>, vector<128x256xbf16>, vector<8x256xf32> -> vector<8x256xf32>
    %24 = arith.addf %23, %19 : vector<8x256xf32>
    %c0_17 = arith.constant 0 : index
    %c0_18 = arith.constant 0 : index
    %c0_19 = arith.constant 0 : index
    %25 = vector.load %arg7[%c0_17, %c0_18, %c0_19] : memref<2x1x256xf32, #tpu.memory_space<vmem>>, vector<1x1x256xf32>
    %26 = vector.shape_cast %25 : vector<1x1x256xf32> to vector<1x256xf32>
    %27 = vector.broadcast %26 : vector<1x256xf32> to vector<8x256xf32>
    %28 = arith.addf %24, %27 : vector<8x256xf32>
    %cst_20 = arith.constant 0.000000e+00 : f32
    %29 = vector.broadcast %cst_20 : f32 to vector<8x256xf32>
    %30 = arith.cmpf oge, %28, %29 : vector<8x256xf32>
    %cst_21 = arith.constant 0.00999999977 : f32
    %31 = vector.broadcast %cst_21 : f32 to vector<8x256xf32>
    %32 = arith.mulf %31, %28 : vector<8x256xf32>
    %33 = arith.select %30, %28, %32 : vector<8x256xi1>, vector<8x256xf32>
    %34 = vector.extract_strided_slice %33 {offsets = [0, 0], sizes = [8, 128], strides = [1, 1]} : vector<8x256xf32> to vector<8x128xf32>
    %35 = vector.extract_strided_slice %33 {offsets = [0, 128], sizes = [8, 128], strides = [1, 1]} : vector<8x256xf32> to vector<8x128xf32>
    %c0_22 = arith.constant 0 : index
    %c0_23 = arith.constant 0 : index
    %c0_24 = arith.constant 0 : index
    %36 = vector.load %arg8[%c0_22, %c0_23, %c0_24] : memref<8x128x128xbf16, #tpu.memory_space<vmem>>, vector<1x128x128xbf16>
    %37 = vector.shape_cast %36 : vector<1x128x128xbf16> to vector<128x128xbf16>
    %38 = arith.truncf %34 : vector<8x128xf32> to vector<8x128xbf16>
    %cst_25 = arith.constant dense<0.000000e+00> : vector<8x128xf32>
    %39 = tpu.matmul %38, %37, %cst_25 {dimension_numbers = #tpu.dot_dimension_numbers<[1], [0], [0], [1], [0, 0, 1, 1], [], []>} : vector<8x128xbf16>, vector<128x128xbf16>, vector<8x128xf32> -> vector<8x128xf32>
    %c0_26 = arith.constant 0 : index
    %c0_27 = arith.constant 0 : index
    %c0_28 = arith.constant 0 : index
    %40 = vector.load %arg9[%c0_26, %c0_27, %c0_28] : memref<8x1x128xf32, #tpu.memory_space<vmem>>, vector<1x1x128xf32>
    %41 = vector.shape_cast %40 : vector<1x1x128xf32> to vector<1x128xf32>
    %42 = vector.broadcast %41 : vector<1x128xf32> to vector<8x128xf32>
    %43 = arith.addf %39, %42 : vector<8x128xf32>
    %cst_29 = arith.constant 0.000000e+00 : f32
    %44 = vector.broadcast %cst_29 : f32 to vector<8x128xf32>
    %45 = arith.cmpf oge, %43, %44 : vector<8x128xf32>
    %cst_30 = arith.constant 0.00999999977 : f32
    %46 = vector.broadcast %cst_30 : f32 to vector<8x128xf32>
    %47 = arith.mulf %46, %43 : vector<8x128xf32>
    %48 = arith.select %45, %43, %47 : vector<8x128xi1>, vector<8x128xf32>
    %c2 = arith.constant 2 : index
    %c0_31 = arith.constant 0 : index
    %c0_32 = arith.constant 0 : index
    %49 = vector.load %arg8[%c2, %c0_31, %c0_32] : memref<8x128x128xbf16, #tpu.memory_space<vmem>>, vector<1x128x128xbf16>
    %50 = vector.shape_cast %49 : vector<1x128x128xbf16> to vector<128x128xbf16>
    %51 = arith.truncf %35 : vector<8x128xf32> to vector<8x128xbf16>
    %cst_33 = arith.constant dense<0.000000e+00> : vector<8x128xf32>
    %52 = tpu.matmul %51, %50, %cst_33 {dimension_numbers = #tpu.dot_dimension_numbers<[1], [0], [0], [1], [0, 0, 1, 1], [], []>} : vector<8x128xbf16>, vector<128x128xbf16>, vector<8x128xf32> -> vector<8x128xf32>
    %c2_34 = arith.constant 2 : index
    %c0_35 = arith.constant 0 : index
    %c0_36 = arith.constant 0 : index
    %53 = vector.load %arg9[%c2_34, %c0_35, %c0_36] : memref<8x1x128xf32, #tpu.memory_space<vmem>>, vector<1x1x128xf32>
    %54 = vector.shape_cast %53 : vector<1x1x128xf32> to vector<1x128xf32>
    %55 = vector.broadcast %54 : vector<1x128xf32> to vector<8x128xf32>
    %56 = arith.addf %52, %55 : vector<8x128xf32>
    %cst_37 = arith.constant 0.000000e+00 : f32
    %57 = vector.broadcast %cst_37 : f32 to vector<8x128xf32>
    %58 = arith.cmpf oge, %56, %57 : vector<8x128xf32>
    %cst_38 = arith.constant 0.00999999977 : f32
    %59 = vector.broadcast %cst_38 : f32 to vector<8x128xf32>
    %60 = arith.mulf %59, %56 : vector<8x128xf32>
    %61 = arith.select %58, %56, %60 : vector<8x128xi1>, vector<8x128xf32>
    %c1 = arith.constant 1 : index
    %c0_39 = arith.constant 0 : index
    %c0_40 = arith.constant 0 : index
    %62 = vector.load %arg8[%c1, %c0_39, %c0_40] : memref<8x128x128xbf16, #tpu.memory_space<vmem>>, vector<1x128x128xbf16>
    %63 = vector.shape_cast %62 : vector<1x128x128xbf16> to vector<128x128xbf16>
    %64 = arith.truncf %48 : vector<8x128xf32> to vector<8x128xbf16>
    %cst_41 = arith.constant dense<0.000000e+00> : vector<8x128xf32>
    %65 = tpu.matmul %64, %63, %cst_41 {dimension_numbers = #tpu.dot_dimension_numbers<[1], [0], [0], [1], [0, 0, 1, 1], [], []>} : vector<8x128xbf16>, vector<128x128xbf16>, vector<8x128xf32> -> vector<8x128xf32>
    %c1_42 = arith.constant 1 : index
    %c0_43 = arith.constant 0 : index
    %c0_44 = arith.constant 0 : index
    %66 = vector.load %arg9[%c1_42, %c0_43, %c0_44] : memref<8x1x128xf32, #tpu.memory_space<vmem>>, vector<1x1x128xf32>
    %67 = vector.shape_cast %66 : vector<1x1x128xf32> to vector<1x128xf32>
    %68 = vector.broadcast %67 : vector<1x128xf32> to vector<8x128xf32>
    %69 = arith.addf %65, %68 : vector<8x128xf32>
    %cst_45 = arith.constant 0.000000e+00 : f32
    %70 = vector.broadcast %cst_45 : f32 to vector<8x128xf32>
    %71 = arith.cmpf oge, %69, %70 : vector<8x128xf32>
    %cst_46 = arith.constant 0.00999999977 : f32
    %72 = vector.broadcast %cst_46 : f32 to vector<8x128xf32>
    %73 = arith.mulf %72, %69 : vector<8x128xf32>
    %74 = arith.select %71, %69, %73 : vector<8x128xi1>, vector<8x128xf32>
    %c3 = arith.constant 3 : index
    %c0_47 = arith.constant 0 : index
    %c0_48 = arith.constant 0 : index
    %75 = vector.load %arg8[%c3, %c0_47, %c0_48] : memref<8x128x128xbf16, #tpu.memory_space<vmem>>, vector<1x128x128xbf16>
    %76 = vector.shape_cast %75 : vector<1x128x128xbf16> to vector<128x128xbf16>
    %77 = arith.truncf %61 : vector<8x128xf32> to vector<8x128xbf16>
    %cst_49 = arith.constant dense<0.000000e+00> : vector<8x128xf32>
    %78 = tpu.matmul %77, %76, %cst_49 {dimension_numbers = #tpu.dot_dimension_numbers<[1], [0], [0], [1], [0, 0, 1, 1], [], []>} : vector<8x128xbf16>, vector<128x128xbf16>, vector<8x128xf32> -> vector<8x128xf32>
    %c3_50 = arith.constant 3 : index
    %c0_51 = arith.constant 0 : index
    %c0_52 = arith.constant 0 : index
    %79 = vector.load %arg9[%c3_50, %c0_51, %c0_52] : memref<8x1x128xf32, #tpu.memory_space<vmem>>, vector<1x1x128xf32>
    %80 = vector.shape_cast %79 : vector<1x1x128xf32> to vector<1x128xf32>
    %81 = vector.broadcast %80 : vector<1x128xf32> to vector<8x128xf32>
    %82 = arith.addf %78, %81 : vector<8x128xf32>
    %cst_53 = arith.constant 0.000000e+00 : f32
    %83 = vector.broadcast %cst_53 : f32 to vector<8x128xf32>
    %84 = arith.cmpf oge, %82, %83 : vector<8x128xf32>
    %cst_54 = arith.constant 0.00999999977 : f32
    %85 = vector.broadcast %cst_54 : f32 to vector<8x128xf32>
    %86 = arith.mulf %85, %82 : vector<8x128xf32>
    %87 = arith.select %84, %82, %86 : vector<8x128xi1>, vector<8x128xf32>
    %c0_55 = arith.constant 0 : index
    %c0_56 = arith.constant 0 : index
    %c0_57 = arith.constant 0 : index
    %88 = vector.load %arg10[%c0_55, %c0_56, %c0_57] : memref<4x128x128xbf16, #tpu.memory_space<vmem>>, vector<1x128x128xbf16>
    %89 = vector.shape_cast %88 : vector<1x128x128xbf16> to vector<128x128xbf16>
    %90 = arith.truncf %74 : vector<8x128xf32> to vector<8x128xbf16>
    %cst_58 = arith.constant dense<0.000000e+00> : vector<8x128xf32>
    %91 = tpu.matmul %90, %89, %cst_58 {dimension_numbers = #tpu.dot_dimension_numbers<[1], [0], [0], [1], [0, 0, 1, 1], [], []>} : vector<8x128xbf16>, vector<128x128xbf16>, vector<8x128xf32> -> vector<8x128xf32>
    %c0_59 = arith.constant 0 : index
    %c0_60 = arith.constant 0 : index
    %c0_61 = arith.constant 0 : index
    %92 = vector.load %arg11[%c0_59, %c0_60, %c0_61] : memref<4x1x128xf32, #tpu.memory_space<vmem>>, vector<1x1x128xf32>
    %93 = vector.shape_cast %92 : vector<1x1x128xf32> to vector<1x128xf32>
    %94 = vector.broadcast %93 : vector<1x128xf32> to vector<8x128xf32>
    %95 = arith.addf %91, %94 : vector<8x128xf32>
    %96 = math.tanh %95 : vector<8x128xf32>
    %c1_62 = arith.constant 1 : index
    %c0_63 = arith.constant 0 : index
    %c0_64 = arith.constant 0 : index
    %97 = vector.load %arg10[%c1_62, %c0_63, %c0_64] : memref<4x128x128xbf16, #tpu.memory_space<vmem>>, vector<1x128x128xbf16>
    %98 = vector.shape_cast %97 : vector<1x128x128xbf16> to vector<128x128xbf16>
    %99 = arith.truncf %87 : vector<8x128xf32> to vector<8x128xbf16>
    %cst_65 = arith.constant dense<0.000000e+00> : vector<8x128xf32>
    %100 = tpu.matmul %99, %98, %cst_65 {dimension_numbers = #tpu.dot_dimension_numbers<[1], [0], [0], [1], [0, 0, 1, 1], [], []>} : vector<8x128xbf16>, vector<128x128xbf16>, vector<8x128xf32> -> vector<8x128xf32>
    %c1_66 = arith.constant 1 : index
    %c0_67 = arith.constant 0 : index
    %c0_68 = arith.constant 0 : index
    %101 = vector.load %arg11[%c1_66, %c0_67, %c0_68] : memref<4x1x128xf32, #tpu.memory_space<vmem>>, vector<1x1x128xf32>
    %102 = vector.shape_cast %101 : vector<1x1x128xf32> to vector<1x128xf32>
    %103 = vector.broadcast %102 : vector<1x128xf32> to vector<8x128xf32>
    %104 = arith.addf %100, %103 : vector<8x128xf32>
    %105 = math.exp %96 : vector<8x128xf32>
    %106 = arith.mulf %15, %105 : vector<8x128xf32>
    %107 = arith.addf %106, %104 : vector<8x128xf32>
    %cst_69 = arith.constant dense<0.000000e+00> : vector<8xf32>
    %108 = vector.multi_reduction <add>, %96, %cst_69 [1] : vector<8x128xf32> to vector<8xf32>
    %109 = vector.shape_cast %108 : vector<8xf32> to vector<8x1xf32>
    %c1_70 = arith.constant 1 : index
    %c0_71 = arith.constant 0 : index
    %c0_72 = arith.constant 0 : index
    %110 = vector.load %arg6[%c1_70, %c0_71, %c0_72] : memref<2x128x256xbf16, #tpu.memory_space<vmem>>, vector<1x128x256xbf16>
    %111 = vector.shape_cast %110 : vector<1x128x256xbf16> to vector<128x256xbf16>
    %cst_73 = arith.constant dense<0.000000e+00> : vector<8x256xf32>
    %112 = tpu.matmul %16, %111, %cst_73 {dimension_numbers = #tpu.dot_dimension_numbers<[1], [0], [0], [1], [0, 0, 1, 1], [], []>} : vector<8x128xbf16>, vector<128x256xbf16>, vector<8x256xf32> -> vector<8x256xf32>
    %c1_74 = arith.constant 1 : index
    %c0_75 = arith.constant 0 : index
    %c0_76 = arith.constant 0 : index
    %113 = vector.load %arg5[%c1_74, %c0_75, %c0_76] : memref<2x128x256xbf16, #tpu.memory_space<vmem>>, vector<1x128x256xbf16>
    %114 = vector.shape_cast %113 : vector<1x128x256xbf16> to vector<128x256xbf16>
    %115 = arith.truncf %107 : vector<8x128xf32> to vector<8x128xbf16>
    %cst_77 = arith.constant dense<0.000000e+00> : vector<8x256xf32>
    %116 = tpu.matmul %115, %114, %cst_77 {dimension_numbers = #tpu.dot_dimension_numbers<[1], [0], [0], [1], [0, 0, 1, 1], [], []>} : vector<8x128xbf16>, vector<128x256xbf16>, vector<8x256xf32> -> vector<8x256xf32>
    %117 = arith.addf %116, %112 : vector<8x256xf32>
    %c1_78 = arith.constant 1 : index
    %c0_79 = arith.constant 0 : index
    %c0_80 = arith.constant 0 : index
    %118 = vector.load %arg7[%c1_78, %c0_79, %c0_80] : memref<2x1x256xf32, #tpu.memory_space<vmem>>, vector<1x1x256xf32>
    %119 = vector.shape_cast %118 : vector<1x1x256xf32> to vector<1x256xf32>
    %120 = vector.broadcast %119 : vector<1x256xf32> to vector<8x256xf32>
    %121 = arith.addf %117, %120 : vector<8x256xf32>
    %cst_81 = arith.constant 0.000000e+00 : f32
    %122 = vector.broadcast %cst_81 : f32 to vector<8x256xf32>
    %123 = arith.cmpf oge, %121, %122 : vector<8x256xf32>
    %cst_82 = arith.constant 0.00999999977 : f32
    %124 = vector.broadcast %cst_82 : f32 to vector<8x256xf32>
    %125 = arith.mulf %124, %121 : vector<8x256xf32>
    %126 = arith.select %123, %121, %125 : vector<8x256xi1>, vector<8x256xf32>
    %127 = vector.extract_strided_slice %126 {offsets = [0, 0], sizes = [8, 128], strides = [1, 1]} : vector<8x256xf32> to vector<8x128xf32>
    %128 = vector.extract_strided_slice %126 {offsets = [0, 128], sizes = [8, 128], strides = [1, 1]} : vector<8x256xf32> to vector<8x128xf32>
    %c4 = arith.constant 4 : index
    %c0_83 = arith.constant 0 : index
    %c0_84 = arith.constant 0 : index
    %129 = vector.load %arg8[%c4, %c0_83, %c0_84] : memref<8x128x128xbf16, #tpu.memory_space<vmem>>, vector<1x128x128xbf16>
    %130 = vector.shape_cast %129 : vector<1x128x128xbf16> to vector<128x128xbf16>
    %131 = arith.truncf %127 : vector<8x128xf32> to vector<8x128xbf16>
    %cst_85 = arith.constant dense<0.000000e+00> : vector<8x128xf32>
    %132 = tpu.matmul %131, %130, %cst_85 {dimension_numbers = #tpu.dot_dimension_numbers<[1], [0], [0], [1], [0, 0, 1, 1], [], []>} : vector<8x128xbf16>, vector<128x128xbf16>, vector<8x128xf32> -> vector<8x128xf32>
    %c4_86 = arith.constant 4 : index
    %c0_87 = arith.constant 0 : index
    %c0_88 = arith.constant 0 : index
    %133 = vector.load %arg9[%c4_86, %c0_87, %c0_88] : memref<8x1x128xf32, #tpu.memory_space<vmem>>, vector<1x1x128xf32>
    %134 = vector.shape_cast %133 : vector<1x1x128xf32> to vector<1x128xf32>
    %135 = vector.broadcast %134 : vector<1x128xf32> to vector<8x128xf32>
    %136 = arith.addf %132, %135 : vector<8x128xf32>
    %cst_89 = arith.constant 0.000000e+00 : f32
    %137 = vector.broadcast %cst_89 : f32 to vector<8x128xf32>
    %138 = arith.cmpf oge, %136, %137 : vector<8x128xf32>
    %cst_90 = arith.constant 0.00999999977 : f32
    %139 = vector.broadcast %cst_90 : f32 to vector<8x128xf32>
    %140 = arith.mulf %139, %136 : vector<8x128xf32>
    %141 = arith.select %138, %136, %140 : vector<8x128xi1>, vector<8x128xf32>
    %c6 = arith.constant 6 : index
    %c0_91 = arith.constant 0 : index
    %c0_92 = arith.constant 0 : index
    %142 = vector.load %arg8[%c6, %c0_91, %c0_92] : memref<8x128x128xbf16, #tpu.memory_space<vmem>>, vector<1x128x128xbf16>
    %143 = vector.shape_cast %142 : vector<1x128x128xbf16> to vector<128x128xbf16>
    %144 = arith.truncf %128 : vector<8x128xf32> to vector<8x128xbf16>
    %cst_93 = arith.constant dense<0.000000e+00> : vector<8x128xf32>
    %145 = tpu.matmul %144, %143, %cst_93 {dimension_numbers = #tpu.dot_dimension_numbers<[1], [0], [0], [1], [0, 0, 1, 1], [], []>} : vector<8x128xbf16>, vector<128x128xbf16>, vector<8x128xf32> -> vector<8x128xf32>
    %c6_94 = arith.constant 6 : index
    %c0_95 = arith.constant 0 : index
    %c0_96 = arith.constant 0 : index
    %146 = vector.load %arg9[%c6_94, %c0_95, %c0_96] : memref<8x1x128xf32, #tpu.memory_space<vmem>>, vector<1x1x128xf32>
    %147 = vector.shape_cast %146 : vector<1x1x128xf32> to vector<1x128xf32>
    %148 = vector.broadcast %147 : vector<1x128xf32> to vector<8x128xf32>
    %149 = arith.addf %145, %148 : vector<8x128xf32>
    %cst_97 = arith.constant 0.000000e+00 : f32
    %150 = vector.broadcast %cst_97 : f32 to vector<8x128xf32>
    %151 = arith.cmpf oge, %149, %150 : vector<8x128xf32>
    %cst_98 = arith.constant 0.00999999977 : f32
    %152 = vector.broadcast %cst_98 : f32 to vector<8x128xf32>
    %153 = arith.mulf %152, %149 : vector<8x128xf32>
    %154 = arith.select %151, %149, %153 : vector<8x128xi1>, vector<8x128xf32>
    %c5 = arith.constant 5 : index
    %c0_99 = arith.constant 0 : index
    %c0_100 = arith.constant 0 : index
    %155 = vector.load %arg8[%c5, %c0_99, %c0_100] : memref<8x128x128xbf16, #tpu.memory_space<vmem>>, vector<1x128x128xbf16>
    %156 = vector.shape_cast %155 : vector<1x128x128xbf16> to vector<128x128xbf16>
    %157 = arith.truncf %141 : vector<8x128xf32> to vector<8x128xbf16>
    %cst_101 = arith.constant dense<0.000000e+00> : vector<8x128xf32>
    %158 = tpu.matmul %157, %156, %cst_101 {dimension_numbers = #tpu.dot_dimension_numbers<[1], [0], [0], [1], [0, 0, 1, 1], [], []>} : vector<8x128xbf16>, vector<128x128xbf16>, vector<8x128xf32> -> vector<8x128xf32>
    %c5_102 = arith.constant 5 : index
    %c0_103 = arith.constant 0 : index
    %c0_104 = arith.constant 0 : index
    %159 = vector.load %arg9[%c5_102, %c0_103, %c0_104] : memref<8x1x128xf32, #tpu.memory_space<vmem>>, vector<1x1x128xf32>
    %160 = vector.shape_cast %159 : vector<1x1x128xf32> to vector<1x128xf32>
    %161 = vector.broadcast %160 : vector<1x128xf32> to vector<8x128xf32>
    %162 = arith.addf %158, %161 : vector<8x128xf32>
    %cst_105 = arith.constant 0.000000e+00 : f32
    %163 = vector.broadcast %cst_105 : f32 to vector<8x128xf32>
    %164 = arith.cmpf oge, %162, %163 : vector<8x128xf32>
    %cst_106 = arith.constant 0.00999999977 : f32
    %165 = vector.broadcast %cst_106 : f32 to vector<8x128xf32>
    %166 = arith.mulf %165, %162 : vector<8x128xf32>
    %167 = arith.select %164, %162, %166 : vector<8x128xi1>, vector<8x128xf32>
    %c7 = arith.constant 7 : index
    %c0_107 = arith.constant 0 : index
    %c0_108 = arith.constant 0 : index
    %168 = vector.load %arg8[%c7, %c0_107, %c0_108] : memref<8x128x128xbf16, #tpu.memory_space<vmem>>, vector<1x128x128xbf16>
    %169 = vector.shape_cast %168 : vector<1x128x128xbf16> to vector<128x128xbf16>
    %170 = arith.truncf %154 : vector<8x128xf32> to vector<8x128xbf16>
    %cst_109 = arith.constant dense<0.000000e+00> : vector<8x128xf32>
    %171 = tpu.matmul %170, %169, %cst_109 {dimension_numbers = #tpu.dot_dimension_numbers<[1], [0], [0], [1], [0, 0, 1, 1], [], []>} : vector<8x128xbf16>, vector<128x128xbf16>, vector<8x128xf32> -> vector<8x128xf32>
    %c7_110 = arith.constant 7 : index
    %c0_111 = arith.constant 0 : index
    %c0_112 = arith.constant 0 : index
    %172 = vector.load %arg9[%c7_110, %c0_111, %c0_112] : memref<8x1x128xf32, #tpu.memory_space<vmem>>, vector<1x1x128xf32>
    %173 = vector.shape_cast %172 : vector<1x1x128xf32> to vector<1x128xf32>
    %174 = vector.broadcast %173 : vector<1x128xf32> to vector<8x128xf32>
    %175 = arith.addf %171, %174 : vector<8x128xf32>
    %cst_113 = arith.constant 0.000000e+00 : f32
    %176 = vector.broadcast %cst_113 : f32 to vector<8x128xf32>
    %177 = arith.cmpf oge, %175, %176 : vector<8x128xf32>
    %cst_114 = arith.constant 0.00999999977 : f32
    %178 = vector.broadcast %cst_114 : f32 to vector<8x128xf32>
    %179 = arith.mulf %178, %175 : vector<8x128xf32>
    %180 = arith.select %177, %175, %179 : vector<8x128xi1>, vector<8x128xf32>
    %c2_115 = arith.constant 2 : index
    %c0_116 = arith.constant 0 : index
    %c0_117 = arith.constant 0 : index
    %181 = vector.load %arg10[%c2_115, %c0_116, %c0_117] : memref<4x128x128xbf16, #tpu.memory_space<vmem>>, vector<1x128x128xbf16>
    %182 = vector.shape_cast %181 : vector<1x128x128xbf16> to vector<128x128xbf16>
    %183 = arith.truncf %167 : vector<8x128xf32> to vector<8x128xbf16>
    %cst_118 = arith.constant dense<0.000000e+00> : vector<8x128xf32>
    %184 = tpu.matmul %183, %182, %cst_118 {dimension_numbers = #tpu.dot_dimension_numbers<[1], [0], [0], [1], [0, 0, 1, 1], [], []>} : vector<8x128xbf16>, vector<128x128xbf16>, vector<8x128xf32> -> vector<8x128xf32>
    %c2_119 = arith.constant 2 : index
    %c0_120 = arith.constant 0 : index
    %c0_121 = arith.constant 0 : index
    %185 = vector.load %arg11[%c2_119, %c0_120, %c0_121] : memref<4x1x128xf32, #tpu.memory_space<vmem>>, vector<1x1x128xf32>
    %186 = vector.shape_cast %185 : vector<1x1x128xf32> to vector<1x128xf32>
    %187 = vector.broadcast %186 : vector<1x128xf32> to vector<8x128xf32>
    %188 = arith.addf %184, %187 : vector<8x128xf32>
    %189 = math.tanh %188 : vector<8x128xf32>
    %c3_122 = arith.constant 3 : index
    %c0_123 = arith.constant 0 : index
    %c0_124 = arith.constant 0 : index
    %190 = vector.load %arg10[%c3_122, %c0_123, %c0_124] : memref<4x128x128xbf16, #tpu.memory_space<vmem>>, vector<1x128x128xbf16>
    %191 = vector.shape_cast %190 : vector<1x128x128xbf16> to vector<128x128xbf16>
    %192 = arith.truncf %180 : vector<8x128xf32> to vector<8x128xbf16>
    %cst_125 = arith.constant dense<0.000000e+00> : vector<8x128xf32>
    %193 = tpu.matmul %192, %191, %cst_125 {dimension_numbers = #tpu.dot_dimension_numbers<[1], [0], [0], [1], [0, 0, 1, 1], [], []>} : vector<8x128xbf16>, vector<128x128xbf16>, vector<8x128xf32> -> vector<8x128xf32>
    %c3_126 = arith.constant 3 : index
    %c0_127 = arith.constant 0 : index
    %c0_128 = arith.constant 0 : index
    %194 = vector.load %arg11[%c3_126, %c0_127, %c0_128] : memref<4x1x128xf32, #tpu.memory_space<vmem>>, vector<1x1x128xf32>
    %195 = vector.shape_cast %194 : vector<1x1x128xf32> to vector<1x128xf32>
    %196 = vector.broadcast %195 : vector<1x128xf32> to vector<8x128xf32>
    %197 = arith.addf %193, %196 : vector<8x128xf32>
    %198 = math.exp %189 : vector<8x128xf32>
    %199 = arith.mulf %14, %198 : vector<8x128xf32>
    %200 = arith.addf %199, %197 : vector<8x128xf32>
    %cst_129 = arith.constant dense<0.000000e+00> : vector<8xf32>
    %201 = vector.multi_reduction <add>, %189, %cst_129 [1] : vector<8x128xf32> to vector<8xf32>
    %202 = vector.shape_cast %201 : vector<8xf32> to vector<8x1xf32>
    %203 = arith.addf %109, %202 : vector<8x1xf32>
    %204 = tpu.iota {dimensions = array<i32: 1>} : vector<8x128xi32>
    %c4_i32 = arith.constant 4 : i32
    %205 = vector.broadcast %c4_i32 : i32 to vector<8x128xi32>
    %206 = arith.cmpi eq, %204, %205 : vector<8x128xi32>
    %207 = vector.shape_cast %203 : vector<8x1xf32> to vector<8x1xf32>
    %208 = vector.broadcast %207 : vector<8x1xf32> to vector<8x128xf32>
    %209 = arith.select %206, %208, %107 : vector<8x128xi1>, vector<8x128xf32>
    %c0_130 = arith.constant 0 : index
    %c0_131 = arith.constant 0 : index
    %210 = vector.load %arg12[%c0_130, %c0_131] : memref<8x256xf32, #tpu.memory_space<vmem>>, vector<8x128xf32>
    tpu.vector_store %arg12[%c0_130, %c0_131], %209 {strides = array<i32>} : memref<8x256xf32, #tpu.memory_space<vmem>>, vector<8x128xf32>,
    %c0_132 = arith.constant 0 : index
    %c128 = arith.constant 128 : index
    %211 = vector.load %arg12[%c0_132, %c128] : memref<8x256xf32, #tpu.memory_space<vmem>>, vector<8x128xf32>
    tpu.vector_store %arg12[%c0_132, %c128], %200 {strides = array<i32>} : memref<8x256xf32, #tpu.memory_space<vmem>>, vector<8x128xf32>,
    return
  }
  func.func @transform_0(%arg0: i32) -> (i32, i32) {
    %c0_i32 = arith.constant 0 : i32
    %c0_i32_0 = arith.constant 0 : i32
    return %arg0, %c0_i32 : i32, i32
  }
  func.func @transform_1(%arg0: i32) -> (i32, i32) {
    %c0_i32 = arith.constant 0 : i32
    %c0_i32_0 = arith.constant 0 : i32
    return %arg0, %c0_i32 : i32, i32
  }
  func.func @transform_2(%arg0: i32) -> (i32, i32) {
    %c0_i32 = arith.constant 0 : i32
    %c0_i32_0 = arith.constant 0 : i32
    %c0_i32_1 = arith.constant 0 : i32
    return %c0_i32, %c0_i32_0 : i32, i32
  }
  func.func @transform_3(%arg0: i32) -> (i32, i32) {
    %c0_i32 = arith.constant 0 : i32
    %c0_i32_0 = arith.constant 0 : i32
    %c0_i32_1 = arith.constant 0 : i32
    return %c0_i32, %c0_i32_0 : i32, i32
  }
  func.func @transform_4(%arg0: i32) -> (i32, i32, i32) {
    %c0_i32 = arith.constant 0 : i32
    %c0_i32_0 = arith.constant 0 : i32
    %c0_i32_1 = arith.constant 0 : i32
    %c0_i32_2 = arith.constant 0 : i32
    return %c0_i32, %c0_i32_0, %c0_i32_1 : i32, i32, i32
  }
  func.func @transform_5(%arg0: i32) -> (i32, i32, i32) {
    %c0_i32 = arith.constant 0 : i32
    %c0_i32_0 = arith.constant 0 : i32
    %c0_i32_1 = arith.constant 0 : i32
    %c0_i32_2 = arith.constant 0 : i32
    return %c0_i32, %c0_i32_0, %c0_i32_1 : i32, i32, i32
  }
  func.func @transform_6(%arg0: i32) -> (i32, i32, i32) {
    %c0_i32 = arith.constant 0 : i32
    %c0_i32_0 = arith.constant 0 : i32
    %c0_i32_1 = arith.constant 0 : i32
    %c0_i32_2 = arith.constant 0 : i32
    return %c0_i32, %c0_i32_0, %c0_i32_1 : i32, i32, i32
  }
  func.func @transform_7(%arg0: i32) -> (i32, i32, i32) {
    %c0_i32 = arith.constant 0 : i32
    %c0_i32_0 = arith.constant 0 : i32
    %c0_i32_1 = arith.constant 0 : i32
    %c0_i32_2 = arith.constant 0 : i32
    return %c0_i32, %c0_i32_0, %c0_i32_1 : i32, i32, i32
  }
  func.func @transform_8(%arg0: i32) -> (i32, i32, i32) {
    %c0_i32 = arith.constant 0 : i32
    %c0_i32_0 = arith.constant 0 : i32
    %c0_i32_1 = arith.constant 0 : i32
    %c0_i32_2 = arith.constant 0 : i32
    return %c0_i32, %c0_i32_0, %c0_i32_1 : i32, i32, i32
  }
  func.func @transform_9(%arg0: i32) -> (i32, i32, i32) {
    %c0_i32 = arith.constant 0 : i32
    %c0_i32_0 = arith.constant 0 : i32
    %c0_i32_1 = arith.constant 0 : i32
    %c0_i32_2 = arith.constant 0 : i32
    return %c0_i32, %c0_i32_0, %c0_i32_1 : i32, i32, i32
  }
  func.func @transform_10(%arg0: i32) -> (i32, i32, i32) {
    %c0_i32 = arith.constant 0 : i32
    %c0_i32_0 = arith.constant 0 : i32
    %c0_i32_1 = arith.constant 0 : i32
    %c0_i32_2 = arith.constant 0 : i32
    return %c0_i32, %c0_i32_0, %c0_i32_1 : i32, i32, i32
  }
  func.func @transform_11(%arg0: i32) -> (i32, i32) {
    %c0_i32 = arith.constant 0 : i32
    %c0_i32_0 = arith.constant 0 : i32
    return %arg0, %c0_i32 : i32, i32
  }
}

</mosaic_0001>

<bundles_post_ra>
// kernel: tpu_custom_call.1
= control target key start
LH: loop header
LB: loop body
LE: loop exit
PB: predicated region body
PF: predicated region fallthrough
CT: control target
= control target key end

     0   :  { %16 = vsyncpa [#allocation3], 0  ;;  %s3035_s0 = inlined_call_operand.hbm [shape: f32[8,256], index: 0, kind: input, shape index: {}]   ;;  %s3036_s1 = inlined_call_operand.hbm [shape: f32[8,128], index: 1, kind: input, shape index: {}]   ;;  %s3037_s2 = inlined_call_operand.hbm [shape: f32[1,256], index: 2, kind: input, shape index: {}]   ;;  %s3038_s3 = inlined_call_operand.hbm [shape: f32[1,256], index: 3, kind: input, shape index: {}]   ;;  %s3039_s4 = inlined_call_operand.hbm [shape: bf16[2,128,256], index: 4, kind: input, shape index: {}]   ;;  %s3040_s5 = inlined_call_operand.hbm [shape: bf16[2,128,256], index: 5, kind: input, shape index: {}]   ;;  %s3041_s6 = inlined_call_operand.vmem [shape: f32[2,1,256], index: 6, kind: input, shape index: {}]   ;;  %s3042_s7 = inlined_call_operand.hbm [shape: bf16[8,128,128], index: 7, kind: input, shape index: {}]   ;;  %s3043_s8 = inlined_call_operand.hbm [shape: f32[8,1,128], index: 8, kind: input, shape index: {}]   ;;  %s3044_s9 = inlined_call_operand.hbm [shape: bf16[4,128,128], index: 9, kind: input, shape index: {}]   ;;  %s3045_s10 = inlined_call_operand.vmem [shape: f32[4,1,128], index: 10, kind: input, shape index: {}]   ;;  %s3046_s11 = inlined_call_operand.hbm [shape: f32[8,256], index: 11, kind: output, shape index: {}]  }
   0x1   :  { %17 = vsyncpa [#allocation6], 0 }
   0x2   :  { %18 = vsyncpa [#allocation9], 0 }
   0x3   :  { %19 = vsyncpa [#allocation12], 0 }
   0x4   :  { %20 = vsyncpa [#allocation15], 0  ;;  %s38_s19 = sshll.u32 %s3036_s1, 4  ;;  %s39_s19 = int_to_ptr.hbm [resolvable:$true] %s38_s19 }
   0x5   :  { %21 = vsyncpa [#allocation4], 0  ;;  %s2881_s20 = smov [#allocation5]   ;;  %s60_s24 = sshll.u32 %s3038_s3, 4  ;;  %s61_s24 = int_to_ptr.hbm [resolvable:$true] %s60_s24 }
   0x6   :  { %s40_s21 = sshll.u32 %s2881_s20, 4  ;;  %s2882_s25 = smov [#allocation8]   ;;  %s41_s21 = int_to_ptr.vmem [resolvable:$true] %s40_s21 }
   0x7   :  { %43 = dma.hbm_to_vmem [thread:$0]  %s39_s19, 128, %s41_s21, [#allocation6]  }
   0x8   :  { %s62_s26 = sshll.u32 %s2882_s25, 4  ;;  %s83_s29 = sshll.u32 %s3040_s5, 4  ;;  %s63_s26 = int_to_ptr.vmem [resolvable:$true] %s62_s26  ;;  %s84_s29 = int_to_ptr.hbm [resolvable:$true] %s83_s29 }
   0x9   :  { %65 = dma.hbm_to_vmem [thread:$0]  %s61_s24, 32, %s63_s26, [#allocation9]  }
   0xa   :  { %s2883_s1 = smov [#allocation11]   ;;  %s111_s14 = sshll.u32 %s3043_s8, 4  ;;  %s112_s14 = int_to_ptr.hbm [resolvable:$true] %s111_s14 }
   0xb   :  { %s85_s30 = sshll.u32 %s2883_s1, 4  ;;  %s2884_s15 = smov 128   ;;  %s86_s30 = int_to_ptr.vmem [resolvable:$true] %s85_s30 }
   0xc   :  { %s2885_s3 = smov 8   ;;  %s2886_s16 = smov [#allocation14]  }
   0xd   :  { %91 = dma.hbm_to_vmem [thread:$0]  %s84_s29, 4096, %s86_s30, [#allocation12], %s2884_s15, %s2884_s15, %s2885_s3  }
   0xe   :  { %s113_s17 = sshll.u32 %s2886_s16, 4  ;;  %s2887_s18 = smov 16   ;;  %s114_s17 = int_to_ptr.vmem [resolvable:$true] %s113_s17 }
   0xf   :  { %s2888_s5 = smov 1   ;;  %s27_s21 = sshll.u32 %s3035_s0, 4  ;;  %s28_s21 = int_to_ptr.hbm [resolvable:$true] %s27_s21 }
  0x10   :  { %119 = dma.hbm_to_vmem [thread:$0]  %s112_s14, 128, %s114_s17, [#allocation15], %s2887_s18, %s2887_s18, %s2888_s5  }
  0x11   :  { %s2889_s22 = smov [#allocation2]   ;;  %s49_s25 = sshll.u32 %s3037_s2, 4  ;;  %s50_s25 = int_to_ptr.hbm [resolvable:$true] %s49_s25 }
  0x12   :  { %s29_s8 = sshll.u32 %s2889_s22, 4  ;;  %s2890_s26 = smov [#allocation7]   ;;  %s30_s8 = int_to_ptr.vmem [resolvable:$true] %s29_s8 }
  0x13   :  { %32 = dma.hbm_to_vmem [thread:$0]  %s28_s21, 256, %s30_s8, [#allocation3]  }
  0x14   :  { %s51_s27 = sshll.u32 %s2890_s26, 4  ;;  %s70_s1 = sshll.u32 %s3039_s4, 4  ;;  %s52_s27 = int_to_ptr.vmem [resolvable:$true] %s51_s27  ;;  %s71_s1 = int_to_ptr.hbm [resolvable:$true] %s70_s1 }
  0x15   :  { %54 = dma.hbm_to_vmem [thread:$0]  %s50_s25, 32, %s52_s27, [#allocation6]  }
  0x16   :  { %s98_s12 = sshll.u32 %s3042_s7, 4  ;;  %s2891_s13 = smov [#allocation10]   ;;  %s99_s12 = int_to_ptr.hbm [resolvable:$true] %s98_s12 }
  0x17   :  { %s72_s14 = sshll.u32 %s2891_s13, 4  ;;  %s2892_s2 = smov [#allocation13]   ;;  %s73_s14 = int_to_ptr.vmem [resolvable:$true] %s72_s14 }
  0x18   :  { %78 = dma.hbm_to_vmem [thread:$0]  %s71_s1, 4096, %s73_s14, [#allocation9], %s2884_s15, %s2884_s15, %s2885_s3  }
  0x19   :  { %s100_s16 = sshll.u32 %s2892_s2, 4  ;;  %s2893_s17 = smov 64   ;;  %s101_s16 = int_to_ptr.vmem [resolvable:$true] %s100_s16 }
  0x1a   :  { %s2894_s4 = smov 4   ;;  %s124_s19 = sshll.u32 %s3044_s9, 4  ;;  %s125_s19 = int_to_ptr.hbm [resolvable:$true] %s124_s19 }
  0x1b   :  { %106 = dma.hbm_to_vmem [thread:$0]  %s99_s12, 8192, %s101_s16, [#allocation12], %s2893_s17, %s2893_s17, %s2894_s4  }
  0x1c   :  { %s2895_s7 = smov [#allocation16]  }
  0x1d   :  { %s126_s20 = sshll.u32 %s2895_s7, 4  ;;  %s127_s20 = int_to_ptr.vmem [resolvable:$true] %s126_s20 }
  0x1e   :  { %132 = dma.hbm_to_vmem [thread:$0]  %s125_s19, 4096, %s127_s20, [#allocation15], %s2893_s17, %s2893_s17, %s2894_s4  }
  0x1f   :  { %2869 = dma.done.wait [#allocation3], 256  }
  0x20   :  { %2870 = vsyncadd [#allocation3], 4294967040 }
  0x21   :  { %2871 = dma.done.wait [#allocation6], 160  }
  0x22   :  { %2872 = vsyncadd [#allocation6], 4294967136 }
  0x23   :  { %2873 = dma.done.wait [#allocation9], 4128  }
  0x24   :  { %2874 = vsyncadd [#allocation9], 4294963168 }
  0x25   :  { %2875 = dma.done.wait [#allocation12], 12288  }
  0x26   :  { %2876 = vsyncadd [#allocation12], 4294955008 }
  0x27   :  { %2877 = dma.done.wait [#allocation15], 4224  }
  0x28   :  { %2878 = vsyncadd [#allocation15], 4294963072  ;;  %v1846_v0 = vld [vmem:[#allocation11 + $0x70] sm:$0xf]  ;;  %v2447_v1 = vld [vmem:[#allocation11 + $0x74] sm:$0xf0] }
  0x29   :  { %v1910_v2 = vld [vmem:[#allocation10 + $0x70] sm:$0xf]  ;;  %v1847_v3 = vor.u32 %v2447_v1, %v1846_v0  ;;  %v2463_v4 = vld [vmem:[#allocation10 + $0x74] sm:$0xf0]  ;;  %v1838_v5 = vld [vmem:[#allocation11 + $0x60] sm:$0xf] }
  0x2a   :  { %v2445_v6 = vld [vmem:[#allocation11 + $0x64] sm:$0xf0]  ;;  %v1911_v7 = vor.u32 %v2463_v4, %v1910_v2  ;;  %v1902_v8 = vld [vmem:[#allocation10 + $0x60] sm:$0xf]  ;;  %v2462_v10 = vld [vmem:[#allocation10 + $0x74] sm:$0xf] }
  0x2b   :  { %v2461_v9 = vld [vmem:[#allocation10 + $0x64] sm:$0xf0]  ;;  %293 = vmatpush.bf16.msra.mxu0 %v1847_v3  ;;  %v1839_v11 = vor.u32 %v2445_v6, %v1838_v5  ;;  %v1912_v12 = vld [vmem:[#allocation10 + $0x78] sm:$0xf0]  ;;  %v1830_v13 = vld [vmem:[#allocation11 + $0x50] sm:$0xf] }
  0x2c   :  { %v2443_v14 = vld [vmem:[#allocation11 + $0x54] sm:$0xf0]  ;;  %416 = vmatpush.bf16.msra.mxu2 %v1911_v7  ;;  %v1903_v15 = vor.u32 %v2461_v9, %v1902_v8  ;;  %v1915_v16 = vor.u32 %v2462_v10, %v1912_v12  ;;  %v1894_v17 = vld [vmem:[#allocation10 + $0x50] sm:$0xf]  ;;  %v2460_v19 = vld [vmem:[#allocation10 + $0x64] sm:$0xf] }
  0x2d   :  { %v2459_v18 = vld [vmem:[#allocation10 + $0x54] sm:$0xf0]  ;;  %v1904_v20 = vld [vmem:[#allocation10 + $0x68] sm:$0xf0]  ;;  %v2446_v21 = vld [vmem:[#allocation11 + $0x74] sm:$0xf]  ;;  %v1831_v25 = vor.u32 %v2443_v14, %v1830_v13 }
  0x2e   :  { %v1848_v22 = vld [vmem:[#allocation11 + $0x78] sm:$0xf0]  ;;  %429 = vmatpush.bf16.msra.mxu3 %v1915_v16  ;;  %v1907_v23 = vor.u32 %v2460_v19, %v1904_v20  ;;  %v1822_v26 = vld [vmem:[#allocation11 + $0x40] sm:$0xf]  ;;  %v2458_v27 = vld [vmem:[#allocation10 + $0x54] sm:$0xf]  ;;  %v1895_v29 = vor.u32 %v2459_v18, %v1894_v17 }
  0x2f   :  { %v1851_v24 = vor.u32 %v2446_v21, %v1848_v22  ;;  %294 = vmatpush.bf16.msra.mxu0 %v1839_v11  ;;  %v1896_v28 = vld [vmem:[#allocation10 + $0x58] sm:$0xf0]  ;;  %v2441_v30 = vld [vmem:[#allocation11 + $0x44] sm:$0xf0]  ;;  %v2444_v31 = vld [vmem:[#allocation11 + $0x64] sm:$0xf] }
  0x30   :  { %417 = vmatpush.bf16.msra.mxu2 %v1903_v15  ;;  %v1840_v32 = vld [vmem:[#allocation11 + $0x68] sm:$0xf0]  ;;  %v1886_v33 = vld [vmem:[#allocation10 + $0x40] sm:$0xf]  ;;  %v2457_v34 = vld [vmem:[#allocation10 + $0x44] sm:$0xf0]  ;;  %v1899_v36 = vor.u32 %v2458_v27, %v1896_v28  ;;  %v1823_v38 = vor.u32 %v2441_v30, %v1822_v26 }
  0x31   :  { %306 = vmatpush.bf16.msra.mxu1 %v1851_v24  ;;  %v1843_v35 = vor.u32 %v2444_v31, %v1840_v32  ;;  %v2442_v37 = vld [vmem:[#allocation11 + $0x54] sm:$0xf]  ;;  %v2456_v39 = vld [vmem:[#allocation10 + $0x44] sm:$0xf]  ;;  %v1888_v40 = vld [vmem:[#allocation10 + $0x48] sm:$0xf0]  ;;  %v1887_v42 = vor.u32 %v2457_v34, %v1886_v33 }
  0x32   :  { %430 = vmatpush.bf16.msra.mxu3 %v1907_v23  ;;  %v1832_v41 = vld [vmem:[#allocation11 + $0x58] sm:$0xf0]  ;;  %v1814_v43 = vld [vmem:[#allocation11 + $0x30] sm:$0xf]  ;;  %v2439_v44 = vld [vmem:[#allocation11 + $0x34] sm:$0xf0]  ;;  %v1891_v50 = vor.u32 %v2456_v39, %v1888_v40 }
  0x33   :  { %295 = vmatpush.bf16.msra.mxu0 %v1831_v25  ;;  %v1878_v45 = vld [vmem:[#allocation10 + $0x30] sm:$0xf]  ;;  %v1835_v46 = vor.u32 %v2442_v37, %v1832_v41  ;;  %v2455_v47 = vld [vmem:[#allocation10 + $0x34] sm:$0xf0]  ;;  %v2440_v48 = vld [vmem:[#allocation11 + $0x44] sm:$0xf]  ;;  %v1815_v51 = vor.u32 %v2439_v44, %v1814_v43 }
  0x34   :  { %418 = vmatpush.bf16.msra.mxu2 %v1895_v29  ;;  %v1824_v49 = vld [vmem:[#allocation11 + $0x48] sm:$0xf0]  ;;  %v2454_v52 = vld [vmem:[#allocation10 + $0x34] sm:$0xf]  ;;  %v1880_v53 = vld [vmem:[#allocation10 + $0x38] sm:$0xf0]  ;;  %v1879_v54 = vor.u32 %v2455_v47, %v1878_v45 }
  0x35   :  { %307 = vmatpush.bf16.msra.mxu1 %v1843_v35  ;;  %v1806_v55 = vld [vmem:[#allocation11 + $0x20] sm:$0xf]  ;;  %v2437_v56 = vld [vmem:[#allocation11 + $0x24] sm:$0xf0]  ;;  %v1827_v58 = vor.u32 %v2440_v48, %v1824_v49  ;;  %v2438_v60 = vld [vmem:[#allocation11 + $0x34] sm:$0xf]  ;;  %v1883_v62 = vor.u32 %v2454_v52, %v1880_v53 }
  0x36   :  { %431 = vmatpush.bf16.msra.mxu3 %v1899_v36  ;;  %v1870_v57 = vld [vmem:[#allocation10 + $0x20] sm:$0xf]  ;;  %v2453_v59 = vld [vmem:[#allocation10 + $0x24] sm:$0xf0]  ;;  %v1816_v61 = vld [vmem:[#allocation11 + $0x38] sm:$0xf0]  ;;  %v1807_v2 = vor.u32 %v2437_v56, %v1806_v55 }
  0x37   :  { %296 = vmatpush.bf16.msra.mxu0 %v1823_v38  ;;  %v1798_v63 = vld [vmem:[#allocation11 + $0x10] sm:$0xf]  ;;  %v2435_v0 = vld [vmem:[#allocation11 + $0x14] sm:$0xf0]  ;;  %v2452_v1 = vld [vmem:[#allocation10 + $0x24] sm:$0xf]  ;;  %v1871_v8 = vor.u32 %v2453_v59, %v1870_v57  ;;  %v1819_v9 = vor.u32 %v2438_v60, %v1816_v61 }
  0x38   :  { %419 = vmatpush.bf16.msra.mxu2 %v1887_v42  ;;  %v1862_v3 = vld [vmem:[#allocation10 + $0x10] sm:$0xf]  ;;  %v2451_v4 = vld [vmem:[#allocation10 + $0x14] sm:$0xf0]  ;;  %v1872_v5 = vld [vmem:[#allocation10 + $0x28] sm:$0xf0]  ;;  %v1799_v19 = vor.u32 %v2435_v0, %v1798_v63 }
  0x39   :  { %308 = vmatpush.bf16.msra.mxu1 %v1835_v46  ;;  %v2436_v6 = vld [vmem:[#allocation11 + $0x24] sm:$0xf]  ;;  %v172_v10 = vld [vmem:[#allocation2 + $0x8] sm:$0xff]  ;;  %v174_v11 = vld [vmem:[#allocation8] sm:$0x3]  ;;  %v1875_v18 = vor.u32 %v2452_v1, %v1872_v5  ;;  %v1863_v25 = vor.u32 %v2451_v4, %v1862_v3  ;;  %s2897_s28 = smov [#allocation17]  }
  0x3a   :  { %432 = vmatpush.bf16.msra.mxu3 %v1891_v50  ;;  %v171_v7 = vld [vmem:[#allocation2] sm:$0xff]  ;;  %v175_v12 = vld [vmem:[#allocation7] sm:$0x3]  ;;  %v1808_v13 = vld [vmem:[#allocation11 + $0x28] sm:$0xf0]  ;;  %v184_v16 = vperm.slane %v174_v11, 0 }
  0x3b   :  { %297 = vmatpush.bf16.msra.mxu0 %v1815_v51  ;;  %v177_v14 = vperm.slane %v175_v12, 0  ;;  %v178_v15 = vperm.slane %v175_v12, 1  ;;  %v185_v17 = vperm.slane %v174_v11, 1  ;;  %v1790_v20 = vld [vmem:[#allocation11] sm:$0xf]  ;;  %v1811_v29 = vor.u32 %v2436_v6, %v1808_v13  ;;  %v173_v30 = vld [vmem:[#allocation5] sm:$0xff] }
  0x3c   :  { %420 = vmatpush.bf16.msra.mxu2 %v1879_v54  ;;  %v2450_v21 = vld [vmem:[#allocation10 + $0x14] sm:$0xf]  ;;  %v1864_v22 = vld [vmem:[#allocation10 + $0x18] sm:$0xf0]  ;;  %v2433_v26 = vld [vmem:[#allocation11 + $0x4] sm:$0xf0]  ;;  %v2998_v48 = vpack.c.bf16 %v173_v30, %v173_v30 }
  0x3d   :  { %309 = vmatpush.bf16.msra.mxu1 %v1827_v58  ;;  %v181_v23 = vadd.f32 %v177_v14, %v171_v7  ;;  %v182_v24 = vadd.f32 %v178_v15, %v172_v10  ;;  %v1854_v27 = vld [vmem:[#allocation10] sm:$0xf]  ;;  %v2449_v28 = vld [vmem:[#allocation10 + $0x4] sm:$0xf0]  ;;  %v2448_v33 = vld [vmem:[#allocation10 + $0x4] sm:$0xf]  ;;  %v1867_v37 = vor.u32 %v2450_v21, %v1864_v22  ;;  %v1791_v38 = vor.u32 %v2433_v26, %v1790_v20 }
  0x3e   :  { %433 = vmatpush.bf16.msra.mxu3 %v1883_v62  ;;  %v1856_v34 = vld [vmem:[#allocation10 + $0x8] sm:$0xf0]  ;;  %v2434_v35 = vld [vmem:[#allocation11 + $0x14] sm:$0xf]  ;;  %v1800_v36 = vld [vmem:[#allocation11 + $0x18] sm:$0xf0]  ;;  %v1855_v42 = vor.u32 %v2449_v28, %v1854_v27 }
  0x3f   :  { %298 = vmatpush.bf16.msra.mxu0 %v1807_v2  ;;  %v188_v31 = vmul.f32 %v184_v16, %v181_v23  ;;  %v2991_v32 = vmul.f32 %v185_v17, %v182_v24  ;;  %v2432_v39 = vld [vmem:[#allocation11 + $0x4] sm:$0xf]  ;;  %v1792_v40 = vld [vmem:[#allocation11 + $0x8] sm:$0xf0]  ;;  %v2471_v41 = vld [vmem:[#allocation13 + $0x38] sm:$0xff]  ;;  %v1803_v46 = vor.u32 %v2434_v35, %v1800_v36  ;;  %v1859_v49 = vor.u32 %v2448_v33, %v1856_v34  ;;  %s1772_s29 = sshll.u32 %s2897_s28, 4  ;;  %s1773_s29 = int_to_ptr.vmem [resolvable:$true] %s1772_s29 }
  0x40   :  { %421 = vmatpush.bf16.msra.mxu2 %v1871_v8  ;;  %v2896_v43 = vmov 0.9   ;;  %v1795_v51 = vor.u32 %v2432_v39, %v1792_v40  ;;  %v2470_v52 = vld [vmem:[#allocation13 + $0x30] sm:$0xff]  ;;  %v2479_v53 = vld [vmem:[#allocation13 + $0xb8] sm:$0xff]  ;;  %v2469_v54 = vld [vmem:[#allocation13 + $0x28] sm:$0xff]  ;;  %s1774_s30 = sshll.u32 %s3046_s11, 4  ;;  %s1775_s30 = int_to_ptr.hbm [resolvable:$true] %s1774_s30 }
  0x41   :  { %310 = vmatpush.bf16.msra.mxu1 %v1819_v9  ;;  %vm190_vm0 = vcmp.ge.f32.partialorder %v188_v31, 0.0  ;;  %vm191_vm1 = vcmp.ge.f32.partialorder %v2991_v32, 0.0  ;;  %v2478_v55 = vld [vmem:[#allocation13 + $0xb0] sm:$0xff]  ;;  %v2468_v56 = vld [vmem:[#allocation13 + $0x20] sm:$0xff]  ;;  %v2477_v57 = vld [vmem:[#allocation13 + $0xa8] sm:$0xff] }
  0x42   :  { %434 = vmatpush.bf16.msra.mxu3 %v1875_v18  ;;  %v192_v44 = vsel %vm190_vm0, 1.0, %v2896_v43  ;;  %v2994_v45 = vsel %vm191_vm1, 1.0, %v2896_v43  ;;  %v2467_v58 = vld [vmem:[#allocation13 + $0x18] sm:$0xff]  ;;  %v2476_v59 = vld [vmem:[#allocation13 + $0xa0] sm:$0xff]  ;;  %v2466_v60 = vld [vmem:[#allocation13 + $0x10] sm:$0xff] }
  0x43   :  { %299 = vmatpush.bf16.msra.mxu0 %v1799_v19  ;;  %v2996_v47 = vmul.f32 %v192_v44, %v188_v31  ;;  %v2475_v61 = vld [vmem:[#allocation13 + $0x98] sm:$0xff]  ;;  %v2465_v62 = vld [vmem:[#allocation13 + $0x8] sm:$0xff]  ;;  %v2474_v63 = vld [vmem:[#allocation13 + $0x90] sm:$0xff] }
  0x44   :  { %422 = vmatpush.bf16.msra.mxu2 %v1863_v25  ;;  %v2464_v0 = vld [vmem:[#allocation13] sm:$0xff]  ;;  %v2473_v1 = vld [vmem:[#allocation13 + $0x88] sm:$0xff]  ;;  %v2487_v3 = vld [vmem:[#allocation13 + $0x78] sm:$0xff] }
  0x45   :  { %311 = vmatpush.bf16.msra.mxu1 %v1811_v29  ;;  %v335_v50 = vpack.c.bf16 %v2996_v47, %v2996_v47  ;;  %v2472_v2 = vld [vmem:[#allocation13 + $0x80] sm:$0xff]  ;;  %v2495_v4 = vld [vmem:[#allocation13 + $0xf8] sm:$0xff]  ;;  %v2486_v5 = vld [vmem:[#allocation13 + $0x70] sm:$0xff] }
  0x46   :  { %435 = vmatpush.bf16.msra.mxu3 %v1867_v37  ;;  %v2494_v6 = vld [vmem:[#allocation13 + $0xf0] sm:$0xff]  ;;  %v2485_v7 = vld [vmem:[#allocation13 + $0x68] sm:$0xff]  ;;  %v2484_v9 = vld [vmem:[#allocation13 + $0x60] sm:$0xff] }
  0x47   :  { %300 = vmatpush.bf16.msra.mxu0 %v1791_v38  ;;  %v2493_v8 = vld [vmem:[#allocation13 + $0xe8] sm:$0xff]  ;;  %v2492_v10 = vld [vmem:[#allocation13 + $0xe0] sm:$0xff]  ;;  %v2483_v12 = vld [vmem:[#allocation13 + $0x58] sm:$0xff] }
  0x48   :  { %423 = vmatpush.bf16.msra.mxu2 %v1855_v42  ;;  %v2491_v13 = vld [vmem:[#allocation13 + $0xd8] sm:$0xff]  ;;  %v442_v14 = vld [vmem:[%s3041_s6] sm:$0x3]  ;;  %v2482_v16 = vld [vmem:[#allocation13 + $0x50] sm:$0xff] }
  0x49   :  { %312 = vmatpush.bf16.msra.mxu1 %v1803_v46  ;;  %v444_v17 = vperm.slane %v442_v14, 0  ;;  %v445_v21 = vperm.slane %v442_v14, 1  ;;  %v2481_v36 = vld [vmem:[#allocation13 + $0x48] sm:$0xff]  ;;  %v2490_v37 = vld [vmem:[#allocation13 + $0xd0] sm:$0xff]  ;;  %v2480_v38 = vld [vmem:[#allocation13 + $0x40] sm:$0xff] }
  0x4a   :  { %301 = vmatmul.bf16.vlgmr.msra.gmra.mxu0 %v2998_v48  ;;  %436 = vmatpush.bf16.msra.mxu3 %v1859_v49  ;;  %v2489_v39 = vld [vmem:[#allocation13 + $0xc8] sm:$0xff]  ;;  %v2488_v40 = vld [vmem:[#allocation13 + $0xc0] sm:$0xff]  ;;  %v2502_v43 = vld [vmem:[#allocation16 + $0x30] sm:$0xff] }
  0x4b   :  { %525 = vmatpush.bf16.msrb.mxu0 %v2471_v41  ;;  %424 = vmatmul.bf16.vlgmr.msra.gmra.mxu2 %v335_v50  ;;  %v2503_v41 = vld [vmem:[#allocation16 + $0x38] sm:$0xff]  ;;  %v2510_v44 = vld [vmem:[#allocation16 + $0x70] sm:$0xff]  ;;  %v2501_v46 = vld [vmem:[#allocation16 + $0x28] sm:$0xff] }
  0x4c   :  { %699 = vmatpush.bf16.msrb.mxu2 %v2487_v3  ;;  %v2511_v42 = vld [vmem:[#allocation16 + $0x78] sm:$0xff]  ;;  %v2509_v49 = vld [vmem:[#allocation16 + $0x68] sm:$0xff]  ;;  %v2525_v14 = vld [vmem:[#allocation11 + $0xe4] sm:$0xf0] }
  0x4d   :  { %313 = vmatpush.bf16.msra.mxu1 %v1795_v51  ;;  %437 = vmatmul.bf16.vlgmr.msra.gmra.mxu3 %v335_v50  ;;  %v2500_v50 = vld [vmem:[#allocation16 + $0x20] sm:$0xff] }
  0x4e   :  { %786 = vmatpush.bf16.msrb.mxu3 %v2495_v4  ;;  %v2508_v51 = vld [vmem:[#allocation16 + $0x60] sm:$0xff] }
  0x4f   :  { %526 = vmatpush.bf16.msrb.mxu0 %v2470_v52  ;;  %v2499_v52 = vld [vmem:[#allocation16 + $0x18] sm:$0xff] }
  0x50   :  { %314 = vmatmul.bf16.vlgmr.msra.gmra.mxu1 %v2998_v48  ;;  %700 = vmatpush.bf16.msrb.mxu2 %v2486_v5  ;;  %v2497_v5 = vld [vmem:[#allocation16 + $0x8] sm:$0xff] }
  0x51   :  { %612 = vmatpush.bf16.msrb.mxu1 %v2479_v53  ;;  %v2507_v53 = vld [vmem:[#allocation16 + $0x58] sm:$0xff] }
  0x52   :  { %787 = vmatpush.bf16.msrb.mxu3 %v2494_v6  ;;  %v2506_v6 = vld [vmem:[#allocation16 + $0x50] sm:$0xff] }
  0x53   :  { %527 = vmatpush.bf16.msrb.mxu0 %v2469_v54  ;;  %v2498_v54 = vld [vmem:[#allocation16 + $0x10] sm:$0xff] }
  0x54   :  { %701 = vmatpush.bf16.msrb.mxu2 %v2485_v7  ;;  %v2496_v7 = vld [vmem:[#allocation16] sm:$0xff] }
  0x55   :  { %613 = vmatpush.bf16.msrb.mxu1 %v2478_v55  ;;  %v2609_v55 = vld [vmem:[#allocation14] ss:$0 sm:$0xff] }
  0x56   :  { %788 = vmatpush.bf16.msrb.mxu3 %v2493_v8  ;;  %v2505_v8 = vld [vmem:[#allocation16 + $0x48] sm:$0xff] }
  0x57   :  { %528 = vmatpush.bf16.msrb.mxu0 %v2468_v56  ;;  %v2610_v56 = vld [vmem:[#allocation14 + $0x2] ss:$0 sm:$0xff] }
  0x58   :  { %702 = vmatpush.bf16.msrb.mxu2 %v2484_v9  ;;  %v2504_v9 = vld [vmem:[#allocation16 + $0x40] sm:$0xff] }
  0x59   :  { %614 = vmatpush.bf16.msrb.mxu1 %v2477_v57 }
  0x5a   :  { %789 = vmatpush.bf16.msrb.mxu3 %v2492_v10  ;;  %v2167_v10 = vld [vmem:[#allocation11 + $0xf0] sm:$0xf] }
  0x5b   :  { %529 = vmatpush.bf16.msrb.mxu0 %v2467_v58 }
  0x5c   :  { %703 = vmatpush.bf16.msrb.mxu2 %v2483_v12  ;;  %v2159_v12 = vld [vmem:[#allocation11 + $0xe0] sm:$0xf] }
  0x5d   :  { %615 = vmatpush.bf16.msrb.mxu1 %v2476_v59 }
  0x5e   :  { %790 = vmatpush.bf16.msrb.mxu3 %v2491_v13 }
  0x5f   :  { %530 = vmatpush.bf16.msrb.mxu0 %v2466_v60 }
  0x60   :  { %704 = vmatpush.bf16.msrb.mxu2 %v2482_v16  ;;  %v2526_v16 = vld [vmem:[#allocation11 + $0xf4] sm:$0xf] }
  0x61   :  { %616 = vmatpush.bf16.msrb.mxu1 %v2475_v61 }
  0x62   :  { %791 = vmatpush.bf16.msrb.mxu3 %v2490_v37  ;;  %v2225_v37 = vld [vmem:[#allocation10 + $0xe8] sm:$0xf0] }
  0x63   :  { %531 = vmatpush.bf16.msrb.mxu0 %v2465_v62 }
  0x64   :  { %705 = vmatpush.bf16.msrb.mxu2 %v2481_v36  ;;  %v2540_v36 = vld [vmem:[#allocation10 + $0xe4] sm:$0xf] }
  0x65   :  { %617 = vmatpush.bf16.msrb.mxu1 %v2474_v63 }
  0x66   :  { %792 = vmatpush.bf16.msrb.mxu3 %v2489_v39  ;;  %v2521_v39 = vld [vmem:[#allocation11 + $0xc4] sm:$0xf0] }
  0x67   :  { %532 = vmatpush.bf16.msrb.mxu0 %v2464_v0 }
  0x68   :  { %706 = vmatpush.bf16.msrb.mxu2 %v2480_v38  ;;  %v2143_v38 = vld [vmem:[#allocation11 + $0xc0] sm:$0xf] }
  0x69   :  { %618 = vmatpush.bf16.msrb.mxu1 %v2473_v1 }
  0x6a   :  { %793 = vmatpush.bf16.msrb.mxu3 %v2488_v40 }
  0x6b   :  { %871 = vmatpush.bf16.msra.mxu0 %v2503_v41  ;;  %v2228_v41 = vor.u32 %v2540_v36, %v2225_v37  ;;  %v2514_v37 = vld [vmem:[#allocation11 + $0x94] sm:$0xf] }
  0x6d   :  { %619 = vmatpush.bf16.msrb.mxu1 %v2472_v2 }
  0x6f   :  { %872 = vmatpush.bf16.msra.mxu0 %v2502_v43  ;;  %v2144_v43 = vor.u32 %v2521_v39, %v2143_v38  ;;  %v2121_v38 = vld [vmem:[#allocation11 + $0x98] sm:$0xf0] }
  0x70   :  { %v2124_v39 = vor.u32 %v2514_v37, %v2121_v38  ;;  %v2565_v37 = vld [vmem:[#allocation13 + $0x168] sm:$0xff] }
  0x71   :  { %956 = vmatpush.bf16.msra.mxu1 %v2511_v42  ;;  %v2573_v38 = vld [vmem:[#allocation13 + $0x1e8] sm:$0xff] }
  0x73   :  { %873 = vmatpush.bf16.msra.mxu0 %v2501_v46  ;;  %v2519_v46 = vld [vmem:[#allocation11 + $0xb4] sm:$0xf0] }
  0x75   :  { %957 = vmatpush.bf16.msra.mxu1 %v2510_v44  ;;  %v2135_v44 = vld [vmem:[#allocation11 + $0xb0] sm:$0xf] }
  0x77   :  { %874 = vmatpush.bf16.msra.mxu0 %v2500_v50  ;;  %v2611_v50 = vld [vmem:[#allocation14 + $0x1] ss:$0 sm:$0xff] }
  0x79   :  { %958 = vmatpush.bf16.msra.mxu1 %v2509_v49  ;;  %v2136_v49 = vor.u32 %v2519_v46, %v2135_v44  ;;  %v2532_v44 = vld [vmem:[#allocation10 + $0xa4] sm:$0xf]  ;;  %v2193_v46 = vld [vmem:[#allocation10 + $0xa8] sm:$0xf0] }
  0x7b   :  { %875 = vmatpush.bf16.msra.mxu0 %v2499_v52 }
  0x7d   :  { %959 = vmatpush.bf16.msra.mxu1 %v2508_v51  ;;  %v2612_v51 = vld [vmem:[#allocation14 + $0x3] ss:$0 sm:$0xff] }
  0x7f   :  { %876 = vmatpush.bf16.msra.mxu0 %v2498_v54 }
  0x81   :  { %960 = vmatpush.bf16.msra.mxu1 %v2507_v53 }
  0x83   :  { %877 = vmatpush.bf16.msra.mxu0 %v2497_v5 }
  0x85   :  { %961 = vmatpush.bf16.msra.mxu1 %v2506_v6  ;;  %v2215_v6 = vld [vmem:[#allocation10 + $0xd0] sm:$0xf] }
  0x87   :  { %878 = vmatpush.bf16.msra.mxu0 %v2496_v7  ;;  %v2539_v7 = vld [vmem:[#allocation10 + $0xd4] sm:$0xf0] }
  0x89   :  { %962 = vmatpush.bf16.msra.mxu1 %v2505_v8  ;;  %v2538_v8 = vld [vmem:[#allocation10 + $0xd4] sm:$0xf] }
  0x8d   :  { %963 = vmatpush.bf16.msra.mxu1 %v2504_v9  ;;  %v2216_v9 = vor.u32 %v2539_v7, %v2215_v6 }
  0xc7   :  { %v302_v11 = vpop.f32.mrf.mxu0 }
  0xcd   :  { %v315_v15 = vpop.f32.mrf.mxu1 }
  0xce   :  { %v425_v18 = vpop.f32.mrf.mxu2 }
  0xcf   :  { %v426_v19 = vadd.f32 %v425_v18, %v302_v11  ;;  %v304_v20 = vpop.f32.mrf.mxu0  ;;  %v2527_v11 = vld [vmem:[#allocation11 + $0xf4] sm:$0xf0]  ;;  %v2160_v18 = vor.u32 %v2525_v14, %v2159_v12  ;;  %v2119_v12 = vld [vmem:[#allocation11 + $0x90] sm:$0xf]  ;;  %v2518_v14 = vld [vmem:[#allocation11 + $0xb4] sm:$0xf] }
  0xd0   :  { %v438_v22 = vpop.f32.mrf.mxu3  ;;  %v2168_v13 = vor.u32 %v2527_v11, %v2167_v10  ;;  %v2217_v10 = vld [vmem:[#allocation10 + $0xd8] sm:$0xf0] }
  0xd1   :  { %v448_v23 = vadd.f32 %v444_v17, %v426_v19  ;;  %v439_v24 = vadd.f32 %v438_v22, %v315_v15  ;;  %v2151_v15 = vld [vmem:[#allocation11 + $0xd0] sm:$0xf]  ;;  %v2169_v17 = vld [vmem:[#allocation11 + $0xf8] sm:$0xf0]  ;;  %v2523_v19 = vld [vmem:[#allocation11 + $0xd4] sm:$0xf0]  ;;  %v2220_v11 = vor.u32 %v2538_v8, %v2217_v10 }
  0xd2   :  { %1072 = vmatpush.bf16.msra.mxu2 %v2168_v13  ;;  %v2172_v20 = vor.u32 %v2526_v16, %v2169_v17  ;;  %v2161_v22 = vld [vmem:[#allocation11 + $0xe8] sm:$0xf0]  ;;  %v2515_v13 = vld [vmem:[#allocation11 + $0x94] sm:$0xf0]  ;;  %v2137_v16 = vld [vmem:[#allocation11 + $0xb8] sm:$0xf0] }
  0xd3   :  { %v452_v25 = vmul.f32 0.01, %v448_v23  ;;  %v449_v26 = vadd.f32 %v445_v21, %v439_v24  ;;  %vm450_vm2 = vcmp.ge.f32.partialorder %v448_v23, 0.0  ;;  %v2524_v21 = vld [vmem:[#allocation11 + $0xe4] sm:$0xf]  ;;  %v2140_v17 = vor.u32 %v2518_v14, %v2137_v16  ;;  %v2550_v14 = vld [vmem:[#allocation13 + $0x130] sm:$0xff] }
  0xd4   :  { %v2543_v24 = vld [vmem:[#allocation10 + $0xf4] sm:$0xf0]  ;;  %1085 = vmatpush.bf16.msra.mxu3 %v2172_v20  ;;  %v2536_v20 = vld [vmem:[#allocation10 + $0xc4] sm:$0xf]  ;;  %v2549_v16 = vld [vmem:[#allocation13 + $0x128] sm:$0xff] }
  0xd5   :  { %v317_v27 = vpop.f32.mrf.mxu1  ;;  %v453_v28 = vmul.f32 0.01, %v449_v26  ;;  %v454_v29 = vsel %vm450_vm2, %v448_v23, %v452_v25  ;;  %vm451_vm3 = vcmp.ge.f32.partialorder %v449_v26, 0.0  ;;  %v2231_v23 = vld [vmem:[#allocation10 + $0xf0] sm:$0xf] }
  0xd6   :  { %v427_v30 = vpop.f32.mrf.mxu2  ;;  %v472_v31 = vpack.c.bf16 %v454_v29, %v454_v29  ;;  %v2542_v25 = vld [vmem:[#allocation10 + $0xf4] sm:$0xf]  ;;  %v2232_v27 = vor.u32 %v2543_v24, %v2231_v23  ;;  %1073 = vmatpush.bf16.msra.mxu2 %v2160_v18  ;;  %v2207_v18 = vld [vmem:[#allocation10 + $0xc0] sm:$0xf] }
  0xd7   :  { %v455_v33 = vsel %vm451_vm3, %v449_v26, %v453_v28  ;;  %v2164_v26 = vor.u32 %v2524_v21, %v2161_v22  ;;  %v2233_v28 = vld [vmem:[#allocation10 + $0xf8] sm:$0xf0]  ;;  %v2522_v30 = vld [vmem:[#allocation11 + $0xd4] sm:$0xf]  ;;  %v2209_v22 = vld [vmem:[#allocation10 + $0xc8] sm:$0xf0] }
  0xd8   :  { %533 = vmatmul.bf16.vlgmr.msrb.gmra.mxu0 %v472_v31  ;;  %v558_v34 = vpack.c.bf16 %v455_v33, %v455_v33  ;;  %v440_v35 = vpop.f32.mrf.mxu3  ;;  %v2236_v29 = vor.u32 %v2542_v25, %v2233_v28  ;;  %v2153_v31 = vld [vmem:[#allocation11 + $0xd8] sm:$0xf0]  ;;  %v2223_v33 = vld [vmem:[#allocation10 + $0xe0] sm:$0xf]  ;;  %v2212_v23 = vor.u32 %v2536_v20, %v2209_v22  ;;  %v2513_v25 = vld [vmem:[#allocation11 + $0x84] sm:$0xf0] }
  0xd9   :  { %1196 = vmatpush.bf16.msrb.mxu0 %v2232_v27  ;;  %v2541_v35 = vld [vmem:[#allocation10 + $0xe4] sm:$0xf0]  ;;  %1086 = vmatpush.bf16.msra.mxu3 %v2164_v26  ;;  %v2156_v42 = vor.u32 %v2522_v30, %v2153_v31  ;;  %v2111_v24 = vld [vmem:[#allocation11 + $0x80] sm:$0xf]  ;;  %v2516_v26 = vld [vmem:[#allocation11 + $0xa4] sm:$0xf] }
  0xda   :  { %620 = vmatmul.bf16.vlgmr.msrb.gmra.mxu1 %v558_v34  ;;  %v2152_v34 = vor.u32 %v2523_v19, %v2151_v15  ;;  %v2224_v40 = vor.u32 %v2541_v35, %v2223_v33  ;;  %v2120_v15 = vor.u32 %v2515_v13, %v2119_v12  ;;  %v2537_v19 = vld [vmem:[#allocation10 + $0xc4] sm:$0xf0]  ;;  %v2112_v27 = vor.u32 %v2513_v25, %v2111_v24  ;;  %v2129_v28 = vld [vmem:[#allocation11 + $0xa8] sm:$0xf0]  ;;  %v2199_v30 = vld [vmem:[#allocation10 + $0xb0] sm:$0xf] }
  0xdb   :  { %1209 = vmatpush.bf16.msrb.mxu1 %v2236_v29  ;;  %v2208_v21 = vor.u32 %v2537_v19, %v2207_v18  ;;  %v2132_v29 = vor.u32 %v2516_v26, %v2129_v28  ;;  %v2535_v31 = vld [vmem:[#allocation10 + $0xb4] sm:$0xf0]  ;;  %v2534_v33 = vld [vmem:[#allocation10 + $0xb4] sm:$0xf]  ;;  %v2201_v35 = vld [vmem:[#allocation10 + $0xb8] sm:$0xf0] }
  0xdc   :  { %1074 = vmatpush.bf16.msra.mxu2 %v2152_v34  ;;  %v2200_v34 = vor.u32 %v2535_v31, %v2199_v30  ;;  %v2204_v36 = vor.u32 %v2534_v33, %v2201_v35  ;;  %v2551_v12 = vld [vmem:[#allocation13 + $0x138] sm:$0xff]  ;;  %v2548_v18 = vld [vmem:[#allocation13 + $0x120] sm:$0xff]  ;;  %v2554_v24 = vld [vmem:[#allocation13 + $0x190] sm:$0xff] }
  0xdd   :  { %1197 = vmatpush.bf16.msrb.mxu0 %v2224_v40  ;;  %1087 = vmatpush.bf16.msra.mxu3 %v2156_v42  ;;  %v2191_v40 = vld [vmem:[#allocation10 + $0xa0] sm:$0xf]  ;;  %v195_v42 = vmul.f32 %v2994_v45, %v2991_v32  ;;  %v2529_v45 = vld [vmem:[#allocation10 + $0x84] sm:$0xf0]  ;;  %v2559_v13 = vld [vmem:[#allocation13 + $0x1b8] sm:$0xff] }
  0xde   :  { %v2175_v32 = vld [vmem:[#allocation10 + $0x80] sm:$0xf]  ;;  %v2547_v20 = vld [vmem:[#allocation13 + $0x118] sm:$0xff]  ;;  %v2553_v28 = vld [vmem:[#allocation13 + $0x188] sm:$0xff] }
  0xdf   :  { %1210 = vmatpush.bf16.msrb.mxu1 %v2228_v41  ;;  %v2533_v41 = vld [vmem:[#allocation10 + $0xa4] sm:$0xf0]  ;;  %v2556_v19 = vld [vmem:[#allocation13 + $0x1a0] sm:$0xff]  ;;  %v2567_v33 = vld [vmem:[#allocation13 + $0x178] sm:$0xff] }
  0xe0   :  { %1075 = vmatpush.bf16.msra.mxu2 %v2144_v43  ;;  %v2192_v43 = vor.u32 %v2533_v41, %v2191_v40  ;;  %v2552_v30 = vld [vmem:[#allocation13 + $0x180] sm:$0xff]  ;;  %v2566_v35 = vld [vmem:[#allocation13 + $0x170] sm:$0xff]  ;;  %v2563_v41 = vld [vmem:[#allocation13 + $0x158] sm:$0xff] }
  0xe1   :  { %1198 = vmatpush.bf16.msrb.mxu0 %v2216_v9  ;;  %v2572_v40 = vld [vmem:[#allocation13 + $0x1e0] sm:$0xff] }
  0xe3   :  { %1211 = vmatpush.bf16.msrb.mxu1 %v2220_v11 }
  0xe4   :  { %1076 = vmatpush.bf16.msra.mxu2 %v2136_v49  ;;  %v2196_v49 = vor.u32 %v2532_v44, %v2193_v46  ;;  %v2562_v44 = vld [vmem:[#allocation13 + $0x150] sm:$0xff] }
  0xe5   :  { %1199 = vmatpush.bf16.msrb.mxu0 %v2208_v21  ;;  %v2555_v21 = vld [vmem:[#allocation13 + $0x198] sm:$0xff]  ;;  %v2570_v46 = vld [vmem:[#allocation13 + $0x1d0] sm:$0xff] }
  0xe7   :  { %1212 = vmatpush.bf16.msrb.mxu1 %v2212_v23  ;;  %v2546_v23 = vld [vmem:[#allocation13 + $0x110] sm:$0xff] }
  0xe9   :  { %1200 = vmatpush.bf16.msrb.mxu0 %v2200_v34  ;;  %v2575_v34 = vld [vmem:[#allocation13 + $0x1f8] sm:$0xff] }
  0xeb   :  { %1213 = vmatpush.bf16.msrb.mxu1 %v2204_v36  ;;  %v2574_v36 = vld [vmem:[#allocation13 + $0x1f0] sm:$0xff] }
  0xed   :  { %1201 = vmatpush.bf16.msrb.mxu0 %v2192_v43  ;;  %v2237_v43 = vld [vmem:[%s3041_s6 + $0x2] sm:$0x3] }
  0xef   :  { %1214 = vmatpush.bf16.msrb.mxu1 %v2196_v49  ;;  %v1225_v49 = vperm.slane %v2237_v43, 0 }
 0x155   :  { %v534_v57 = vpop.f32.mrf.mxu0 }
 0x156   :  { %v535_v58 = vadd.f32 %v2609_v55, %v534_v57 }
 0x157   :  { %v621_v59 = vpop.f32.mrf.mxu1 }
 0x158   :  { %vm538_vm4 = vcmp.ge.f32.partialorder %v535_v58, 0.0  ;;  %v539_v60 = vmul.f32 0.01, %v535_v58  ;;  %v622_v61 = vadd.f32 %v2610_v56, %v621_v59 }
 0x15a   :  { %vm625_vm5 = vcmp.ge.f32.partialorder %v622_v61, 0.0  ;;  %v626_v62 = vmul.f32 0.01, %v622_v61  ;;  %v540_v63 = vsel %vm538_vm4, %v535_v58, %v539_v60 }
 0x15b   :  { %v645_v0 = vpack.c.bf16 %v540_v63, %v540_v63 }
 0x15c   :  { %v627_v1 = vsel %vm625_vm5, %v622_v61, %v626_v62 }
 0x15d   :  { %v536_v2 = vpop.f32.mrf.mxu0  ;;  %707 = vmatmul.bf16.vlgmr.msrb.gmra.mxu2 %v645_v0  ;;  %v732_v3 = vpack.c.bf16 %v627_v1, %v627_v1  ;;  %v2127_v0 = vld [vmem:[#allocation11 + $0xa0] sm:$0xf]  ;;  %v2517_v1 = vld [vmem:[#allocation11 + $0xa4] sm:$0xf0] }
 0x15e   :  { %v2520_v2 = vld [vmem:[#allocation11 + $0xc4] sm:$0xf] }
 0x15f   :  { %794 = vmatmul.bf16.vlgmr.msrb.gmra.mxu3 %v732_v3  ;;  %v623_v4 = vpop.f32.mrf.mxu1  ;;  %v2128_v3 = vor.u32 %v2517_v1, %v2127_v0 }
 0x160   :  { %v2145_v4 = vld [vmem:[#allocation11 + $0xc8] sm:$0xf0] }
 0x161   :  { %v2148_v5 = vor.u32 %v2520_v2, %v2145_v4  ;;  %1077 = vmatpush.bf16.msra.mxu2 %v2128_v3 }
 0x163   :  { %1088 = vmatpush.bf16.msra.mxu3 %v2148_v5 }
 0x165   :  { %1078 = vmatpush.bf16.msra.mxu2 %v2120_v15  ;;  %v2558_v15 = vld [vmem:[#allocation13 + $0x1b0] sm:$0xff] }
 0x167   :  { %1089 = vmatpush.bf16.msra.mxu3 %v2140_v17  ;;  %v2557_v17 = vld [vmem:[#allocation13 + $0x1a8] sm:$0xff] }
 0x169   :  { %1079 = vmatpush.bf16.msra.mxu2 %v2112_v27  ;;  %v2545_v27 = vld [vmem:[#allocation13 + $0x108] sm:$0xff] }
 0x16b   :  { %1090 = vmatpush.bf16.msra.mxu3 %v2132_v29  ;;  %v2544_v29 = vld [vmem:[#allocation13 + $0x100] sm:$0xff] }
 0x16d   :  { %1080 = vmatmul.bf16.vlgmr.msra.gmra.mxu2 %v2998_v48 }
 0x16e   :  { %1308 = vmatpush.bf16.msrb.mxu2 %v2551_v12  ;;  %v2587_v12 = vld [vmem:[#allocation16 + $0xd8] sm:$0xff] }
 0x16f   :  { %1091 = vmatpush.bf16.msra.mxu3 %v2124_v39  ;;  %v2564_v39 = vld [vmem:[#allocation13 + $0x160] sm:$0xff] }
 0x172   :  { %1309 = vmatpush.bf16.msrb.mxu2 %v2550_v14  ;;  %v2586_v14 = vld [vmem:[#allocation16 + $0xd0] sm:$0xff] }
 0x176   :  { %1310 = vmatpush.bf16.msrb.mxu2 %v2549_v16  ;;  %v2616_v16 = vld [vmem:[#allocation14 + $0x6] ss:$0 sm:$0xff] }
 0x17a   :  { %1311 = vmatpush.bf16.msrb.mxu2 %v2548_v18 }
 0x17e   :  { %1312 = vmatpush.bf16.msrb.mxu2 %v2547_v20 }
 0x182   :  { %1313 = vmatpush.bf16.msrb.mxu2 %v2546_v23 }
 0x186   :  { %1314 = vmatpush.bf16.msrb.mxu2 %v2545_v27 }
 0x18a   :  { %1315 = vmatpush.bf16.msrb.mxu2 %v2544_v29  ;;  %v2577_v29 = vld [vmem:[#allocation16 + $0x88] sm:$0xff] }
 0x1e0   :  { %v708_v52 = vpop.f32.mrf.mxu2 }
 0x1e1   :  { %v709_v53 = vadd.f32 %v2611_v50, %v708_v52  ;;  %v2512_v50 = vld [vmem:[#allocation11 + $0x84] sm:$0xf] }
 0x1e2   :  { %v795_v54 = vpop.f32.mrf.mxu3 }
 0x1e3   :  { %vm712_vm6 = vcmp.ge.f32.partialorder %v709_v53, 0.0  ;;  %v713_v55 = vmul.f32 0.01, %v709_v53  ;;  %v796_v56 = vadd.f32 %v2612_v51, %v795_v54  ;;  %v2113_v51 = vld [vmem:[#allocation11 + $0x88] sm:$0xf0] }
 0x1e4   :  { %v2116_v52 = vor.u32 %v2512_v50, %v2113_v51  ;;  %v2531_v54 = vld [vmem:[#allocation10 + $0x94] sm:$0xf0]  ;;  %v1226_v50 = vperm.slane %v2237_v43, 1 }
 0x1e5   :  { %v714_v57 = vsel %vm712_vm6, %v709_v53, %v713_v55  ;;  %vm799_vm7 = vcmp.ge.f32.partialorder %v796_v56, 0.0  ;;  %v800_v58 = vmul.f32 0.01, %v796_v56  ;;  %v2183_v53 = vld [vmem:[#allocation10 + $0x90] sm:$0xf] }
 0x1e6   :  { %v818_v59 = vpack.c.bf16 %v714_v57, %v714_v57  ;;  %v2530_v55 = vld [vmem:[#allocation10 + $0x94] sm:$0xf]  ;;  %v2185_v57 = vld [vmem:[#allocation10 + $0x98] sm:$0xf0]  ;;  %1092 = vmatpush.bf16.msra.mxu3 %v2116_v52 }
 0x1e7   :  { %v801_v60 = vsel %vm799_vm7, %v796_v56, %v800_v58  ;;  %v2184_v56 = vor.u32 %v2531_v54, %v2183_v53  ;;  %v2188_v58 = vor.u32 %v2530_v55, %v2185_v57 }
 0x1e8   :  { %v902_v61 = vpack.c.bf16 %v801_v60, %v801_v60  ;;  %v710_v62 = vpop.f32.mrf.mxu2  ;;  %879 = vmatmul.bf16.vlgmr.msra.gmra.mxu0 %v818_v59  ;;  %v2528_v59 = vld [vmem:[#allocation10 + $0x84] sm:$0xf]  ;;  %v2176_v60 = vor.u32 %v2529_v45, %v2175_v32 }
 0x1e9   :  { %1202 = vmatpush.bf16.msrb.mxu0 %v2184_v56  ;;  %1215 = vmatpush.bf16.msrb.mxu1 %v2188_v58 }
 0x1ea   :  { %964 = vmatmul.bf16.vlgmr.msra.gmra.mxu1 %v902_v61  ;;  %v797_v63 = vpop.f32.mrf.mxu3  ;;  %1093 = vmatmul.bf16.vlgmr.msra.gmra.mxu3 %v2998_v48  ;;  %v2177_v61 = vld [vmem:[#allocation10 + $0x88] sm:$0xf0]  ;;  %v2614_v48 = vld [vmem:[%s3045_s10 + $0x1] ss:$0 sm:$0xff] }
 0x1eb   :  { %v2180_v62 = vor.u32 %v2528_v59, %v2177_v61  ;;  %v2613_v63 = vld [vmem:[%s3045_s10] ss:$0 sm:$0xff]  ;;  %1395 = vmatpush.bf16.msrb.mxu3 %v2559_v13  ;;  %v2578_v13 = vld [vmem:[#allocation16 + $0x90] sm:$0xff] }
 0x1ed   :  { %1203 = vmatpush.bf16.msrb.mxu0 %v2176_v60  ;;  %1216 = vmatpush.bf16.msrb.mxu1 %v2180_v62 }
 0x1ef   :  { %1396 = vmatpush.bf16.msrb.mxu3 %v2558_v15  ;;  %v2615_v15 = vld [vmem:[#allocation14 + $0x4] ss:$0 sm:$0xff] }
 0x1f0   :  { %v1081_v22 = vpop.f32.mrf.mxu2 }
 0x1f1   :  { %1482 = vmatpush.bf16.msra.mxu0 %v2567_v33  ;;  %1569 = vmatpush.bf16.msra.mxu1 %v2575_v34  ;;  %v2584_v33 = vld [vmem:[#allocation16 + $0xc0] sm:$0xff]  ;;  %v2617_v34 = vld [vmem:[#allocation14 + $0x5] ss:$0 sm:$0xff] }
 0x1f3   :  { %1397 = vmatpush.bf16.msrb.mxu3 %v2557_v17 }
 0x1f5   :  { %1483 = vmatpush.bf16.msra.mxu0 %v2566_v35  ;;  %1570 = vmatpush.bf16.msra.mxu1 %v2574_v36  ;;  %v2618_v35 = vld [vmem:[#allocation14 + $0x7] ss:$0 sm:$0xff] }
 0x1f7   :  { %1398 = vmatpush.bf16.msrb.mxu3 %v2556_v19 }
 0x1f8   :  { %v1083_v25 = vpop.f32.mrf.mxu2 }
 0x1f9   :  { %1484 = vmatpush.bf16.msra.mxu0 %v2565_v37  ;;  %1571 = vmatpush.bf16.msra.mxu1 %v2573_v38 }
 0x1fb   :  { %1399 = vmatpush.bf16.msrb.mxu3 %v2555_v21 }
 0x1fd   :  { %1485 = vmatpush.bf16.msra.mxu0 %v2564_v39  ;;  %1572 = vmatpush.bf16.msra.mxu1 %v2572_v40 }
 0x1ff   :  { %1400 = vmatpush.bf16.msrb.mxu3 %v2554_v24 }
 0x201   :  { %1486 = vmatpush.bf16.msra.mxu0 %v2563_v41 }
 0x203   :  { %1401 = vmatpush.bf16.msrb.mxu3 %v2553_v28 }
 0x205   :  { %1487 = vmatpush.bf16.msra.mxu0 %v2562_v44 }
 0x207   :  { %1402 = vmatpush.bf16.msrb.mxu3 %v2552_v30  ;;  %v2585_v30 = vld [vmem:[#allocation16 + $0xc8] sm:$0xff] }
 0x265   :  { %v880_v0 = vpop.f32.mrf.mxu0 }
 0x266   :  { %v881_v1 = vadd.f32 %v2613_v63, %v880_v0  ;;  %v2561_v63 = vld [vmem:[#allocation13 + $0x148] sm:$0xff] }
 0x267   :  { %v965_v2 = vpop.f32.mrf.mxu1  ;;  %v2569_v0 = vld [vmem:[#allocation13 + $0x1c8] sm:$0xff]  ;;  %1488 = vmatpush.bf16.msra.mxu0 %v2561_v63  ;;  %v1761_v63 = vlaneseq }
 0x268   :  { %2621 = vtanh.f32 %v881_v1  ;;  %v966_v8 = vadd.f32 %v2614_v48, %v965_v2  ;;  %v2560_v1 = vld [vmem:[#allocation13 + $0x140] sm:$0xff]  ;;  %v2581_v48 = vld [vmem:[#allocation16 + $0xa8] sm:$0xff] }
 0x269   :  { %v2568_v2 = vld [vmem:[#allocation13 + $0x1c0] sm:$0xff] }
 0x26b   :  { %1489 = vmatpush.bf16.msra.mxu0 %v2560_v1 }
 0x26d   :  { %v882_v3 = vpop.f32.mrf.mxu0  ;;  %v1094_v26 = vpop.f32.mrf.mxu3 }
 0x26e   :  { %v2622_v4 = vpop.eup %2621  ;;  %v2583_v3 = vld [vmem:[#allocation16 + $0xb8] sm:$0xff] }
 0x26f   :  { %v969_v5 = vmul.f32 1.442695, %v2622_v4  ;;  %973 = vadd.xlane.f32.xlu0 %v2622_v4  ;;  %v967_v6 = vpop.f32.mrf.mxu1  ;;  %v2591_v4 = vld [vmem:[#allocation16 + $0xf8] sm:$0xff]  ;;  %1656 = vmatpush.bf16.msra.mxu2 %v2583_v3 }
 0x270   :  { %1741 = vmatpush.bf16.msra.mxu3 %v2591_v4  ;;  %v2590_v6 = vld [vmem:[#allocation16 + $0xf0] sm:$0xff] }
 0x271   :  { %2623 = vpow2.f32 %v969_v5  ;;  %v2582_v5 = vld [vmem:[#allocation16 + $0xb0] sm:$0xff] }
 0x273   :  { %1657 = vmatpush.bf16.msra.mxu2 %v2582_v5 }
 0x274   :  { %1742 = vmatpush.bf16.msra.mxu3 %v2590_v6 }
 0x275   :  { %v1096_v31 = vpop.f32.mrf.mxu3 }
 0x276   :  { %v2576_v31 = vld [vmem:[#allocation16 + $0x80] sm:$0xff] }
 0x277   :  { %v2624_v7 = vpop.eup %2623  ;;  %1658 = vmatpush.bf16.msra.mxu2 %v2581_v48 }
 0x278   :  { %v971_v9 = vmul.f32 %v2624_v7, %v195_v42  ;;  %v2571_v42 = vld [vmem:[#allocation13 + $0x1d8] sm:$0xff]  ;;  %v2589_v7 = vld [vmem:[#allocation16 + $0xe8] sm:$0xff] }
 0x279   :  { %1573 = vmatpush.bf16.msra.mxu1 %v2571_v42  ;;  %1743 = vmatpush.bf16.msra.mxu3 %v2589_v7 }
 0x27a   :  { %v3017_v10 = vadd.f32 %v971_v9, %v966_v8  ;;  %v2580_v8 = vld [vmem:[#allocation16 + $0xa0] sm:$0xff] }
 0x27b   :  { %v2588_v9 = vld [vmem:[#allocation16 + $0xe0] sm:$0xff]  ;;  %1659 = vmatpush.bf16.msra.mxu2 %v2580_v8 }
 0x27c   :  { %v1115_v11 = vpack.c.bf16 %v3017_v10, %v3017_v10 }
 0x27d   :  { %1574 = vmatpush.bf16.msra.mxu1 %v2570_v46  ;;  %1744 = vmatpush.bf16.msra.mxu3 %v2588_v9 }
 0x27e   :  { %1204 = vmatmul.bf16.vlgmr.msrb.gmra.mxu0 %v1115_v11  ;;  %1217 = vmatmul.bf16.vlgmr.msrb.gmra.mxu1 %v1115_v11  ;;  %v2579_v11 = vld [vmem:[#allocation16 + $0x98] sm:$0xff] }
 0x27f   :  { %1660 = vmatpush.bf16.msra.mxu2 %v2579_v11 }
 0x281   :  { %1575 = vmatpush.bf16.msra.mxu1 %v2569_v0  ;;  %1745 = vmatpush.bf16.msra.mxu3 %v2587_v12  ;;  %v1762_v0 = vand.u32 127, %v1761_v63 }
 0x283   :  { %1661 = vmatpush.bf16.msra.mxu2 %v2578_v13  ;;  %vm1763_vm14 = vcmp.eq.s32.totalorder %v1762_v0, 4 }
 0x285   :  { %1576 = vmatpush.bf16.msra.mxu1 %v2568_v2  ;;  %1746 = vmatpush.bf16.msra.mxu3 %v2586_v14 }
 0x287   :  { %1662 = vmatpush.bf16.msra.mxu2 %v2577_v29 }
 0x289   :  { %1747 = vmatpush.bf16.msra.mxu3 %v2585_v30 }
 0x28b   :  { %1663 = vmatpush.bf16.msra.mxu2 %v2576_v31 }
 0x28d   :  { %1748 = vmatpush.bf16.msra.mxu3 %v2584_v33 }
 0x2fb   :  { %v1205_v51 = vpop.f32.mrf.mxu0  ;;  %v1218_v52 = vpop.f32.mrf.mxu1 }
 0x2fc   :  { %v1206_v53 = vadd.f32 %v1205_v51, %v1081_v22  ;;  %v1219_v54 = vadd.f32 %v1218_v52, %v1094_v26  ;;  %v2619_v51 = vld [vmem:[%s3045_s10 + $0x2] ss:$0 sm:$0xff] }
 0x2fe   :  { %v1229_v55 = vadd.f32 %v1225_v49, %v1206_v53  ;;  %v1230_v56 = vadd.f32 %v1226_v50, %v1219_v54 }
 0x300   :  { %vm1231_vm8 = vcmp.ge.f32.partialorder %v1229_v55, 0.0  ;;  %v1233_v57 = vmul.f32 0.01, %v1229_v55  ;;  %vm1232_vm9 = vcmp.ge.f32.partialorder %v1230_v56, 0.0  ;;  %v1234_v58 = vmul.f32 0.01, %v1230_v56 }
 0x302   :  { %v1235_v32 = vsel %vm1231_vm8, %v1229_v55, %v1233_v57  ;;  %v1236_v45 = vsel %vm1232_vm9, %v1230_v56, %v1234_v58 }
 0x303   :  { %v1254_v59 = vpack.c.bf16 %v1235_v32, %v1235_v32  ;;  %v1341_v60 = vpack.c.bf16 %v1236_v45, %v1236_v45  ;;  %v1207_v61 = vpop.f32.mrf.mxu0  ;;  %v1220_v62 = vpop.f32.mrf.mxu1  ;;  %v2620_v32 = vld [vmem:[%s3045_s10 + $0x3] ss:$0 sm:$0xff] }
 0x304   :  { %v974_v62 = vpop.xlane.xlu0 %973 }
 0x305   :  { %1316 = vmatmul.bf16.vlgmr.msrb.gmra.mxu2 %v1254_v59  ;;  %1403 = vmatmul.bf16.vlgmr.msrb.gmra.mxu3 %v1341_v60 }
 0x388   :  { %v1317_v17 = vpop.f32.mrf.mxu2  ;;  %v1404_v18 = vpop.f32.mrf.mxu3 }
 0x389   :  { %v1318_v19 = vadd.f32 %v2615_v15, %v1317_v17  ;;  %v1405_v20 = vadd.f32 %v2616_v16, %v1404_v18 }
 0x38b   :  { %vm1321_vm10 = vcmp.ge.f32.partialorder %v1318_v19, 0.0  ;;  %v1322_v21 = vmul.f32 0.01, %v1318_v19  ;;  %vm1408_vm11 = vcmp.ge.f32.partialorder %v1405_v20, 0.0  ;;  %v1409_v22 = vmul.f32 0.01, %v1405_v20 }
 0x38d   :  { %v1323_v23 = vsel %vm1321_vm10, %v1318_v19, %v1322_v21  ;;  %v1410_v24 = vsel %vm1408_vm11, %v1405_v20, %v1409_v22 }
 0x38e   :  { %v1428_v25 = vpack.c.bf16 %v1323_v23, %v1323_v23  ;;  %v1515_v26 = vpack.c.bf16 %v1410_v24, %v1410_v24 }
 0x390   :  { %v1319_v27 = vpop.f32.mrf.mxu2  ;;  %v1406_v28 = vpop.f32.mrf.mxu3  ;;  %1490 = vmatmul.bf16.vlgmr.msra.gmra.mxu0 %v1428_v25  ;;  %1577 = vmatmul.bf16.vlgmr.msra.gmra.mxu1 %v1515_v26 }
 0x40d   :  { %v1491_v36 = vpop.f32.mrf.mxu0  ;;  %v1578_v37 = vpop.f32.mrf.mxu1 }
 0x40e   :  { %v1492_v38 = vadd.f32 %v2617_v34, %v1491_v36  ;;  %v1579_v39 = vadd.f32 %v2618_v35, %v1578_v37 }
 0x410   :  { %vm1495_vm12 = vcmp.ge.f32.partialorder %v1492_v38, 0.0  ;;  %v1496_v40 = vmul.f32 0.01, %v1492_v38  ;;  %vm1582_vm13 = vcmp.ge.f32.partialorder %v1579_v39, 0.0  ;;  %v1583_v41 = vmul.f32 0.01, %v1579_v39 }
 0x412   :  { %v1497_v42 = vsel %vm1495_vm12, %v1492_v38, %v1496_v40  ;;  %v1584_v43 = vsel %vm1582_vm13, %v1579_v39, %v1583_v41 }
 0x413   :  { %v1602_v44 = vpack.c.bf16 %v1497_v42, %v1497_v42  ;;  %v1687_v46 = vpack.c.bf16 %v1584_v43, %v1584_v43 }
 0x415   :  { %v1493_v49 = vpop.f32.mrf.mxu0  ;;  %v1580_v50 = vpop.f32.mrf.mxu1  ;;  %1664 = vmatmul.bf16.vlgmr.msra.gmra.mxu2 %v1602_v44  ;;  %1749 = vmatmul.bf16.vlgmr.msra.gmra.mxu3 %v1687_v46 }
 0x498   :  { %v1665_v52 = vpop.f32.mrf.mxu2  ;;  %v1750_v53 = vpop.f32.mrf.mxu3 }
 0x499   :  { %v1666_v54 = vadd.f32 %v2619_v51, %v1665_v52  ;;  %v1751_v59 = vadd.f32 %v2620_v32, %v1750_v53 }
 0x49b   :  { %2625 = vtanh.f32 %v1666_v54 }
 0x4a0   :  { %v1667_v55 = vpop.f32.mrf.mxu2  ;;  %v1752_v56 = vpop.f32.mrf.mxu3 }
 0x4a1   :  { %v2626_v57 = vpop.eup %2625 }
 0x4a2   :  { %v1754_v58 = vmul.f32 1.442695, %v2626_v57  ;;  %1758 = vadd.xlane.f32.xlu0 %v2626_v57 }
 0x4a4   :  { %2627 = vpow2.f32 %v1754_v58 }
 0x4aa   :  { %v2628_v45 = vpop.eup %2627 }
 0x4ab   :  { %v1756_v60 = vmul.f32 %v2628_v45, %v2996_v47 }
 0x4ad   :  { %v1757_v61 = vadd.f32 %v1756_v60, %v1751_v59 }
 0x4af   :  { %1766 = vst [vmem:[#allocation17 + $0x8] sm:$0xff] %v1757_v61 }
 0x515   :  { %v1759_v1 = vpop.xlane.xlu0 %1758 }
 0x516   :  { %v1760_v2 = vadd.f32 %v1759_v1, %v974_v62 }
 0x518   :  { %v1764_v3 = vsel %vm1763_vm14, %v1760_v2, %v3017_v10 }
 0x519   :  { %1765 = vst [vmem:[#allocation17] sm:$0xff] %v1764_v3 }
 0x51a   :  { %1777 = dma.vmem_to_hbm [thread:$0]  %s1773_s29, 256, %s1775_s30, [#allocation4]  }
 0x51b   :  { %2879 = dma.done.wait [#allocation4], 256  }
 0x51c   :  { %2880 = vsyncadd [#allocation4], 4294967040 }
 0x51d   :  { %1782 = vsyncpa [#allocation3], 1 }
 0x51e   :  { %1783 = vsyncpa [#allocation6], 1 }
 0x51f   :  { %1784 = vsyncpa [#allocation9], 1 }
 0x520   :  { %1785 = vsyncpa [#allocation12], 1 }
 0x521   :  { %1786 = vsyncpa [#allocation15], 1 }
 0x522   :  { %1787 = vsyncpa [#allocation4], 1 }

// kernel: tpu_custom_call.1
= control target key start
LH: loop header
LB: loop body
LE: loop exit
PB: predicated region body
PF: predicated region fallthrough
CT: control target
= control target key end

     0   :  { %16 = vsyncpa [#allocation3], 0  ;;  %s3035_s0 = inlined_call_operand.hbm [shape: f32[8,256], index: 0, kind: input, shape index: {}]   ;;  %s3036_s1 = inlined_call_operand.hbm [shape: f32[8,128], index: 1, kind: input, shape index: {}]   ;;  %s3037_s2 = inlined_call_operand.hbm [shape: f32[1,256], index: 2, kind: input, shape index: {}]   ;;  %s3038_s3 = inlined_call_operand.hbm [shape: f32[1,256], index: 3, kind: input, shape index: {}]   ;;  %s3039_s4 = inlined_call_operand.hbm [shape: bf16[2,128,256], index: 4, kind: input, shape index: {}]   ;;  %s3040_s5 = inlined_call_operand.hbm [shape: bf16[2,128,256], index: 5, kind: input, shape index: {}]   ;;  %s3041_s6 = inlined_call_operand.vmem [shape: f32[2,1,256], index: 6, kind: input, shape index: {}]   ;;  %s3042_s7 = inlined_call_operand.hbm [shape: bf16[8,128,128], index: 7, kind: input, shape index: {}]   ;;  %s3043_s8 = inlined_call_operand.hbm [shape: f32[8,1,128], index: 8, kind: input, shape index: {}]   ;;  %s3044_s9 = inlined_call_operand.hbm [shape: bf16[4,128,128], index: 9, kind: input, shape index: {}]   ;;  %s3045_s10 = inlined_call_operand.vmem [shape: f32[4,1,128], index: 10, kind: input, shape index: {}]   ;;  %s3046_s11 = inlined_call_operand.hbm [shape: f32[8,256], index: 11, kind: output, shape index: {}]  }
   0x1   :  { %17 = vsyncpa [#allocation6], 0 }
   0x2   :  { %18 = vsyncpa [#allocation9], 0 }
   0x3   :  { %19 = vsyncpa [#allocation12], 0 }
   0x4   :  { %20 = vsyncpa [#allocation15], 0  ;;  %s38_s19 = sshll.u32 %s3036_s1, 4  ;;  %s39_s19 = int_to_ptr.hbm [resolvable:$true] %s38_s19 }
   0x5   :  { %21 = vsyncpa [#allocation4], 0  ;;  %s2881_s20 = smov [#allocation5]   ;;  %s60_s24 = sshll.u32 %s3038_s3, 4  ;;  %s61_s24 = int_to_ptr.hbm [resolvable:$true] %s60_s24 }
   0x6   :  { %s40_s21 = sshll.u32 %s2881_s20, 4  ;;  %s2882_s25 = smov [#allocation8]   ;;  %s41_s21 = int_to_ptr.vmem [resolvable:$true] %s40_s21 }
   0x7   :  { %43 = dma.hbm_to_vmem [thread:$0]  %s39_s19, 128, %s41_s21, [#allocation6]  }
   0x8   :  { %s62_s26 = sshll.u32 %s2882_s25, 4  ;;  %s83_s29 = sshll.u32 %s3040_s5, 4  ;;  %s63_s26 = int_to_ptr.vmem [resolvable:$true] %s62_s26  ;;  %s84_s29 = int_to_ptr.hbm [resolvable:$true] %s83_s29 }
   0x9   :  { %65 = dma.hbm_to_vmem [thread:$0]  %s61_s24, 32, %s63_s26, [#allocation9]  }
   0xa   :  { %s2883_s1 = smov [#allocation11]   ;;  %s111_s14 = sshll.u32 %s3043_s8, 4  ;;  %s112_s14 = int_to_ptr.hbm [resolvable:$true] %s111_s14 }
   0xb   :  { %s85_s30 = sshll.u32 %s2883_s1, 4  ;;  %s2884_s15 = smov 128   ;;  %s86_s30 = int_to_ptr.vmem [resolvable:$true] %s85_s30 }
   0xc   :  { %s2885_s3 = smov 8   ;;  %s2886_s16 = smov [#allocation14]  }
   0xd   :  { %91 = dma.hbm_to_vmem [thread:$0]  %s84_s29, 4096, %s86_s30, [#allocation12], %s2884_s15, %s2884_s15, %s2885_s3  }
   0xe   :  { %s113_s17 = sshll.u32 %s2886_s16, 4  ;;  %s2887_s18 = smov 16   ;;  %s114_s17 = int_to_ptr.vmem [resolvable:$true] %s113_s17 }
   0xf   :  { %s2888_s5 = smov 1   ;;  %s27_s21 = sshll.u32 %s3035_s0, 4  ;;  %s28_s21 = int_to_ptr.hbm [resolvable:$true] %s27_s21 }
  0x10   :  { %119 = dma.hbm_to_vmem [thread:$0]  %s112_s14, 128, %s114_s17, [#allocation15], %s2887_s18, %s2887_s18, %s2888_s5  }
  0x11   :  { %s2889_s22 = smov [#allocation2]   ;;  %s49_s25 = sshll.u32 %s3037_s2, 4  ;;  %s50_s25 = int_to_ptr.hbm [resolvable:$true] %s49_s25 }
  0x12   :  { %s29_s8 = sshll.u32 %s2889_s22, 4  ;;  %s2890_s26 = smov [#allocation7]   ;;  %s30_s8 = int_to_ptr.vmem [resolvable:$true] %s29_s8 }
  0x13   :  { %32 = dma.hbm_to_vmem [thread:$0]  %s28_s21, 256, %s30_s8, [#allocation3]  }
  0x14   :  { %s51_s27 = sshll.u32 %s2890_s26, 4  ;;  %s70_s1 = sshll.u32 %s3039_s4, 4  ;;  %s52_s27 = int_to_ptr.vmem [resolvable:$true] %s51_s27  ;;  %s71_s1 = int_to_ptr.hbm [resolvable:$true] %s70_s1 }
  0x15   :  { %54 = dma.hbm_to_vmem [thread:$0]  %s50_s25, 32, %s52_s27, [#allocation6]  }
  0x16   :  { %s98_s12 = sshll.u32 %s3042_s7, 4  ;;  %s2891_s13 = smov [#allocation10]   ;;  %s99_s12 = int_to_ptr.hbm [resolvable:$true] %s98_s12 }
  0x17   :  { %s72_s14 = sshll.u32 %s2891_s13, 4  ;;  %s2892_s2 = smov [#allocation13]   ;;  %s73_s14 = int_to_ptr.vmem [resolvable:$true] %s72_s14 }
  0x18   :  { %78 = dma.hbm_to_vmem [thread:$0]  %s71_s1, 4096, %s73_s14, [#allocation9], %s2884_s15, %s2884_s15, %s2885_s3  }
  0x19   :  { %s100_s16 = sshll.u32 %s2892_s2, 4  ;;  %s2893_s17 = smov 64   ;;  %s101_s16 = int_to_ptr.vmem [resolvable:$true] %s100_s16 }
  0x1a   :  { %s2894_s4 = smov 4   ;;  %s124_s19 = sshll.u32 %s3044_s9, 4  ;;  %s125_s19 = int_to_ptr.hbm [resolvable:$true] %s124_s19 }
  0x1b   :  { %106 = dma.hbm_to_vmem [thread:$0]  %s99_s12, 8192, %s101_s16, [#allocation12], %s2893_s17, %s2893_s17, %s2894_s4  }
  0x1c   :  { %s2895_s7 = smov [#allocation16]  }
  0x1d   :  { %s126_s20 = sshll.u32 %s2895_s7, 4  ;;  %s127_s20 = int_to_ptr.vmem [resolvable:$true] %s126_s20 }
  0x1e   :  { %132 = dma.hbm_to_vmem [thread:$0]  %s125_s19, 4096, %s127_s20, [#allocation15], %s2893_s17, %s2893_s17, %s2894_s4  }
  0x1f   :  { %2869 = dma.done.wait [#allocation3], 256  }
  0x20   :  { %2870 = vsyncadd [#allocation3], 4294967040 }
  0x21   :  { %2871 = dma.done.wait [#allocation6], 160  }
  0x22   :  { %2872 = vsyncadd [#allocation6], 4294967136 }
  0x23   :  { %2873 = dma.done.wait [#allocation9], 4128  }
  0x24   :  { %2874 = vsyncadd [#allocation9], 4294963168 }
  0x25   :  { %2875 = dma.done.wait [#allocation12], 12288  }
  0x26   :  { %2876 = vsyncadd [#allocation12], 4294955008 }
  0x27   :  { %2877 = dma.done.wait [#allocation15], 4224  }
  0x28   :  { %2878 = vsyncadd [#allocation15], 4294963072  ;;  %v1846_v0 = vld [vmem:[#allocation11 + $0x70] sm:$0xf]  ;;  %v2447_v1 = vld [vmem:[#allocation11 + $0x74] sm:$0xf0] }
  0x29   :  { %v1910_v2 = vld [vmem:[#allocation10 + $0x70] sm:$0xf]  ;;  %v1847_v3 = vor.u32 %v2447_v1, %v1846_v0  ;;  %v2463_v4 = vld [vmem:[#allocation10 + $0x74] sm:$0xf0]  ;;  %v1838_v5 = vld [vmem:[#allocation11 + $0x60] sm:$0xf] }
  0x2a   :  { %v2445_v6 = vld [vmem:[#allocation11 + $0x64] sm:$0xf0]  ;;  %v1911_v7 = vor.u32 %v2463_v4, %v1910_v2  ;;  %v1902_v8 = vld [vmem:[#allocation10 + $0x60] sm:$0xf]  ;;  %v2462_v10 = vld [vmem:[#allocation10 + $0x74] sm:$0xf] }
  0x2b   :  { %v2461_v9 = vld [vmem:[#allocation10 + $0x64] sm:$0xf0]  ;;  %293 = vmatpush.bf16.msra.mxu0 %v1847_v3  ;;  %v1839_v11 = vor.u32 %v2445_v6, %v1838_v5  ;;  %v1912_v12 = vld [vmem:[#allocation10 + $0x78] sm:$0xf0]  ;;  %v1830_v13 = vld [vmem:[#allocation11 + $0x50] sm:$0xf] }
  0x2c   :  { %v2443_v14 = vld [vmem:[#allocation11 + $0x54] sm:$0xf0]  ;;  %416 = vmatpush.bf16.msra.mxu2 %v1911_v7  ;;  %v1903_v15 = vor.u32 %v2461_v9, %v1902_v8  ;;  %v1915_v16 = vor.u32 %v2462_v10, %v1912_v12  ;;  %v1894_v17 = vld [vmem:[#allocation10 + $0x50] sm:$0xf]  ;;  %v2460_v19 = vld [vmem:[#allocation10 + $0x64] sm:$0xf] }
  0x2d   :  { %v2459_v18 = vld [vmem:[#allocation10 + $0x54] sm:$0xf0]  ;;  %v1904_v20 = vld [vmem:[#allocation10 + $0x68] sm:$0xf0]  ;;  %v2446_v21 = vld [vmem:[#allocation11 + $0x74] sm:$0xf]  ;;  %v1831_v25 = vor.u32 %v2443_v14, %v1830_v13 }
  0x2e   :  { %v1848_v22 = vld [vmem:[#allocation11 + $0x78] sm:$0xf0]  ;;  %429 = vmatpush.bf16.msra.mxu3 %v1915_v16  ;;  %v1907_v23 = vor.u32 %v2460_v19, %v1904_v20  ;;  %v1822_v26 = vld [vmem:[#allocation11 + $0x40] sm:$0xf]  ;;  %v2458_v27 = vld [vmem:[#allocation10 + $0x54] sm:$0xf]  ;;  %v1895_v29 = vor.u32 %v2459_v18, %v1894_v17 }
  0x2f   :  { %v1851_v24 = vor.u32 %v2446_v21, %v1848_v22  ;;  %294 = vmatpush.bf16.msra.mxu0 %v1839_v11  ;;  %v1896_v28 = vld [vmem:[#allocation10 + $0x58] sm:$0xf0]  ;;  %v2441_v30 = vld [vmem:[#allocation11 + $0x44] sm:$0xf0]  ;;  %v2444_v31 = vld [vmem:[#allocation11 + $0x64] sm:$0xf] }
  0x30   :  { %417 = vmatpush.bf16.msra.mxu2 %v1903_v15  ;;  %v1840_v32 = vld [vmem:[#allocation11 + $0x68] sm:$0xf0]  ;;  %v1886_v33 = vld [vmem:[#allocation10 + $0x40] sm:$0xf]  ;;  %v2457_v34 = vld [vmem:[#allocation10 + $0x44] sm:$0xf0]  ;;  %v1899_v36 = vor.u32 %v2458_v27, %v1896_v28  ;;  %v1823_v38 = vor.u32 %v2441_v30, %v1822_v26 }
  0x31   :  { %306 = vmatpush.bf16.msra.mxu1 %v1851_v24  ;;  %v1843_v35 = vor.u32 %v2444_v31, %v1840_v32  ;;  %v2442_v37 = vld [vmem:[#allocation11 + $0x54] sm:$0xf]  ;;  %v2456_v39 = vld [vmem:[#allocation10 + $0x44] sm:$0xf]  ;;  %v1888_v40 = vld [vmem:[#allocation10 + $0x48] sm:$0xf0]  ;;  %v1887_v42 = vor.u32 %v2457_v34, %v1886_v33 }
  0x32   :  { %430 = vmatpush.bf16.msra.mxu3 %v1907_v23  ;;  %v1832_v41 = vld [vmem:[#allocation11 + $0x58] sm:$0xf0]  ;;  %v1814_v43 = vld [vmem:[#allocation11 + $0x30] sm:$0xf]  ;;  %v2439_v44 = vld [vmem:[#allocation11 + $0x34] sm:$0xf0]  ;;  %v1891_v50 = vor.u32 %v2456_v39, %v1888_v40 }
  0x33   :  { %295 = vmatpush.bf16.msra.mxu0 %v1831_v25  ;;  %v1878_v45 = vld [vmem:[#allocation10 + $0x30] sm:$0xf]  ;;  %v1835_v46 = vor.u32 %v2442_v37, %v1832_v41  ;;  %v2455_v47 = vld [vmem:[#allocation10 + $0x34] sm:$0xf0]  ;;  %v2440_v48 = vld [vmem:[#allocation11 + $0x44] sm:$0xf]  ;;  %v1815_v51 = vor.u32 %v2439_v44, %v1814_v43 }
  0x34   :  { %418 = vmatpush.bf16.msra.mxu2 %v1895_v29  ;;  %v1824_v49 = vld [vmem:[#allocation11 + $0x48] sm:$0xf0]  ;;  %v2454_v52 = vld [vmem:[#allocation10 + $0x34] sm:$0xf]  ;;  %v1880_v53 = vld [vmem:[#allocation10 + $0x38] sm:$0xf0]  ;;  %v1879_v54 = vor.u32 %v2455_v47, %v1878_v45 }
  0x35   :  { %307 = vmatpush.bf16.msra.mxu1 %v1843_v35  ;;  %v1806_v55 = vld [vmem:[#allocation11 + $0x20] sm:$0xf]  ;;  %v2437_v56 = vld [vmem:[#allocation11 + $0x24] sm:$0xf0]  ;;  %v1827_v58 = vor.u32 %v2440_v48, %v1824_v49  ;;  %v2438_v60 = vld [vmem:[#allocation11 + $0x34] sm:$0xf]  ;;  %v1883_v62 = vor.u32 %v2454_v52, %v1880_v53 }
  0x36   :  { %431 = vmatpush.bf16.msra.mxu3 %v1899_v36  ;;  %v1870_v57 = vld [vmem:[#allocation10 + $0x20] sm:$0xf]  ;;  %v2453_v59 = vld [vmem:[#allocation10 + $0x24] sm:$0xf0]  ;;  %v1816_v61 = vld [vmem:[#allocation11 + $0x38] sm:$0xf0]  ;;  %v1807_v2 = vor.u32 %v2437_v56, %v1806_v55 }
  0x37   :  { %296 = vmatpush.bf16.msra.mxu0 %v1823_v38  ;;  %v1798_v63 = vld [vmem:[#allocation11 + $0x10] sm:$0xf]  ;;  %v2435_v0 = vld [vmem:[#allocation11 + $0x14] sm:$0xf0]  ;;  %v2452_v1 = vld [vmem:[#allocation10 + $0x24] sm:$0xf]  ;;  %v1871_v8 = vor.u32 %v2453_v59, %v1870_v57  ;;  %v1819_v9 = vor.u32 %v2438_v60, %v1816_v61 }
  0x38   :  { %419 = vmatpush.bf16.msra.mxu2 %v1887_v42  ;;  %v1862_v3 = vld [vmem:[#allocation10 + $0x10] sm:$0xf]  ;;  %v2451_v4 = vld [vmem:[#allocation10 + $0x14] sm:$0xf0]  ;;  %v1872_v5 = vld [vmem:[#allocation10 + $0x28] sm:$0xf0]  ;;  %v1799_v19 = vor.u32 %v2435_v0, %v1798_v63 }
  0x39   :  { %308 = vmatpush.bf16.msra.mxu1 %v1835_v46  ;;  %v2436_v6 = vld [vmem:[#allocation11 + $0x24] sm:$0xf]  ;;  %v172_v10 = vld [vmem:[#allocation2 + $0x8] sm:$0xff]  ;;  %v174_v11 = vld [vmem:[#allocation8] sm:$0x3]  ;;  %v1875_v18 = vor.u32 %v2452_v1, %v1872_v5  ;;  %v1863_v25 = vor.u32 %v2451_v4, %v1862_v3  ;;  %s2897_s28 = smov [#allocation17]  }
  0x3a   :  { %432 = vmatpush.bf16.msra.mxu3 %v1891_v50  ;;  %v171_v7 = vld [vmem:[#allocation2] sm:$0xff]  ;;  %v175_v12 = vld [vmem:[#allocation7] sm:$0x3]  ;;  %v1808_v13 = vld [vmem:[#allocation11 + $0x28] sm:$0xf0]  ;;  %v184_v16 = vperm.slane %v174_v11, 0 }
  0x3b   :  { %297 = vmatpush.bf16.msra.mxu0 %v1815_v51  ;;  %v177_v14 = vperm.slane %v175_v12, 0  ;;  %v178_v15 = vperm.slane %v175_v12, 1  ;;  %v185_v17 = vperm.slane %v174_v11, 1  ;;  %v1790_v20 = vld [vmem:[#allocation11] sm:$0xf]  ;;  %v1811_v29 = vor.u32 %v2436_v6, %v1808_v13  ;;  %v173_v30 = vld [vmem:[#allocation5] sm:$0xff] }
  0x3c   :  { %420 = vmatpush.bf16.msra.mxu2 %v1879_v54  ;;  %v2450_v21 = vld [vmem:[#allocation10 + $0x14] sm:$0xf]  ;;  %v1864_v22 = vld [vmem:[#allocation10 + $0x18] sm:$0xf0]  ;;  %v2433_v26 = vld [vmem:[#allocation11 + $0x4] sm:$0xf0]  ;;  %v2998_v48 = vpack.c.bf16 %v173_v30, %v173_v30 }
  0x3d   :  { %309 = vmatpush.bf16.msra.mxu1 %v1827_v58  ;;  %v181_v23 = vadd.f32 %v177_v14, %v171_v7  ;;  %v182_v24 = vadd.f32 %v178_v15, %v172_v10  ;;  %v1854_v27 = vld [vmem:[#allocation10] sm:$0xf]  ;;  %v2449_v28 = vld [vmem:[#allocation10 + $0x4] sm:$0xf0]  ;;  %v2448_v33 = vld [vmem:[#allocation10 + $0x4] sm:$0xf]  ;;  %v1867_v37 = vor.u32 %v2450_v21, %v1864_v22  ;;  %v1791_v38 = vor.u32 %v2433_v26, %v1790_v20 }
  0x3e   :  { %433 = vmatpush.bf16.msra.mxu3 %v1883_v62  ;;  %v1856_v34 = vld [vmem:[#allocation10 + $0x8] sm:$0xf0]  ;;  %v2434_v35 = vld [vmem:[#allocation11 + $0x14] sm:$0xf]  ;;  %v1800_v36 = vld [vmem:[#allocation11 + $0x18] sm:$0xf0]  ;;  %v1855_v42 = vor.u32 %v2449_v28, %v1854_v27 }
  0x3f   :  { %298 = vmatpush.bf16.msra.mxu0 %v1807_v2  ;;  %v188_v31 = vmul.f32 %v184_v16, %v181_v23  ;;  %v2991_v32 = vmul.f32 %v185_v17, %v182_v24  ;;  %v2432_v39 = vld [vmem:[#allocation11 + $0x4] sm:$0xf]  ;;  %v1792_v40 = vld [vmem:[#allocation11 + $0x8] sm:$0xf0]  ;;  %v2471_v41 = vld [vmem:[#allocation13 + $0x38] sm:$0xff]  ;;  %v1803_v46 = vor.u32 %v2434_v35, %v1800_v36  ;;  %v1859_v49 = vor.u32 %v2448_v33, %v1856_v34  ;;  %s1772_s29 = sshll.u32 %s2897_s28, 4  ;;  %s1773_s29 = int_to_ptr.vmem [resolvable:$true] %s1772_s29 }
  0x40   :  { %421 = vmatpush.bf16.msra.mxu2 %v1871_v8  ;;  %v2896_v43 = vmov 0.9   ;;  %v1795_v51 = vor.u32 %v2432_v39, %v1792_v40  ;;  %v2470_v52 = vld [vmem:[#allocation13 + $0x30] sm:$0xff]  ;;  %v2479_v53 = vld [vmem:[#allocation13 + $0xb8] sm:$0xff]  ;;  %v2469_v54 = vld [vmem:[#allocation13 + $0x28] sm:$0xff]  ;;  %s1774_s30 = sshll.u32 %s3046_s11, 4  ;;  %s1775_s30 = int_to_ptr.hbm [resolvable:$true] %s1774_s30 }
  0x41   :  { %310 = vmatpush.bf16.msra.mxu1 %v1819_v9  ;;  %vm190_vm0 = vcmp.ge.f32.partialorder %v188_v31, 0.0  ;;  %vm191_vm1 = vcmp.ge.f32.partialorder %v2991_v32, 0.0  ;;  %v2478_v55 = vld [vmem:[#allocation13 + $0xb0] sm:$0xff]  ;;  %v2468_v56 = vld [vmem:[#allocation13 + $0x20] sm:$0xff]  ;;  %v2477_v57 = vld [vmem:[#allocation13 + $0xa8] sm:$0xff] }
  0x42   :  { %434 = vmatpush.bf16.msra.mxu3 %v1875_v18  ;;  %v192_v44 = vsel %vm190_vm0, 1.0, %v2896_v43  ;;  %v2994_v45 = vsel %vm191_vm1, 1.0, %v2896_v43  ;;  %v2467_v58 = vld [vmem:[#allocation13 + $0x18] sm:$0xff]  ;;  %v2476_v59 = vld [vmem:[#allocation13 + $0xa0] sm:$0xff]  ;;  %v2466_v60 = vld [vmem:[#allocation13 + $0x10] sm:$0xff] }
  0x43   :  { %299 = vmatpush.bf16.msra.mxu0 %v1799_v19  ;;  %v2996_v47 = vmul.f32 %v192_v44, %v188_v31  ;;  %v2475_v61 = vld [vmem:[#allocation13 + $0x98] sm:$0xff]  ;;  %v2465_v62 = vld [vmem:[#allocation13 + $0x8] sm:$0xff]  ;;  %v2474_v63 = vld [vmem:[#allocation13 + $0x90] sm:$0xff] }
  0x44   :  { %422 = vmatpush.bf16.msra.mxu2 %v1863_v25  ;;  %v2464_v0 = vld [vmem:[#allocation13] sm:$0xff]  ;;  %v2473_v1 = vld [vmem:[#allocation13 + $0x88] sm:$0xff]  ;;  %v2487_v3 = vld [vmem:[#allocation13 + $0x78] sm:$0xff] }
  0x45   :  { %311 = vmatpush.bf16.msra.mxu1 %v1811_v29  ;;  %v335_v50 = vpack.c.bf16 %v2996_v47, %v2996_v47  ;;  %v2472_v2 = vld [vmem:[#allocation13 + $0x80] sm:$0xff]  ;;  %v2495_v4 = vld [vmem:[#allocation13 + $0xf8] sm:$0xff]  ;;  %v2486_v5 = vld [vmem:[#allocation13 + $0x70] sm:$0xff] }
  0x46   :  { %435 = vmatpush.bf16.msra.mxu3 %v1867_v37  ;;  %v2494_v6 = vld [vmem:[#allocation13 + $0xf0] sm:$0xff]  ;;  %v2485_v7 = vld [vmem:[#allocation13 + $0x68] sm:$0xff]  ;;  %v2484_v9 = vld [vmem:[#allocation13 + $0x60] sm:$0xff] }
  0x47   :  { %300 = vmatpush.bf16.msra.mxu0 %v1791_v38  ;;  %v2493_v8 = vld [vmem:[#allocation13 + $0xe8] sm:$0xff]  ;;  %v2492_v10 = vld [vmem:[#allocation13 + $0xe0] sm:$0xff]  ;;  %v2483_v12 = vld [vmem:[#allocation13 + $0x58] sm:$0xff] }
  0x48   :  { %423 = vmatpush.bf16.msra.mxu2 %v1855_v42  ;;  %v2491_v13 = vld [vmem:[#allocation13 + $0xd8] sm:$0xff]  ;;  %v442_v14 = vld [vmem:[%s3041_s6] sm:$0x3]  ;;  %v2482_v16 = vld [vmem:[#allocation13 + $0x50] sm:$0xff] }
  0x49   :  { %312 = vmatpush.bf16.msra.mxu1 %v1803_v46  ;;  %v444_v17 = vperm.slane %v442_v14, 0  ;;  %v445_v21 = vperm.slane %v442_v14, 1  ;;  %v2481_v36 = vld [vmem:[#allocation13 + $0x48] sm:$0xff]  ;;  %v2490_v37 = vld [vmem:[#allocation13 + $0xd0] sm:$0xff]  ;;  %v2480_v38 = vld [vmem:[#allocation13 + $0x40] sm:$0xff] }
  0x4a   :  { %301 = vmatmul.bf16.vlgmr.msra.gmra.mxu0 %v2998_v48  ;;  %436 = vmatpush.bf16.msra.mxu3 %v1859_v49  ;;  %v2489_v39 = vld [vmem:[#allocation13 + $0xc8] sm:$0xff]  ;;  %v2488_v40 = vld [vmem:[#allocation13 + $0xc0] sm:$0xff]  ;;  %v2502_v43 = vld [vmem:[#allocation16 + $0x30] sm:$0xff] }
  0x4b   :  { %525 = vmatpush.bf16.msrb.mxu0 %v2471_v41  ;;  %424 = vmatmul.bf16.vlgmr.msra.gmra.mxu2 %v335_v50  ;;  %v2503_v41 = vld [vmem:[#allocation16 + $0x38] sm:$0xff]  ;;  %v2510_v44 = vld [vmem:[#allocation16 + $0x70] sm:$0xff]  ;;  %v2501_v46 = vld [vmem:[#allocation16 + $0x28] sm:$0xff] }
  0x4c   :  { %699 = vmatpush.bf16.msrb.mxu2 %v2487_v3  ;;  %v2511_v42 = vld [vmem:[#allocation16 + $0x78] sm:$0xff]  ;;  %v2509_v49 = vld [vmem:[#allocation16 + $0x68] sm:$0xff]  ;;  %v2525_v14 = vld [vmem:[#allocation11 + $0xe4] sm:$0xf0] }
  0x4d   :  { %313 = vmatpush.bf16.msra.mxu1 %v1795_v51  ;;  %437 = vmatmul.bf16.vlgmr.msra.gmra.mxu3 %v335_v50  ;;  %v2500_v50 = vld [vmem:[#allocation16 + $0x20] sm:$0xff] }
  0x4e   :  { %786 = vmatpush.bf16.msrb.mxu3 %v2495_v4  ;;  %v2508_v51 = vld [vmem:[#allocation16 + $0x60] sm:$0xff] }
  0x4f   :  { %526 = vmatpush.bf16.msrb.mxu0 %v2470_v52  ;;  %v2499_v52 = vld [vmem:[#allocation16 + $0x18] sm:$0xff] }
  0x50   :  { %314 = vmatmul.bf16.vlgmr.msra.gmra.mxu1 %v2998_v48  ;;  %700 = vmatpush.bf16.msrb.mxu2 %v2486_v5  ;;  %v2497_v5 = vld [vmem:[#allocation16 + $0x8] sm:$0xff] }
  0x51   :  { %612 = vmatpush.bf16.msrb.mxu1 %v2479_v53  ;;  %v2507_v53 = vld [vmem:[#allocation16 + $0x58] sm:$0xff] }
  0x52   :  { %787 = vmatpush.bf16.msrb.mxu3 %v2494_v6  ;;  %v2506_v6 = vld [vmem:[#allocation16 + $0x50] sm:$0xff] }
  0x53   :  { %527 = vmatpush.bf16.msrb.mxu0 %v2469_v54  ;;  %v2498_v54 = vld [vmem:[#allocation16 + $0x10] sm:$0xff] }
  0x54   :  { %701 = vmatpush.bf16.msrb.mxu2 %v2485_v7  ;;  %v2496_v7 = vld [vmem:[#allocation16] sm:$0xff] }
  0x55   :  { %613 = vmatpush.bf16.msrb.mxu1 %v2478_v55  ;;  %v2609_v55 = vld [vmem:[#allocation14] ss:$0 sm:$0xff] }
  0x56   :  { %788 = vmatpush.bf16.msrb.mxu3 %v2493_v8  ;;  %v2505_v8 = vld [vmem:[#allocation16 + $0x48] sm:$0xff] }
  0x57   :  { %528 = vmatpush.bf16.msrb.mxu0 %v2468_v56  ;;  %v2610_v56 = vld [vmem:[#allocation14 + $0x2] ss:$0 sm:$0xff] }
  0x58   :  { %702 = vmatpush.bf16.msrb.mxu2 %v2484_v9  ;;  %v2504_v9 = vld [vmem:[#allocation16 + $0x40] sm:$0xff] }
  0x59   :  { %614 = vmatpush.bf16.msrb.mxu1 %v2477_v57 }
  0x5a   :  { %789 = vmatpush.bf16.msrb.mxu3 %v2492_v10  ;;  %v2167_v10 = vld [vmem:[#allocation11 + $0xf0] sm:$0xf] }
  0x5b   :  { %529 = vmatpush.bf16.msrb.mxu0 %v2467_v58 }
  0x5c   :  { %703 = vmatpush.bf16.msrb.mxu2 %v2483_v12  ;;  %v2159_v12 = vld [vmem:[#allocation11 + $0xe0] sm:$0xf] }
  0x5d   :  { %615 = vmatpush.bf16.msrb.mxu1 %v2476_v59 }
  0x5e   :  { %790 = vmatpush.bf16.msrb.mxu3 %v2491_v13 }
  0x5f   :  { %530 = vmatpush.bf16.msrb.mxu0 %v2466_v60 }
  0x60   :  { %704 = vmatpush.bf16.msrb.mxu2 %v2482_v16  ;;  %v2526_v16 = vld [vmem:[#allocation11 + $0xf4] sm:$0xf] }
  0x61   :  { %616 = vmatpush.bf16.msrb.mxu1 %v2475_v61 }
  0x62   :  { %791 = vmatpush.bf16.msrb.mxu3 %v2490_v37  ;;  %v2225_v37 = vld [vmem:[#allocation10 + $0xe8] sm:$0xf0] }
  0x63   :  { %531 = vmatpush.bf16.msrb.mxu0 %v2465_v62 }
  0x64   :  { %705 = vmatpush.bf16.msrb.mxu2 %v2481_v36  ;;  %v2540_v36 = vld [vmem:[#allocation10 + $0xe4] sm:$0xf] }
  0x65   :  { %617 = vmatpush.bf16.msrb.mxu1 %v2474_v63 }
  0x66   :  { %792 = vmatpush.bf16.msrb.mxu3 %v2489_v39  ;;  %v2521_v39 = vld [vmem:[#allocation11 + $0xc4] sm:$0xf0] }
  0x67   :  { %532 = vmatpush.bf16.msrb.mxu0 %v2464_v0 }
  0x68   :  { %706 = vmatpush.bf16.msrb.mxu2 %v2480_v38  ;;  %v2143_v38 = vld [vmem:[#allocation11 + $0xc0] sm:$0xf] }
  0x69   :  { %618 = vmatpush.bf16.msrb.mxu1 %v2473_v1 }
  0x6a   :  { %793 = vmatpush.bf16.msrb.mxu3 %v2488_v40 }
  0x6b   :  { %871 = vmatpush.bf16.msra.mxu0 %v2503_v41  ;;  %v2228_v41 = vor.u32 %v2540_v36, %v2225_v37  ;;  %v2514_v37 = vld [vmem:[#allocation11 + $0x94] sm:$0xf] }
  0x6d   :  { %619 = vmatpush.bf16.msrb.mxu1 %v2472_v2 }
  0x6f   :  { %872 = vmatpush.bf16.msra.mxu0 %v2502_v43  ;;  %v2144_v43 = vor.u32 %v2521_v39, %v2143_v38  ;;  %v2121_v38 = vld [vmem:[#allocation11 + $0x98] sm:$0xf0] }
  0x70   :  { %v2124_v39 = vor.u32 %v2514_v37, %v2121_v38  ;;  %v2565_v37 = vld [vmem:[#allocation13 + $0x168] sm:$0xff] }
  0x71   :  { %956 = vmatpush.bf16.msra.mxu1 %v2511_v42  ;;  %v2573_v38 = vld [vmem:[#allocation13 + $0x1e8] sm:$0xff] }
  0x73   :  { %873 = vmatpush.bf16.msra.mxu0 %v2501_v46  ;;  %v2519_v46 = vld [vmem:[#allocation11 + $0xb4] sm:$0xf0] }
  0x75   :  { %957 = vmatpush.bf16.msra.mxu1 %v2510_v44  ;;  %v2135_v44 = vld [vmem:[#allocation11 + $0xb0] sm:$0xf] }
  0x77   :  { %874 = vmatpush.bf16.msra.mxu0 %v2500_v50  ;;  %v2611_v50 = vld [vmem:[#allocation14 + $0x1] ss:$0 sm:$0xff] }
  0x79   :  { %958 = vmatpush.bf16.msra.mxu1 %v2509_v49  ;;  %v2136_v49 = vor.u32 %v2519_v46, %v2135_v44  ;;  %v2532_v44 = vld [vmem:[#allocation10 + $0xa4] sm:$0xf]  ;;  %v2193_v46 = vld [vmem:[#allocation10 + $0xa8] sm:$0xf0] }
  0x7b   :  { %875 = vmatpush.bf16.msra.mxu0 %v2499_v52 }
  0x7d   :  { %959 = vmatpush.bf16.msra.mxu1 %v2508_v51  ;;  %v2612_v51 = vld [vmem:[#allocation14 + $0x3] ss:$0 sm:$0xff] }
  0x7f   :  { %876 = vmatpush.bf16.msra.mxu0 %v2498_v54 }
  0x81   :  { %960 = vmatpush.bf16.msra.mxu1 %v2507_v53 }
  0x83   :  { %877 = vmatpush.bf16.msra.mxu0 %v2497_v5 }
  0x85   :  { %961 = vmatpush.bf16.msra.mxu1 %v2506_v6  ;;  %v2215_v6 = vld [vmem:[#allocation10 + $0xd0] sm:$0xf] }
  0x87   :  { %878 = vmatpush.bf16.msra.mxu0 %v2496_v7  ;;  %v2539_v7 = vld [vmem:[#allocation10 + $0xd4] sm:$0xf0] }
  0x89   :  { %962 = vmatpush.bf16.msra.mxu1 %v2505_v8  ;;  %v2538_v8 = vld [vmem:[#allocation10 + $0xd4] sm:$0xf] }
  0x8d   :  { %963 = vmatpush.bf16.msra.mxu1 %v2504_v9  ;;  %v2216_v9 = vor.u32 %v2539_v7, %v2215_v6 }
  0xc7   :  { %v302_v11 = vpop.f32.mrf.mxu0 }
  0xcd   :  { %v315_v15 = vpop.f32.mrf.mxu1 }
  0xce   :  { %v425_v18 = vpop.f32.mrf.mxu2 }
  0xcf   :  { %v426_v19 = vadd.f32 %v425_v18, %v302_v11  ;;  %v304_v20 = vpop.f32.mrf.mxu0  ;;  %v2527_v11 = vld [vmem:[#allocation11 + $0xf4] sm:$0xf0]  ;;  %v2160_v18 = vor.u32 %v2525_v14, %v2159_v12  ;;  %v2119_v12 = vld [vmem:[#allocation11 + $0x90] sm:$0xf]  ;;  %v2518_v14 = vld [vmem:[#allocation11 + $0xb4] sm:$0xf] }
  0xd0   :  { %v438_v22 = vpop.f32.mrf.mxu3  ;;  %v2168_v13 = vor.u32 %v2527_v11, %v2167_v10  ;;  %v2217_v10 = vld [vmem:[#allocation10 + $0xd8] sm:$0xf0] }
  0xd1   :  { %v448_v23 = vadd.f32 %v444_v17, %v426_v19  ;;  %v439_v24 = vadd.f32 %v438_v22, %v315_v15  ;;  %v2151_v15 = vld [vmem:[#allocation11 + $0xd0] sm:$0xf]  ;;  %v2169_v17 = vld [vmem:[#allocation11 + $0xf8] sm:$0xf0]  ;;  %v2523_v19 = vld [vmem:[#allocation11 + $0xd4] sm:$0xf0]  ;;  %v2220_v11 = vor.u32 %v2538_v8, %v2217_v10 }
  0xd2   :  { %1072 = vmatpush.bf16.msra.mxu2 %v2168_v13  ;;  %v2172_v20 = vor.u32 %v2526_v16, %v2169_v17  ;;  %v2161_v22 = vld [vmem:[#allocation11 + $0xe8] sm:$0xf0]  ;;  %v2515_v13 = vld [vmem:[#allocation11 + $0x94] sm:$0xf0]  ;;  %v2137_v16 = vld [vmem:[#allocation11 + $0xb8] sm:$0xf0] }
  0xd3   :  { %v452_v25 = vmul.f32 0.01, %v448_v23  ;;  %v449_v26 = vadd.f32 %v445_v21, %v439_v24  ;;  %vm450_vm2 = vcmp.ge.f32.partialorder %v448_v23, 0.0  ;;  %v2524_v21 = vld [vmem:[#allocation11 + $0xe4] sm:$0xf]  ;;  %v2140_v17 = vor.u32 %v2518_v14, %v2137_v16  ;;  %v2550_v14 = vld [vmem:[#allocation13 + $0x130] sm:$0xff] }
  0xd4   :  { %v2543_v24 = vld [vmem:[#allocation10 + $0xf4] sm:$0xf0]  ;;  %1085 = vmatpush.bf16.msra.mxu3 %v2172_v20  ;;  %v2536_v20 = vld [vmem:[#allocation10 + $0xc4] sm:$0xf]  ;;  %v2549_v16 = vld [vmem:[#allocation13 + $0x128] sm:$0xff] }
  0xd5   :  { %v317_v27 = vpop.f32.mrf.mxu1  ;;  %v453_v28 = vmul.f32 0.01, %v449_v26  ;;  %v454_v29 = vsel %vm450_vm2, %v448_v23, %v452_v25  ;;  %vm451_vm3 = vcmp.ge.f32.partialorder %v449_v26, 0.0  ;;  %v2231_v23 = vld [vmem:[#allocation10 + $0xf0] sm:$0xf] }
  0xd6   :  { %v427_v30 = vpop.f32.mrf.mxu2  ;;  %v472_v31 = vpack.c.bf16 %v454_v29, %v454_v29  ;;  %v2542_v25 = vld [vmem:[#allocation10 + $0xf4] sm:$0xf]  ;;  %v2232_v27 = vor.u32 %v2543_v24, %v2231_v23  ;;  %1073 = vmatpush.bf16.msra.mxu2 %v2160_v18  ;;  %v2207_v18 = vld [vmem:[#allocation10 + $0xc0] sm:$0xf] }
  0xd7   :  { %v455_v33 = vsel %vm451_vm3, %v449_v26, %v453_v28  ;;  %v2164_v26 = vor.u32 %v2524_v21, %v2161_v22  ;;  %v2233_v28 = vld [vmem:[#allocation10 + $0xf8] sm:$0xf0]  ;;  %v2522_v30 = vld [vmem:[#allocation11 + $0xd4] sm:$0xf]  ;;  %v2209_v22 = vld [vmem:[#allocation10 + $0xc8] sm:$0xf0] }
  0xd8   :  { %533 = vmatmul.bf16.vlgmr.msrb.gmra.mxu0 %v472_v31  ;;  %v558_v34 = vpack.c.bf16 %v455_v33, %v455_v33  ;;  %v440_v35 = vpop.f32.mrf.mxu3  ;;  %v2236_v29 = vor.u32 %v2542_v25, %v2233_v28  ;;  %v2153_v31 = vld [vmem:[#allocation11 + $0xd8] sm:$0xf0]  ;;  %v2223_v33 = vld [vmem:[#allocation10 + $0xe0] sm:$0xf]  ;;  %v2212_v23 = vor.u32 %v2536_v20, %v2209_v22  ;;  %v2513_v25 = vld [vmem:[#allocation11 + $0x84] sm:$0xf0] }
  0xd9   :  { %1196 = vmatpush.bf16.msrb.mxu0 %v2232_v27  ;;  %v2541_v35 = vld [vmem:[#allocation10 + $0xe4] sm:$0xf0]  ;;  %1086 = vmatpush.bf16.msra.mxu3 %v2164_v26  ;;  %v2156_v42 = vor.u32 %v2522_v30, %v2153_v31  ;;  %v2111_v24 = vld [vmem:[#allocation11 + $0x80] sm:$0xf]  ;;  %v2516_v26 = vld [vmem:[#allocation11 + $0xa4] sm:$0xf] }
  0xda   :  { %620 = vmatmul.bf16.vlgmr.msrb.gmra.mxu1 %v558_v34  ;;  %v2152_v34 = vor.u32 %v2523_v19, %v2151_v15  ;;  %v2224_v40 = vor.u32 %v2541_v35, %v2223_v33  ;;  %v2120_v15 = vor.u32 %v2515_v13, %v2119_v12  ;;  %v2537_v19 = vld [vmem:[#allocation10 + $0xc4] sm:$0xf0]  ;;  %v2112_v27 = vor.u32 %v2513_v25, %v2111_v24  ;;  %v2129_v28 = vld [vmem:[#allocation11 + $0xa8] sm:$0xf0]  ;;  %v2199_v30 = vld [vmem:[#allocation10 + $0xb0] sm:$0xf] }
  0xdb   :  { %1209 = vmatpush.bf16.msrb.mxu1 %v2236_v29  ;;  %v2208_v21 = vor.u32 %v2537_v19, %v2207_v18  ;;  %v2132_v29 = vor.u32 %v2516_v26, %v2129_v28  ;;  %v2535_v31 = vld [vmem:[#allocation10 + $0xb4] sm:$0xf0]  ;;  %v2534_v33 = vld [vmem:[#allocation10 + $0xb4] sm:$0xf]  ;;  %v2201_v35 = vld [vmem:[#allocation10 + $0xb8] sm:$0xf0] }
  0xdc   :  { %1074 = vmatpush.bf16.msra.mxu2 %v2152_v34  ;;  %v2200_v34 = vor.u32 %v2535_v31, %v2199_v30  ;;  %v2204_v36 = vor.u32 %v2534_v33, %v2201_v35  ;;  %v2551_v12 = vld [vmem:[#allocation13 + $0x138] sm:$0xff]  ;;  %v2548_v18 = vld [vmem:[#allocation13 + $0x120] sm:$0xff]  ;;  %v2554_v24 = vld [vmem:[#allocation13 + $0x190] sm:$0xff] }
  0xdd   :  { %1197 = vmatpush.bf16.msrb.mxu0 %v2224_v40  ;;  %1087 = vmatpush.bf16.msra.mxu3 %v2156_v42  ;;  %v2191_v40 = vld [vmem:[#allocation10 + $0xa0] sm:$0xf]  ;;  %v195_v42 = vmul.f32 %v2994_v45, %v2991_v32  ;;  %v2529_v45 = vld [vmem:[#allocation10 + $0x84] sm:$0xf0]  ;;  %v2559_v13 = vld [vmem:[#allocation13 + $0x1b8] sm:$0xff] }
  0xde   :  { %v2175_v32 = vld [vmem:[#allocation10 + $0x80] sm:$0xf]  ;;  %v2547_v20 = vld [vmem:[#allocation13 + $0x118] sm:$0xff]  ;;  %v2553_v28 = vld [vmem:[#allocation13 + $0x188] sm:$0xff] }
  0xdf   :  { %1210 = vmatpush.bf16.msrb.mxu1 %v2228_v41  ;;  %v2533_v41 = vld [vmem:[#allocation10 + $0xa4] sm:$0xf0]  ;;  %v2556_v19 = vld [vmem:[#allocation13 + $0x1a0] sm:$0xff]  ;;  %v2567_v33 = vld [vmem:[#allocation13 + $0x178] sm:$0xff] }
  0xe0   :  { %1075 = vmatpush.bf16.msra.mxu2 %v2144_v43  ;;  %v2192_v43 = vor.u32 %v2533_v41, %v2191_v40  ;;  %v2552_v30 = vld [vmem:[#allocation13 + $0x180] sm:$0xff]  ;;  %v2566_v35 = vld [vmem:[#allocation13 + $0x170] sm:$0xff]  ;;  %v2563_v41 = vld [vmem:[#allocation13 + $0x158] sm:$0xff] }
  0xe1   :  { %1198 = vmatpush.bf16.msrb.mxu0 %v2216_v9  ;;  %v2572_v40 = vld [vmem:[#allocation13 + $0x1e0] sm:$0xff] }
  0xe3   :  { %1211 = vmatpush.bf16.msrb.mxu1 %v2220_v11 }
  0xe4   :  { %1076 = vmatpush.bf16.msra.mxu2 %v2136_v49  ;;  %v2196_v49 = vor.u32 %v2532_v44, %v2193_v46  ;;  %v2562_v44 = vld [vmem:[#allocation13 + $0x150] sm:$0xff] }
  0xe5   :  { %1199 = vmatpush.bf16.msrb.mxu0 %v2208_v21  ;;  %v2555_v21 = vld [vmem:[#allocation13 + $0x198] sm:$0xff]  ;;  %v2570_v46 = vld [vmem:[#allocation13 + $0x1d0] sm:$0xff] }
  0xe7   :  { %1212 = vmatpush.bf16.msrb.mxu1 %v2212_v23  ;;  %v2546_v23 = vld [vmem:[#allocation13 + $0x110] sm:$0xff] }
  0xe9   :  { %1200 = vmatpush.bf16.msrb.mxu0 %v2200_v34  ;;  %v2575_v34 = vld [vmem:[#allocation13 + $0x1f8] sm:$0xff] }
  0xeb   :  { %1213 = vmatpush.bf16.msrb.mxu1 %v2204_v36  ;;  %v2574_v36 = vld [vmem:[#allocation13 + $0x1f0] sm:$0xff] }
  0xed   :  { %1201 = vmatpush.bf16.msrb.mxu0 %v2192_v43  ;;  %v2237_v43 = vld [vmem:[%s3041_s6 + $0x2] sm:$0x3] }
  0xef   :  { %1214 = vmatpush.bf16.msrb.mxu1 %v2196_v49  ;;  %v1225_v49 = vperm.slane %v2237_v43, 0 }
 0x155   :  { %v534_v57 = vpop.f32.mrf.mxu0 }
 0x156   :  { %v535_v58 = vadd.f32 %v2609_v55, %v534_v57 }
 0x157   :  { %v621_v59 = vpop.f32.mrf.mxu1 }
 0x158   :  { %vm538_vm4 = vcmp.ge.f32.partialorder %v535_v58, 0.0  ;;  %v539_v60 = vmul.f32 0.01, %v535_v58  ;;  %v622_v61 = vadd.f32 %v2610_v56, %v621_v59 }
 0x15a   :  { %vm625_vm5 = vcmp.ge.f32.partialorder %v622_v61, 0.0  ;;  %v626_v62 = vmul.f32 0.01, %v622_v61  ;;  %v540_v63 = vsel %vm538_vm4, %v535_v58, %v539_v60 }
 0x15b   :  { %v645_v0 = vpack.c.bf16 %v540_v63, %v540_v63 }
 0x15c   :  { %v627_v1 = vsel %vm625_vm5, %v622_v61, %v626_v62 }
 0x15d   :  { %v536_v2 = vpop.f32.mrf.mxu0  ;;  %707 = vmatmul.bf16.vlgmr.msrb.gmra.mxu2 %v645_v0  ;;  %v732_v3 = vpack.c.bf16 %v627_v1, %v627_v1  ;;  %v2127_v0 = vld [vmem:[#allocation11 + $0xa0] sm:$0xf]  ;;  %v2517_v1 = vld [vmem:[#allocation11 + $0xa4] sm:$0xf0] }
 0x15e   :  { %v2520_v2 = vld [vmem:[#allocation11 + $0xc4] sm:$0xf] }
 0x15f   :  { %794 = vmatmul.bf16.vlgmr.msrb.gmra.mxu3 %v732_v3  ;;  %v623_v4 = vpop.f32.mrf.mxu1  ;;  %v2128_v3 = vor.u32 %v2517_v1, %v2127_v0 }
 0x160   :  { %v2145_v4 = vld [vmem:[#allocation11 + $0xc8] sm:$0xf0] }
 0x161   :  { %v2148_v5 = vor.u32 %v2520_v2, %v2145_v4  ;;  %1077 = vmatpush.bf16.msra.mxu2 %v2128_v3 }
 0x163   :  { %1088 = vmatpush.bf16.msra.mxu3 %v2148_v5 }
 0x165   :  { %1078 = vmatpush.bf16.msra.mxu2 %v2120_v15  ;;  %v2558_v15 = vld [vmem:[#allocation13 + $0x1b0] sm:$0xff] }
 0x167   :  { %1089 = vmatpush.bf16.msra.mxu3 %v2140_v17  ;;  %v2557_v17 = vld [vmem:[#allocation13 + $0x1a8] sm:$0xff] }
 0x169   :  { %1079 = vmatpush.bf16.msra.mxu2 %v2112_v27  ;;  %v2545_v27 = vld [vmem:[#allocation13 + $0x108] sm:$0xff] }
 0x16b   :  { %1090 = vmatpush.bf16.msra.mxu3 %v2132_v29  ;;  %v2544_v29 = vld [vmem:[#allocation13 + $0x100] sm:$0xff] }
 0x16d   :  { %1080 = vmatmul.bf16.vlgmr.msra.gmra.mxu2 %v2998_v48 }
 0x16e   :  { %1308 = vmatpush.bf16.msrb.mxu2 %v2551_v12  ;;  %v2587_v12 = vld [vmem:[#allocation16 + $0xd8] sm:$0xff] }
 0x16f   :  { %1091 = vmatpush.bf16.msra.mxu3 %v2124_v39  ;;  %v2564_v39 = vld [vmem:[#allocation13 + $0x160] sm:$0xff] }
 0x172   :  { %1309 = vmatpush.bf16.msrb.mxu2 %v2550_v14  ;;  %v2586_v14 = vld [vmem:[#allocation16 + $0xd0] sm:$0xff] }
 0x176   :  { %1310 = vmatpush.bf16.msrb.mxu2 %v2549_v16  ;;  %v2616_v16 = vld [vmem:[#allocation14 + $0x6] ss:$0 sm:$0xff] }
 0x17a   :  { %1311 = vmatpush.bf16.msrb.mxu2 %v2548_v18 }
 0x17e   :  { %1312 = vmatpush.bf16.msrb.mxu2 %v2547_v20 }
 0x182   :  { %1313 = vmatpush.bf16.msrb.mxu2 %v2546_v23 }
 0x186   :  { %1314 = vmatpush.bf16.msrb.mxu2 %v2545_v27 }
 0x18a   :  { %1315 = vmatpush.bf16.msrb.mxu2 %v2544_v29  ;;  %v2577_v29 = vld [vmem:[#allocation16 + $0x88] sm:$0xff] }
 0x1e0   :  { %v708_v52 = vpop.f32.mrf.mxu2 }
 0x1e1   :  { %v709_v53 = vadd.f32 %v2611_v50, %v708_v52  ;;  %v2512_v50 = vld [vmem:[#allocation11 + $0x84] sm:$0xf] }
 0x1e2   :  { %v795_v54 = vpop.f32.mrf.mxu3 }
 0x1e3   :  { %vm712_vm6 = vcmp.ge.f32.partialorder %v709_v53, 0.0  ;;  %v713_v55 = vmul.f32 0.01, %v709_v53  ;;  %v796_v56 = vadd.f32 %v2612_v51, %v795_v54  ;;  %v2113_v51 = vld [vmem:[#allocation11 + $0x88] sm:$0xf0] }
 0x1e4   :  { %v2116_v52 = vor.u32 %v2512_v50, %v2113_v51  ;;  %v2531_v54 = vld [vmem:[#allocation10 + $0x94] sm:$0xf0]  ;;  %v1226_v50 = vperm.slane %v2237_v43, 1 }
 0x1e5   :  { %v714_v57 = vsel %vm712_vm6, %v709_v53, %v713_v55  ;;  %vm799_vm7 = vcmp.ge.f32.partialorder %v796_v56, 0.0  ;;  %v800_v58 = vmul.f32 0.01, %v796_v56  ;;  %v2183_v53 = vld [vmem:[#allocation10 + $0x90] sm:$0xf] }
 0x1e6   :  { %v818_v59 = vpack.c.bf16 %v714_v57, %v714_v57  ;;  %v2530_v55 = vld [vmem:[#allocation10 + $0x94] sm:$0xf]  ;;  %v2185_v57 = vld [vmem:[#allocation10 + $0x98] sm:$0xf0]  ;;  %1092 = vmatpush.bf16.msra.mxu3 %v2116_v52 }
 0x1e7   :  { %v801_v60 = vsel %vm799_vm7, %v796_v56, %v800_v58  ;;  %v2184_v56 = vor.u32 %v2531_v54, %v2183_v53  ;;  %v2188_v58 = vor.u32 %v2530_v55, %v2185_v57 }
 0x1e8   :  { %v902_v61 = vpack.c.bf16 %v801_v60, %v801_v60  ;;  %v710_v62 = vpop.f32.mrf.mxu2  ;;  %879 = vmatmul.bf16.vlgmr.msra.gmra.mxu0 %v818_v59  ;;  %v2528_v59 = vld [vmem:[#allocation10 + $0x84] sm:$0xf]  ;;  %v2176_v60 = vor.u32 %v2529_v45, %v2175_v32 }
 0x1e9   :  { %1202 = vmatpush.bf16.msrb.mxu0 %v2184_v56  ;;  %1215 = vmatpush.bf16.msrb.mxu1 %v2188_v58 }
 0x1ea   :  { %964 = vmatmul.bf16.vlgmr.msra.gmra.mxu1 %v902_v61  ;;  %v797_v63 = vpop.f32.mrf.mxu3  ;;  %1093 = vmatmul.bf16.vlgmr.msra.gmra.mxu3 %v2998_v48  ;;  %v2177_v61 = vld [vmem:[#allocation10 + $0x88] sm:$0xf0]  ;;  %v2614_v48 = vld [vmem:[%s3045_s10 + $0x1] ss:$0 sm:$0xff] }
 0x1eb   :  { %v2180_v62 = vor.u32 %v2528_v59, %v2177_v61  ;;  %v2613_v63 = vld [vmem:[%s3045_s10] ss:$0 sm:$0xff]  ;;  %1395 = vmatpush.bf16.msrb.mxu3 %v2559_v13  ;;  %v2578_v13 = vld [vmem:[#allocation16 + $0x90] sm:$0xff] }
 0x1ed   :  { %1203 = vmatpush.bf16.msrb.mxu0 %v2176_v60  ;;  %1216 = vmatpush.bf16.msrb.mxu1 %v2180_v62 }
 0x1ef   :  { %1396 = vmatpush.bf16.msrb.mxu3 %v2558_v15  ;;  %v2615_v15 = vld [vmem:[#allocation14 + $0x4] ss:$0 sm:$0xff] }
 0x1f0   :  { %v1081_v22 = vpop.f32.mrf.mxu2 }
 0x1f1   :  { %1482 = vmatpush.bf16.msra.mxu0 %v2567_v33  ;;  %1569 = vmatpush.bf16.msra.mxu1 %v2575_v34  ;;  %v2584_v33 = vld [vmem:[#allocation16 + $0xc0] sm:$0xff]  ;;  %v2617_v34 = vld [vmem:[#allocation14 + $0x5] ss:$0 sm:$0xff] }
 0x1f3   :  { %1397 = vmatpush.bf16.msrb.mxu3 %v2557_v17 }
 0x1f5   :  { %1483 = vmatpush.bf16.msra.mxu0 %v2566_v35  ;;  %1570 = vmatpush.bf16.msra.mxu1 %v2574_v36  ;;  %v2618_v35 = vld [vmem:[#allocation14 + $0x7] ss:$0 sm:$0xff] }
 0x1f7   :  { %1398 = vmatpush.bf16.msrb.mxu3 %v2556_v19 }
 0x1f8   :  { %v1083_v25 = vpop.f32.mrf.mxu2 }
 0x1f9   :  { %1484 = vmatpush.bf16.msra.mxu0 %v2565_v37  ;;  %1571 = vmatpush.bf16.msra.mxu1 %v2573_v38 }
 0x1fb   :  { %1399 = vmatpush.bf16.msrb.mxu3 %v2555_v21 }
 0x1fd   :  { %1485 = vmatpush.bf16.msra.mxu0 %v2564_v39  ;;  %1572 = vmatpush.bf16.msra.mxu1 %v2572_v40 }
 0x1ff   :  { %1400 = vmatpush.bf16.msrb.mxu3 %v2554_v24 }
 0x201   :  { %1486 = vmatpush.bf16.msra.mxu0 %v2563_v41 }
 0x203   :  { %1401 = vmatpush.bf16.msrb.mxu3 %v2553_v28 }
 0x205   :  { %1487 = vmatpush.bf16.msra.mxu0 %v2562_v44 }
 0x207   :  { %1402 = vmatpush.bf16.msrb.mxu3 %v2552_v30  ;;  %v2585_v30 = vld [vmem:[#allocation16 + $0xc8] sm:$0xff] }
 0x265   :  { %v880_v0 = vpop.f32.mrf.mxu0 }
 0x266   :  { %v881_v1 = vadd.f32 %v2613_v63, %v880_v0  ;;  %v2561_v63 = vld [vmem:[#allocation13 + $0x148] sm:$0xff] }
 0x267   :  { %v965_v2 = vpop.f32.mrf.mxu1  ;;  %v2569_v0 = vld [vmem:[#allocation13 + $0x1c8] sm:$0xff]  ;;  %1488 = vmatpush.bf16.msra.mxu0 %v2561_v63  ;;  %v1761_v63 = vlaneseq }
 0x268   :  { %2621 = vtanh.f32 %v881_v1  ;;  %v966_v8 = vadd.f32 %v2614_v48, %v965_v2  ;;  %v2560_v1 = vld [vmem:[#allocation13 + $0x140] sm:$0xff]  ;;  %v2581_v48 = vld [vmem:[#allocation16 + $0xa8] sm:$0xff] }
 0x269   :  { %v2568_v2 = vld [vmem:[#allocation13 + $0x1c0] sm:$0xff] }
 0x26b   :  { %1489 = vmatpush.bf16.msra.mxu0 %v2560_v1 }
 0x26d   :  { %v882_v3 = vpop.f32.mrf.mxu0  ;;  %v1094_v26 = vpop.f32.mrf.mxu3 }
 0x26e   :  { %v2622_v4 = vpop.eup %2621  ;;  %v2583_v3 = vld [vmem:[#allocation16 + $0xb8] sm:$0xff] }
 0x26f   :  { %v969_v5 = vmul.f32 1.442695, %v2622_v4  ;;  %973 = vadd.xlane.f32.xlu0 %v2622_v4  ;;  %v967_v6 = vpop.f32.mrf.mxu1  ;;  %v2591_v4 = vld [vmem:[#allocation16 + $0xf8] sm:$0xff]  ;;  %1656 = vmatpush.bf16.msra.mxu2 %v2583_v3 }
 0x270   :  { %1741 = vmatpush.bf16.msra.mxu3 %v2591_v4  ;;  %v2590_v6 = vld [vmem:[#allocation16 + $0xf0] sm:$0xff] }
 0x271   :  { %2623 = vpow2.f32 %v969_v5  ;;  %v2582_v5 = vld [vmem:[#allocation16 + $0xb0] sm:$0xff] }
 0x273   :  { %1657 = vmatpush.bf16.msra.mxu2 %v2582_v5 }
 0x274   :  { %1742 = vmatpush.bf16.msra.mxu3 %v2590_v6 }
 0x275   :  { %v1096_v31 = vpop.f32.mrf.mxu3 }
 0x276   :  { %v2576_v31 = vld [vmem:[#allocation16 + $0x80] sm:$0xff] }
 0x277   :  { %v2624_v7 = vpop.eup %2623  ;;  %1658 = vmatpush.bf16.msra.mxu2 %v2581_v48 }
 0x278   :  { %v971_v9 = vmul.f32 %v2624_v7, %v195_v42  ;;  %v2571_v42 = vld [vmem:[#allocation13 + $0x1d8] sm:$0xff]  ;;  %v2589_v7 = vld [vmem:[#allocation16 + $0xe8] sm:$0xff] }
 0x279   :  { %1573 = vmatpush.bf16.msra.mxu1 %v2571_v42  ;;  %1743 = vmatpush.bf16.msra.mxu3 %v2589_v7 }
 0x27a   :  { %v3017_v10 = vadd.f32 %v971_v9, %v966_v8  ;;  %v2580_v8 = vld [vmem:[#allocation16 + $0xa0] sm:$0xff] }
 0x27b   :  { %v2588_v9 = vld [vmem:[#allocation16 + $0xe0] sm:$0xff]  ;;  %1659 = vmatpush.bf16.msra.mxu2 %v2580_v8 }
 0x27c   :  { %v1115_v11 = vpack.c.bf16 %v3017_v10, %v3017_v10 }
 0x27d   :  { %1574 = vmatpush.bf16.msra.mxu1 %v2570_v46  ;;  %1744 = vmatpush.bf16.msra.mxu3 %v2588_v9 }
 0x27e   :  { %1204 = vmatmul.bf16.vlgmr.msrb.gmra.mxu0 %v1115_v11  ;;  %1217 = vmatmul.bf16.vlgmr.msrb.gmra.mxu1 %v1115_v11  ;;  %v2579_v11 = vld [vmem:[#allocation16 + $0x98] sm:$0xff] }
 0x27f   :  { %1660 = vmatpush.bf16.msra.mxu2 %v2579_v11 }
 0x281   :  { %1575 = vmatpush.bf16.msra.mxu1 %v2569_v0  ;;  %1745 = vmatpush.bf16.msra.mxu3 %v2587_v12  ;;  %v1762_v0 = vand.u32 127, %v1761_v63 }
 0x283   :  { %1661 = vmatpush.bf16.msra.mxu2 %v2578_v13  ;;  %vm1763_vm14 = vcmp.eq.s32.totalorder %v1762_v0, 4 }
 0x285   :  { %1576 = vmatpush.bf16.msra.mxu1 %v2568_v2  ;;  %1746 = vmatpush.bf16.msra.mxu3 %v2586_v14 }
 0x287   :  { %1662 = vmatpush.bf16.msra.mxu2 %v2577_v29 }
 0x289   :  { %1747 = vmatpush.bf16.msra.mxu3 %v2585_v30 }
 0x28b   :  { %1663 = vmatpush.bf16.msra.mxu2 %v2576_v31 }
 0x28d   :  { %1748 = vmatpush.bf16.msra.mxu3 %v2584_v33 }
 0x2fb   :  { %v1205_v51 = vpop.f32.mrf.mxu0  ;;  %v1218_v52 = vpop.f32.mrf.mxu1 }
 0x2fc   :  { %v1206_v53 = vadd.f32 %v1205_v51, %v1081_v22  ;;  %v1219_v54 = vadd.f32 %v1218_v52, %v1094_v26  ;;  %v2619_v51 = vld [vmem:[%s3045_s10 + $0x2] ss:$0 sm:$0xff] }
 0x2fe   :  { %v1229_v55 = vadd.f32 %v1225_v49, %v1206_v53  ;;  %v1230_v56 = vadd.f32 %v1226_v50, %v1219_v54 }
 0x300   :  { %vm1231_vm8 = vcmp.ge.f32.partialorder %v1229_v55, 0.0  ;;  %v1233_v57 = vmul.f32 0.01, %v1229_v55  ;;  %vm1232_vm9 = vcmp.ge.f32.partialorder %v1230_v56, 0.0  ;;  %v1234_v58 = vmul.f32 0.01, %v1230_v56 }
 0x302   :  { %v1235_v32 = vsel %vm1231_vm8, %v1229_v55, %v1233_v57  ;;  %v1236_v45 = vsel %vm1232_vm9, %v1230_v56, %v1234_v58 }
 0x303   :  { %v1254_v59 = vpack.c.bf16 %v1235_v32, %v1235_v32  ;;  %v1341_v60 = vpack.c.bf16 %v1236_v45, %v1236_v45  ;;  %v1207_v61 = vpop.f32.mrf.mxu0  ;;  %v1220_v62 = vpop.f32.mrf.mxu1  ;;  %v2620_v32 = vld [vmem:[%s3045_s10 + $0x3] ss:$0 sm:$0xff] }
 0x304   :  { %v974_v62 = vpop.xlane.xlu0 %973 }
 0x305   :  { %1316 = vmatmul.bf16.vlgmr.msrb.gmra.mxu2 %v1254_v59  ;;  %1403 = vmatmul.bf16.vlgmr.msrb.gmra.mxu3 %v1341_v60 }
 0x388   :  { %v1317_v17 = vpop.f32.mrf.mxu2  ;;  %v1404_v18 = vpop.f32.mrf.mxu3 }
 0x389   :  { %v1318_v19 = vadd.f32 %v2615_v15, %v1317_v17  ;;  %v1405_v20 = vadd.f32 %v2616_v16, %v1404_v18 }
 0x38b   :  { %vm1321_vm10 = vcmp.ge.f32.partialorder %v1318_v19, 0.0  ;;  %v1322_v21 = vmul.f32 0.01, %v1318_v19  ;;  %vm1408_vm11 = vcmp.ge.f32.partialorder %v1405_v20, 0.0  ;;  %v1409_v22 = vmul.f32 0.01, %v1405_v20 }
 0x38d   :  { %v1323_v23 = vsel %vm1321_vm10, %v1318_v19, %v1322_v21  ;;  %v1410_v24 = vsel %vm1408_vm11, %v1405_v20, %v1409_v22 }
 0x38e   :  { %v1428_v25 = vpack.c.bf16 %v1323_v23, %v1323_v23  ;;  %v1515_v26 = vpack.c.bf16 %v1410_v24, %v1410_v24 }
 0x390   :  { %v1319_v27 = vpop.f32.mrf.mxu2  ;;  %v1406_v28 = vpop.f32.mrf.mxu3  ;;  %1490 = vmatmul.bf16.vlgmr.msra.gmra.mxu0 %v1428_v25  ;;  %1577 = vmatmul.bf16.vlgmr.msra.gmra.mxu1 %v1515_v26 }
 0x40d   :  { %v1491_v36 = vpop.f32.mrf.mxu0  ;;  %v1578_v37 = vpop.f32.mrf.mxu1 }
 0x40e   :  { %v1492_v38 = vadd.f32 %v2617_v34, %v1491_v36  ;;  %v1579_v39 = vadd.f32 %v2618_v35, %v1578_v37 }
 0x410   :  { %vm1495_vm12 = vcmp.ge.f32.partialorder %v1492_v38, 0.0  ;;  %v1496_v40 = vmul.f32 0.01, %v1492_v38  ;;  %vm1582_vm13 = vcmp.ge.f32.partialorder %v1579_v39, 0.0  ;;  %v1583_v41 = vmul.f32 0.01, %v1579_v39 }
 0x412   :  { %v1497_v42 = vsel %vm1495_vm12, %v1492_v38, %v1496_v40  ;;  %v1584_v43 = vsel %vm1582_vm13, %v1579_v39, %v1583_v41 }
 0x413   :  { %v1602_v44 = vpack.c.bf16 %v1497_v42, %v1497_v42  ;;  %v1687_v46 = vpack.c.bf16 %v1584_v43, %v1584_v43 }
 0x415   :  { %v1493_v49 = vpop.f32.mrf.mxu0  ;;  %v1580_v50 = vpop.f32.mrf.mxu1  ;;  %1664 = vmatmul.bf16.vlgmr.msra.gmra.mxu2 %v1602_v44  ;;  %1749 = vmatmul.bf16.vlgmr.msra.gmra.mxu3 %v1687_v46 }
 0x498   :  { %v1665_v52 = vpop.f32.mrf.mxu2  ;;  %v1750_v53 = vpop.f32.mrf.mxu3 }
 0x499   :  { %v1666_v54 = vadd.f32 %v2619_v51, %v1665_v52  ;;  %v1751_v59 = vadd.f32 %v2620_v32, %v1750_v53 }
 0x49b   :  { %2625 = vtanh.f32 %v1666_v54 }
 0x4a0   :  { %v1667_v55 = vpop.f32.mrf.mxu2  ;;  %v1752_v56 = vpop.f32.mrf.mxu3 }
 0x4a1   :  { %v2626_v57 = vpop.eup %2625 }
 0x4a2   :  { %v1754_v58 = vmul.f32 1.442695, %v2626_v57  ;;  %1758 = vadd.xlane.f32.xlu0 %v2626_v57 }
 0x4a4   :  { %2627 = vpow2.f32 %v1754_v58 }
 0x4aa   :  { %v2628_v45 = vpop.eup %2627 }
 0x4ab   :  { %v1756_v60 = vmul.f32 %v2628_v45, %v2996_v47 }
 0x4ad   :  { %v1757_v61 = vadd.f32 %v1756_v60, %v1751_v59 }
 0x4af   :  { %1766 = vst [vmem:[#allocation17 + $0x8] sm:$0xff] %v1757_v61 }
 0x515   :  { %v1759_v1 = vpop.xlane.xlu0 %1758 }
 0x516   :  { %v1760_v2 = vadd.f32 %v1759_v1, %v974_v62 }
 0x518   :  { %v1764_v3 = vsel %vm1763_vm14, %v1760_v2, %v3017_v10 }
 0x519   :  { %1765 = vst [vmem:[#allocation17] sm:$0xff] %v1764_v3 }
 0x51a   :  { %1777 = dma.vmem_to_hbm [thread:$0]  %s1773_s29, 256, %s1775_s30, [#allocation4]  }
 0x51b   :  { %2879 = dma.done.wait [#allocation4], 256  }
 0x51c   :  { %2880 = vsyncadd [#allocation4], 4294967040 }
 0x51d   :  { %1782 = vsyncpa [#allocation3], 1 }
 0x51e   :  { %1783 = vsyncpa [#allocation6], 1 }
 0x51f   :  { %1784 = vsyncpa [#allocation9], 1 }
 0x520   :  { %1785 = vsyncpa [#allocation12], 1 }
 0x521   :  { %1786 = vsyncpa [#allocation15], 1 }
 0x522   :  { %1787 = vsyncpa [#allocation4], 1 }

</bundles_post_ra>
